<compile_context>
chip_gen: v6e
topology: v6e:2x2x1
jax: 0.10.0
libtpu: 0.0.40
codegen_flags: <defaults>
</compile_context>

<pallas_src>
import functools
import math

import jax
import jax.numpy as jnp
from jax import lax
from jax.experimental import pallas as pl
from jax.experimental.pallas import tpu as pltpu


# --------------------------------------------------------------------------- #
# helpers
# --------------------------------------------------------------------------- #
def _layernorm(x, gamma, beta, eps):
    """LayerNorm in f32; gamma/beta kept 2-D (1, D) and broadcast."""
    mean = jnp.mean(x, axis=-1, keepdims=True)
    var = jnp.mean((x - mean) ** 2, axis=-1, keepdims=True)
    return (x - mean) * lax.rsqrt(var + eps) * gamma + beta


def _pick_tile(n, candidates):
    for c in candidates:
        if n >= c and n % c == 0:
            return c
    return n


def _pick_chunk(n, candidates):
    for c in candidates:
        if n >= c and n % c == 0:
            return c
    return n


# --------------------------------------------------------------------------- #
# fused kernel: (per batch, per query tile)
#   i == 0 : project K, V for the whole sequence into head-major VMEM scratch
#   every i: Q proj -> per-head attention -> out-proj + residual -> MLP + residual
# --------------------------------------------------------------------------- #
def _rev_block_kernel(num_heads, kv_chunk, mlp_chunk,
                      x1_ref, x2_ref,
                      lnf_g_ref, lnf_b_ref,
                      wq_ref, bq_ref, wk_ref, bk_ref, wv_ref, bv_ref,
                      wo_ref, bo_ref,
                      lng_g_ref, lng_b_ref,
                      w1_ref, b1_ref, w2_ref, b2_ref,
                      y1_ref, y2_ref,
                      kv_ref):
    i = pl.program_id(1)
    N, D = x2_ref.shape[1], x2_ref.shape[2]
    tq = x1_ref.shape[1]
    hd = D // num_heads
    cdtype = kv_ref.dtype

    # ---------- once per batch: K/V projection into head-major VMEM scratch ----
    # TODO(synk): for hd == 64 the head-major scratch pads each head to 128 lanes
    # (2x VMEM); packing two 64-wide heads per 128-lane group would reclaim it.
    @pl.when(i == 0)
    def _():
        for c in range(N // kv_chunk):
            r0 = c * kv_chunk
            xc = x2_ref[0, pl.ds(r0, kv_chunk), :]                          # f32
            xn = _layernorm(xc, lnf_g_ref[...], lnf_b_ref[...], 1e-6).astype(cdtype)
            kc = jnp.dot(xn, wk_ref[...],
                         preferred_element_type=jnp.float32) + bk_ref[...]
            vc = jnp.dot(xn, wv_ref[...],
                         preferred_element_type=jnp.float32) + bv_ref[...]
            for h in range(num_heads):
                lo = h * hd
                kv_ref[0, h, pl.ds(r0, kv_chunk), :] = kc[:, lo:lo + hd].astype(cdtype)
                kv_ref[1, h, pl.ds(r0, kv_chunk), :] = vc[:, lo:lo + hd].astype(cdtype)

    # ---------- per query tile ----------
    row0 = pl.multiple_of(i * tq, tq)
    x2_t = x2_ref[0, pl.ds(row0, tq), :]                                     # (tq, D) f32
    xn_q = _layernorm(x2_t, lnf_g_ref[...], lnf_b_ref[...], 1e-6).astype(cdtype)
    # 1/sqrt(hd) is folded into wq / bq by the wrapper.
    q = (jnp.dot(xn_q, wq_ref[...], preferred_element_type=jnp.float32)
         + bq_ref[...]).astype(cdtype)                                       # (tq, D) bf16

    # F: multi-head attention; accumulate out-projection per head into f32 residual.
    # TODO(synk): for num_heads >= 8, a lax.fori_loop over heads with a lane-aligned
    # head-major Q scratch would bound the live range of the (tq, N) temporaries.
    acc = x1_ref[0] + bo_ref[...]                                            # (tq, D) f32
    for h in range(num_heads):
        lo = h * hd
        qh = q[:, lo:lo + hd]                                                # (tq, hd)
        kh = kv_ref[0, h]                                                    # (N, hd)
        vh = kv_ref[1, h]                                                    # (N, hd)
        s = lax.dot_general(qh, kh, (((1,), (1,)), ((), ())),
                            preferred_element_type=jnp.float32)              # (tq, N) f32
        m = jnp.max(s, axis=-1, keepdims=True)
        p = jnp.exp(s - m)
        l = jnp.sum(p, axis=-1, keepdims=True)                               # (tq, 1)
        oh = jnp.dot(p.astype(cdtype), vh,
                     preferred_element_type=jnp.float32)                     # (tq, hd) f32
        oh = oh * pl.reciprocal(l, approx=True)       # normalize AFTER the PV matmul
        acc = acc + jnp.dot(oh.astype(cdtype), wo_ref[lo:lo + hd, :],
                            preferred_element_type=jnp.float32)
    y1_ref[0] = acc.astype(y1_ref.dtype)                                     # Y_1

    # G: LayerNorm(1e-5) -> Linear -> exact GELU -> Linear, hidden chunked.
    yn = _layernorm(acc, lng_g_ref[...], lng_b_ref[...], 1e-5).astype(cdtype)
    hidden = w1_ref.shape[-1]
    inv_sqrt2 = 1.0 / math.sqrt(2.0)
    g = x2_t + b2_ref[...]                              # init accumulator from residual + bias
    for c in range(hidden // mlp_chunk):
        lo = c * mlp_chunk
        h1 = (jnp.dot(yn, w1_ref[:, lo:lo + mlp_chunk],
                      preferred_element_type=jnp.float32)
              + b1_ref[:, lo:lo + mlp_chunk])
        h1 = 0.5 * h1 * (1.0 + lax.erf(h1 * inv_sqrt2))                      # exact GELU
        g = g + jnp.dot(h1.astype(cdtype), w2_ref[lo:lo + mlp_chunk, :],
                        preferred_element_type=jnp.float32)
    y2_ref[0] = g.astype(y2_ref.dtype)                                       # Y_2


# --------------------------------------------------------------------------- #
# wrapper
# --------------------------------------------------------------------------- #
def reversible_block(x1, x2, params, num_heads, *,
                     q_tile=None, compute_dtype=jnp.bfloat16):
    B, N, D = x1.shape
    hidden = params["w1_t"].shape[-1]
    hd = D // num_heads
    assert hd * num_heads == D

    # Generation-aware sizing (v7x has 64 MiB per-TC VMEM; v5e/v6e have 128 MiB).
    try:
        vmem_cap = int(pltpu.get_tpu_info().vmem_capacity_bytes)
    except Exception:
        vmem_cap = 64 << 20          # conservative default (v7x per-TC)
    big_vmem = vmem_cap >= (100 << 20)

    q_tile = q_tile or _pick_tile(N, (512, 256, 128) if big_vmem else (256, 128))
    assert N % q_tile == 0
    kv_chunk = _pick_tile(N, (512, 256, 128))
    mlp_chunk = _pick_chunk(hidden, (2048, 1024, 512) if big_vmem else (1024, 512))

    # Fold the attention scale into the Q projection; split Wqkv; cast matmul
    # weights to bf16 (f32 accumulation happens inside the kernel); biases stay f32.
    scale = 1.0 / math.sqrt(hd)
    wqkv = params["wqkv_t"].astype(jnp.float32)
    bqkv = params["bqkv"].astype(jnp.float32)
    wq = (wqkv[:, :D] * scale).astype(compute_dtype)
    wk = wqkv[:, D:2 * D].astype(compute_dtype)
    wv = wqkv[:, 2 * D:].astype(compute_dtype)
    bq = bqkv[:, :D] * scale
    bk = bqkv[:, D:2 * D]
    bv = bqkv[:, 2 * D:]
    wo = params["wo_t"].astype(compute_dtype)
    w1 = params["w1_t"].astype(compute_dtype)
    w2 = params["w2_t"].astype(compute_dtype)
    lnf_g, lnf_b = params["lnf_g"], params["lnf_b"]
    lng_g, lng_b = params["lng_g"], params["lng_b"]
    bo, b1, b2 = params["bo"], params["b1"], params["b2"]

    f32 = 4
    cb = jnp.dtype(compute_dtype).itemsize
    hd_pad = max(hd, 128)            # head slabs are lane-padded to 128

    def _estimate(weight_bufs):
        weights = weight_bufs * ((4 * D * D + 2 * D * hidden) * cb
                                 + (7 * D + hidden) * f32)
        blocks = (2 * q_tile * D * f32              # x1 (double-buffered)
                  + 2 * N * D * f32                 # x2 full sequence (double-buffered)
                  + 2 * 2 * q_tile * D * f32)       # y1, y2 outputs
        scratch = 2 * num_heads * N * hd_pad * cb   # head-major K/V scratch
        tmp = (2 * q_tile * N * f32                 # per-head scores / probs
               + 6 * q_tile * D * f32               # q / acc / yn / g / residual temps
               + q_tile * mlp_chunk * (f32 + cb)    # GELU intermediate
               + 4 * kv_chunk * D * f32)            # i==0 K/V chunk temporaries
        return weights + blocks + scratch + tmp

    tok = lambda b, i: (b, i, 0)
    full_seq = lambda b, i: (b, 0, 0)

    def _run(weight_mode):
        # Weights have a constant block index across the grid -> single-buffer them.
        def wspec(arr):
            shp = arr.shape
            if weight_mode is None:
                return pl.BlockSpec(shp, lambda b, i: (0,) * len(shp))
            return pl.BlockSpec(shp, lambda b, i: (0,) * len(shp),
                                pipeline_mode=weight_mode)

        wbuf = 1 if weight_mode is not None else 2
        est = _estimate(wbuf)
        vmem_limit = int(min(0.8 * vmem_cap, max(32 << 20, int(est * 1.25))))

        kernel = functools.partial(_rev_block_kernel, num_heads, kv_chunk, mlp_chunk)
        return pl.pallas_call(
            kernel,
            out_shape=(jax.ShapeDtypeStruct((B, N, D), x1.dtype),
                       jax.ShapeDtypeStruct((B, N, D), x2.dtype)),
            grid_spec=pltpu.PrefetchScalarGridSpec(
                num_scalar_prefetch=0,
                grid=(B, N // q_tile),
                in_specs=[pl.BlockSpec((1, q_tile, D), tok),      # x1 (query tile)
                          pl.BlockSpec((1, N, D), full_seq),      # x2 (full sequence)
                          wspec(lnf_g), wspec(lnf_b),
                          wspec(wq), wspec(bq), wspec(wk), wspec(bk),
                          wspec(wv), wspec(bv),
                          wspec(wo), wspec(bo),
                          wspec(lng_g), wspec(lng_b),
                          wspec(w1), wspec(b1), wspec(w2), wspec(b2)],
                out_specs=[pl.BlockSpec((1, q_tile, D), tok)] * 2,
                scratch_shapes=[pltpu.VMEM((2, num_heads, N, hd), compute_dtype)],
            ),
            compiler_params=pltpu.CompilerParams(
                dimension_semantics=("parallel", "arbitrary"),
                vmem_limit_bytes=vmem_limit),
        )(x1, x2, lnf_g, lnf_b, wq, bq, wk, bk, wv, bv, wo, bo,
          lng_g, lng_b, w1, b1, w2, b2)

    try:
        return _run(pl.Buffered(1))
    except Exception:
        # Fallback for Pallas versions without single-buffer pipeline_mode support.
        # Genuine lowering errors will also fail in this path and propagate.
        return _run(None)


# --------------------------------------------------------------------------- #
# pure-JAX reference (f32, matches the PyTorch module)
# --------------------------------------------------------------------------- #
def reversible_block_ref(x1, x2, params, num_heads):
    B, N, D = x1.shape
    hd = D // num_heads
    scale = 1.0 / math.sqrt(hd)

    xn = _layernorm(x2, params["lnf_g"], params["lnf_b"], 1e-6)
    qkv = xn @ params["wqkv_t"] + params["bqkv"]
    q, k, v = qkv[..., :D], qkv[..., D:2 * D], qkv[..., 2 * D:]
    qh = q.reshape(B, N, num_heads, hd).transpose(0, 2, 1, 3)
    kh = k.reshape(B, N, num_heads, hd).transpose(0, 2, 1, 3)
    vh = v.reshape(B, N, num_heads, hd).transpose(0, 2, 1, 3)
    s = jnp.einsum("bhqd,bhkd->bhqk", qh, kh) * scale
    p = jax.nn.softmax(s, axis=-1)
    o = jnp.einsum("bhqk,bhkd->bhqd", p, vh).transpose(0, 2, 1, 3).reshape(B, N, D)
    f_x2 = o @ params["wo_t"] + params["bo"]
    y1 = x1 + f_x2

    yn = _layernorm(y1, params["lng_g"], params["lng_b"], 1e-5)
    h1 = yn @ params["w1_t"] + params["b1"]
    h1 = 0.5 * h1 * (1.0 + lax.erf(h1 / math.sqrt(2.0)))
    g_y1 = h1 @ params["w2_t"] + params["b2"]
    y2 = x2 + g_y1
    return y1, y2


def make_params(key, dim, mlp_ratio=4):
    ks = jax.random.split(key, 8)
    hidden = dim * mlp_ratio
    return {
        # LayerNorm of F (eps 1e-6) and G (eps 1e-5)
        "lnf_g": jnp.ones((1, dim), jnp.float32),
        "lnf_b": jnp.zeros((1, dim), jnp.float32),
        "lng_g": jnp.ones((1, dim), jnp.float32),
        "lng_b": jnp.zeros((1, dim), jnp.float32),
        # MHA in-proj / out-proj (stored pre-transposed: (in, out))
        "wqkv_t": (jax.random.normal(ks[0], (dim, 3 * dim)) * 0.02).astype(jnp.float32),
        "bqkv": (jax.random.normal(ks[1], (1, 3 * dim)) * 0.02).astype(jnp.float32),
        "wo_t": (jax.random.normal(ks[2], (dim, dim)) * 0.02).astype(jnp.float32),
        "bo": (jax.random.normal(ks[3], (1, dim)) * 0.02).astype(jnp.float32),
        # MLP
        "w1_t": (jax.random.normal(ks[4], (dim, hidden)) * 0.02).astype(jnp.float32),
        "b1": (jax.random.normal(ks[5], (1, hidden)) * 0.02).astype(jnp.float32),
        "w2_t": (jax.random.normal(ks[6], (hidden, dim)) * 0.02).astype(jnp.float32),
        "b2": (jax.random.normal(ks[7], (1, dim)) * 0.02).astype(jnp.float32),
    }


if __name__ == "__main__":
    B, N, D, H = 2, 16, 32, 4

    key = jax.random.PRNGKey(0)
    k1, k2, kp = jax.random.split(key, 3)
    x1 = jax.random.normal(k1, (B, N, D), jnp.float32)
    x2 = jax.random.normal(k2, (B, N, D), jnp.float32)
    params = make_params(kp, D)

    # q_tile = 8 so the (batch, query-tile) grid and the i==0 K/V path are exercised.
    y1, y2 = reversible_block(x1, x2, params, H, q_tile=8)
    jax.block_until_ready((y1, y2))

    y1_ref, y2_ref = reversible_block_ref(x1, x2, params, H)
    # bf16 matmul operands (f32 accumulation) + approx-reciprocal softmax
    # => compare against the f32 reference with a bf16-appropriate tolerance.
    assert jnp.allclose(y1, y1_ref, atol=2e-2, rtol=2e-2), "Y_1 mismatch"
    assert jnp.allclose(y2, y2_ref, atol=2e-2, rtol=2e-2), "Y_2 mismatch"

    print("KERNEL_OK")
</pallas_src>

<mosaic_0001>
module attributes {stable_mosaic.version = 11 : i64} {
  func.func @_rev_block_kernel(%arg0: i32, %arg1: i32, %arg2: memref<1x8x32xf32, #tpu.memory_space<vmem>>, %arg3: memref<1x16x32xf32, #tpu.memory_space<vmem>>, %arg4: memref<1x32xf32, #tpu.memory_space<vmem>>, %arg5: memref<1x32xf32, #tpu.memory_space<vmem>>, %arg6: memref<32x32xbf16, #tpu.memory_space<vmem>>, %arg7: memref<1x32xf32, #tpu.memory_space<vmem>>, %arg8: memref<32x32xbf16, #tpu.memory_space<vmem>>, %arg9: memref<1x32xf32, #tpu.memory_space<vmem>>, %arg10: memref<32x32xbf16, #tpu.memory_space<vmem>>, %arg11: memref<1x32xf32, #tpu.memory_space<vmem>>, %arg12: memref<32x32xbf16, #tpu.memory_space<vmem>>, %arg13: memref<1x32xf32, #tpu.memory_space<vmem>>, %arg14: memref<1x32xf32, #tpu.memory_space<vmem>>, %arg15: memref<1x32xf32, #tpu.memory_space<vmem>>, %arg16: memref<32x128xbf16, #tpu.memory_space<vmem>>, %arg17: memref<1x128xf32, #tpu.memory_space<vmem>>, %arg18: memref<128x32xbf16, #tpu.memory_space<vmem>>, %arg19: memref<1x32xf32, #tpu.memory_space<vmem>>, %arg20: memref<1x8x32xf32, #tpu.memory_space<vmem>>, %arg21: memref<1x8x32xf32, #tpu.memory_space<vmem>>, %arg22: memref<2x4x16x8xbf16, #tpu.memory_space<vmem>>) attributes {dimension_semantics = [#tpu.dimension_semantics<parallel>, #tpu.dimension_semantics<arbitrary>], iteration_bounds = array<i64: 2, 2>, scalar_prefetch = 0 : i64, scratch_operands = 1 : i64, tpu.core_type = #tpu.core_type<tc>, window_params = [{transform_indices = @transform_0, window_bounds = array<i64: 1, 8, 32>}, {transform_indices = @transform_1, window_bounds = array<i64: 1, 16, 32>}, {pipeline_mode = #tpu.pipeline_mode<synchronous>, transform_indices = @transform_2, window_bounds = array<i64: 1, 32>}, {pipeline_mode = #tpu.pipeline_mode<synchronous>, transform_indices = @transform_3, window_bounds = array<i64: 1, 32>}, {pipeline_mode = #tpu.pipeline_mode<synchronous>, transform_indices = @transform_4, window_bounds = array<i64: 32, 32>}, {pipeline_mode = #tpu.pipeline_mode<synchronous>, transform_indices = @transform_5, window_bounds = array<i64: 1, 32>}, {pipeline_mode = #tpu.pipeline_mode<synchronous>, transform_indices = @transform_6, window_bounds = array<i64: 32, 32>}, {pipeline_mode = #tpu.pipeline_mode<synchronous>, transform_indices = @transform_7, window_bounds = array<i64: 1, 32>}, {pipeline_mode = #tpu.pipeline_mode<synchronous>, transform_indices = @transform_8, window_bounds = array<i64: 32, 32>}, {pipeline_mode = #tpu.pipeline_mode<synchronous>, transform_indices = @transform_9, window_bounds = array<i64: 1, 32>}, {pipeline_mode = #tpu.pipeline_mode<synchronous>, transform_indices = @transform_10, window_bounds = array<i64: 32, 32>}, {pipeline_mode = #tpu.pipeline_mode<synchronous>, transform_indices = @transform_11, window_bounds = array<i64: 1, 32>}, {pipeline_mode = #tpu.pipeline_mode<synchronous>, transform_indices = @transform_12, window_bounds = array<i64: 1, 32>}, {pipeline_mode = #tpu.pipeline_mode<synchronous>, transform_indices = @transform_13, window_bounds = array<i64: 1, 32>}, {pipeline_mode = #tpu.pipeline_mode<synchronous>, transform_indices = @transform_14, window_bounds = array<i64: 32, 128>}, {pipeline_mode = #tpu.pipeline_mode<synchronous>, transform_indices = @transform_15, window_bounds = array<i64: 1, 128>}, {pipeline_mode = #tpu.pipeline_mode<synchronous>, transform_indices = @transform_16, window_bounds = array<i64: 128, 32>}, {pipeline_mode = #tpu.pipeline_mode<synchronous>, transform_indices = @transform_17, window_bounds = array<i64: 1, 32>}, {transform_indices = @transform_18, window_bounds = array<i64: 1, 8, 32>}, {transform_indices = @transform_19, window_bounds = array<i64: 1, 8, 32>}]} {
    %c0_i32 = arith.constant 0 : i32
    %0 = arith.cmpi eq, %arg1, %c0_i32 : i32
    %1 = arith.extui %0 : i1 to i32
    %c0_i32_0 = arith.constant 0 : i32
    %2 = arith.cmpi ne, %1, %c0_i32_0 : i32
    scf.if %2 {
      %c0_102 = arith.constant 0 : index
      %c0_103 = arith.constant 0 : index
      %c0_104 = arith.constant 0 : index
      %183 = vector.load %arg3[%c0_102, %c0_103, %c0_104] : memref<1x16x32xf32, #tpu.memory_space<vmem>>, vector<1x16x32xf32>
      %184 = vector.shape_cast %183 : vector<1x16x32xf32> to vector<16x32xf32>
      %c0_105 = arith.constant 0 : index
      %c0_106 = arith.constant 0 : index
      %185 = vector.load %arg4[%c0_105, %c0_106] : memref<1x32xf32, #tpu.memory_space<vmem>>, vector<1x32xf32>
      %c0_107 = arith.constant 0 : index
      %c0_108 = arith.constant 0 : index
      %186 = vector.load %arg5[%c0_107, %c0_108] : memref<1x32xf32, #tpu.memory_space<vmem>>, vector<1x32xf32>
      %cst_109 = arith.constant dense<0.000000e+00> : vector<16xf32>
      %187 = vector.multi_reduction <add>, %184, %cst_109 [1] : vector<16x32xf32> to vector<16xf32>
      %188 = vector.shape_cast %187 : vector<16xf32> to vector<16x1xf32>
      %cst_110 = arith.constant 3.200000e+01 : f32
      %189 = vector.broadcast %cst_110 : f32 to vector<16x1xf32>
      %190 = arith.divf %188, %189 : vector<16x1xf32>
      %191 = vector.broadcast %190 : vector<16x1xf32> to vector<16x32xf32>
      %192 = arith.subf %184, %191 : vector<16x32xf32>
      %193 = arith.mulf %192, %192 : vector<16x32xf32>
      %cst_111 = arith.constant dense<0.000000e+00> : vector<16xf32>
      %194 = vector.multi_reduction <add>, %193, %cst_111 [1] : vector<16x32xf32> to vector<16xf32>
      %195 = vector.shape_cast %194 : vector<16xf32> to vector<16x1xf32>
      %cst_112 = arith.constant 3.200000e+01 : f32
      %196 = vector.broadcast %cst_112 : f32 to vector<16x1xf32>
      %197 = arith.divf %195, %196 : vector<16x1xf32>
      %198 = vector.broadcast %190 : vector<16x1xf32> to vector<16x32xf32>
      %199 = arith.subf %184, %198 : vector<16x32xf32>
      %cst_113 = arith.constant 9.99999997E-7 : f32
      %200 = vector.broadcast %cst_113 : f32 to vector<16x1xf32>
      %201 = arith.addf %197, %200 : vector<16x1xf32>
      %202 = math.rsqrt %201 : vector<16x1xf32>
      %203 = vector.broadcast %202 : vector<16x1xf32> to vector<16x32xf32>
      %204 = arith.mulf %199, %203 : vector<16x32xf32>
      %205 = vector.broadcast %185 : vector<1x32xf32> to vector<16x32xf32>
      %206 = arith.mulf %204, %205 : vector<16x32xf32>
      %207 = vector.broadcast %186 : vector<1x32xf32> to vector<16x32xf32>
      %208 = arith.addf %206, %207 : vector<16x32xf32>
      %209 = arith.truncf %208 : vector<16x32xf32> to vector<16x32xbf16>
      %c0_114 = arith.constant 0 : index
      %c0_115 = arith.constant 0 : index
      %210 = vector.load %arg8[%c0_114, %c0_115] : memref<32x32xbf16, #tpu.memory_space<vmem>>, vector<32x32xbf16>
      %cst_116 = arith.constant dense<0.000000e+00> : vector<16x32xf32>
      %211 = tpu.matmul %209, %210, %cst_116 {dimension_numbers = #tpu.dot_dimension_numbers<[1], [0], [0], [1], [0, 0, 1, 1], [], []>} : vector<16x32xbf16>, vector<32x32xbf16>, vector<16x32xf32> -> vector<16x32xf32>
      %c0_117 = arith.constant 0 : index
      %c0_118 = arith.constant 0 : index
      %212 = vector.load %arg9[%c0_117, %c0_118] : memref<1x32xf32, #tpu.memory_space<vmem>>, vector<1x32xf32>
      %213 = vector.broadcast %212 : vector<1x32xf32> to vector<16x32xf32>
      %214 = arith.addf %211, %213 : vector<16x32xf32>
      %c0_119 = arith.constant 0 : index
      %c0_120 = arith.constant 0 : index
      %215 = vector.load %arg10[%c0_119, %c0_120] : memref<32x32xbf16, #tpu.memory_space<vmem>>, vector<32x32xbf16>
      %cst_121 = arith.constant dense<0.000000e+00> : vector<16x32xf32>
      %216 = tpu.matmul %209, %215, %cst_121 {dimension_numbers = #tpu.dot_dimension_numbers<[1], [0], [0], [1], [0, 0, 1, 1], [], []>} : vector<16x32xbf16>, vector<32x32xbf16>, vector<16x32xf32> -> vector<16x32xf32>
      %c0_122 = arith.constant 0 : index
      %c0_123 = arith.constant 0 : index
      %217 = vector.load %arg11[%c0_122, %c0_123] : memref<1x32xf32, #tpu.memory_space<vmem>>, vector<1x32xf32>
      %218 = vector.broadcast %217 : vector<1x32xf32> to vector<16x32xf32>
      %219 = arith.addf %216, %218 : vector<16x32xf32>
      %220 = vector.extract_strided_slice %214 {offsets = [0, 0], sizes = [16, 8], strides = [1, 1]} : vector<16x32xf32> to vector<16x8xf32>
      %221 = arith.truncf %220 : vector<16x8xf32> to vector<16x8xbf16>
      %c0_124 = arith.constant 0 : index
      %c0_125 = arith.constant 0 : index
      %c0_126 = arith.constant 0 : index
      %c0_127 = arith.constant 0 : index
      %222 = vector.load %arg22[%c0_124, %c0_125, %c0_126, %c0_127] : memref<2x4x16x8xbf16, #tpu.memory_space<vmem>>, vector<1x1x16x8xbf16>
      %223 = vector.shape_cast %222 : vector<1x1x16x8xbf16> to vector<16x8xbf16>
      %224 = vector.shape_cast %221 : vector<16x8xbf16> to vector<1x1x16x8xbf16>
      tpu.vector_store %arg22[%c0_124, %c0_125, %c0_126, %c0_127], %224 {strides = array<i32>} : memref<2x4x16x8xbf16, #tpu.memory_space<vmem>>, vector<1x1x16x8xbf16>,
      %225 = vector.extract_strided_slice %219 {offsets = [0, 0], sizes = [16, 8], strides = [1, 1]} : vector<16x32xf32> to vector<16x8xf32>
      %226 = arith.truncf %225 : vector<16x8xf32> to vector<16x8xbf16>
      %c1_128 = arith.constant 1 : index
      %c0_129 = arith.constant 0 : index
      %c0_130 = arith.constant 0 : index
      %c0_131 = arith.constant 0 : index
      %227 = vector.load %arg22[%c1_128, %c0_129, %c0_130, %c0_131] : memref<2x4x16x8xbf16, #tpu.memory_space<vmem>>, vector<1x1x16x8xbf16>
      %228 = vector.shape_cast %227 : vector<1x1x16x8xbf16> to vector<16x8xbf16>
      %229 = vector.shape_cast %226 : vector<16x8xbf16> to vector<1x1x16x8xbf16>
      tpu.vector_store %arg22[%c1_128, %c0_129, %c0_130, %c0_131], %229 {strides = array<i32>} : memref<2x4x16x8xbf16, #tpu.memory_space<vmem>>, vector<1x1x16x8xbf16>,
      %230 = vector.extract_strided_slice %214 {offsets = [0, 8], sizes = [16, 8], strides = [1, 1]} : vector<16x32xf32> to vector<16x8xf32>
      %231 = arith.truncf %230 : vector<16x8xf32> to vector<16x8xbf16>
      %c0_132 = arith.constant 0 : index
      %c1_133 = arith.constant 1 : index
      %c0_134 = arith.constant 0 : index
      %c0_135 = arith.constant 0 : index
      %232 = vector.load %arg22[%c0_132, %c1_133, %c0_134, %c0_135] : memref<2x4x16x8xbf16, #tpu.memory_space<vmem>>, vector<1x1x16x8xbf16>
      %233 = vector.shape_cast %232 : vector<1x1x16x8xbf16> to vector<16x8xbf16>
      %234 = vector.shape_cast %231 : vector<16x8xbf16> to vector<1x1x16x8xbf16>
      tpu.vector_store %arg22[%c0_132, %c1_133, %c0_134, %c0_135], %234 {strides = array<i32>} : memref<2x4x16x8xbf16, #tpu.memory_space<vmem>>, vector<1x1x16x8xbf16>,
      %235 = vector.extract_strided_slice %219 {offsets = [0, 8], sizes = [16, 8], strides = [1, 1]} : vector<16x32xf32> to vector<16x8xf32>
      %236 = arith.truncf %235 : vector<16x8xf32> to vector<16x8xbf16>
      %c1_136 = arith.constant 1 : index
      %c1_137 = arith.constant 1 : index
      %c0_138 = arith.constant 0 : index
      %c0_139 = arith.constant 0 : index
      %237 = vector.load %arg22[%c1_136, %c1_137, %c0_138, %c0_139] : memref<2x4x16x8xbf16, #tpu.memory_space<vmem>>, vector<1x1x16x8xbf16>
      %238 = vector.shape_cast %237 : vector<1x1x16x8xbf16> to vector<16x8xbf16>
      %239 = vector.shape_cast %236 : vector<16x8xbf16> to vector<1x1x16x8xbf16>
      tpu.vector_store %arg22[%c1_136, %c1_137, %c0_138, %c0_139], %239 {strides = array<i32>} : memref<2x4x16x8xbf16, #tpu.memory_space<vmem>>, vector<1x1x16x8xbf16>,
      %240 = vector.extract_strided_slice %214 {offsets = [0, 16], sizes = [16, 8], strides = [1, 1]} : vector<16x32xf32> to vector<16x8xf32>
      %241 = arith.truncf %240 : vector<16x8xf32> to vector<16x8xbf16>
      %c0_140 = arith.constant 0 : index
      %c2_141 = arith.constant 2 : index
      %c0_142 = arith.constant 0 : index
      %c0_143 = arith.constant 0 : index
      %242 = vector.load %arg22[%c0_140, %c2_141, %c0_142, %c0_143] : memref<2x4x16x8xbf16, #tpu.memory_space<vmem>>, vector<1x1x16x8xbf16>
      %243 = vector.shape_cast %242 : vector<1x1x16x8xbf16> to vector<16x8xbf16>
      %244 = vector.shape_cast %241 : vector<16x8xbf16> to vector<1x1x16x8xbf16>
      tpu.vector_store %arg22[%c0_140, %c2_141, %c0_142, %c0_143], %244 {strides = array<i32>} : memref<2x4x16x8xbf16, #tpu.memory_space<vmem>>, vector<1x1x16x8xbf16>,
      %245 = vector.extract_strided_slice %219 {offsets = [0, 16], sizes = [16, 8], strides = [1, 1]} : vector<16x32xf32> to vector<16x8xf32>
      %246 = arith.truncf %245 : vector<16x8xf32> to vector<16x8xbf16>
      %c1_144 = arith.constant 1 : index
      %c2_145 = arith.constant 2 : index
      %c0_146 = arith.constant 0 : index
      %c0_147 = arith.constant 0 : index
      %247 = vector.load %arg22[%c1_144, %c2_145, %c0_146, %c0_147] : memref<2x4x16x8xbf16, #tpu.memory_space<vmem>>, vector<1x1x16x8xbf16>
      %248 = vector.shape_cast %247 : vector<1x1x16x8xbf16> to vector<16x8xbf16>
      %249 = vector.shape_cast %246 : vector<16x8xbf16> to vector<1x1x16x8xbf16>
      tpu.vector_store %arg22[%c1_144, %c2_145, %c0_146, %c0_147], %249 {strides = array<i32>} : memref<2x4x16x8xbf16, #tpu.memory_space<vmem>>, vector<1x1x16x8xbf16>,
      %250 = vector.extract_strided_slice %214 {offsets = [0, 24], sizes = [16, 8], strides = [1, 1]} : vector<16x32xf32> to vector<16x8xf32>
      %251 = arith.truncf %250 : vector<16x8xf32> to vector<16x8xbf16>
      %c0_148 = arith.constant 0 : index
      %c3_149 = arith.constant 3 : index
      %c0_150 = arith.constant 0 : index
      %c0_151 = arith.constant 0 : index
      %252 = vector.load %arg22[%c0_148, %c3_149, %c0_150, %c0_151] : memref<2x4x16x8xbf16, #tpu.memory_space<vmem>>, vector<1x1x16x8xbf16>
      %253 = vector.shape_cast %252 : vector<1x1x16x8xbf16> to vector<16x8xbf16>
      %254 = vector.shape_cast %251 : vector<16x8xbf16> to vector<1x1x16x8xbf16>
      tpu.vector_store %arg22[%c0_148, %c3_149, %c0_150, %c0_151], %254 {strides = array<i32>} : memref<2x4x16x8xbf16, #tpu.memory_space<vmem>>, vector<1x1x16x8xbf16>,
      %255 = vector.extract_strided_slice %219 {offsets = [0, 24], sizes = [16, 8], strides = [1, 1]} : vector<16x32xf32> to vector<16x8xf32>
      %256 = arith.truncf %255 : vector<16x8xf32> to vector<16x8xbf16>
      %c1_152 = arith.constant 1 : index
      %c3_153 = arith.constant 3 : index
      %c0_154 = arith.constant 0 : index
      %c0_155 = arith.constant 0 : index
      %257 = vector.load %arg22[%c1_152, %c3_153, %c0_154, %c0_155] : memref<2x4x16x8xbf16, #tpu.memory_space<vmem>>, vector<1x1x16x8xbf16>
      %258 = vector.shape_cast %257 : vector<1x1x16x8xbf16> to vector<16x8xbf16>
      %259 = vector.shape_cast %256 : vector<16x8xbf16> to vector<1x1x16x8xbf16>
      tpu.vector_store %arg22[%c1_152, %c3_153, %c0_154, %c0_155], %259 {strides = array<i32>} : memref<2x4x16x8xbf16, #tpu.memory_space<vmem>>, vector<1x1x16x8xbf16>,
    } else {
    }
    %c8_i32 = arith.constant 8 : i32
    %3 = arith.muli %arg1, %c8_i32 : i32
    %4 = tpu.assume_multiple %3, 8 : i32
    %c0 = arith.constant 0 : index
    %5 = arith.index_cast %4 : i32 to index
    %c0_1 = arith.constant 0 : index
    %6 = vector.load %arg3[%c0, %5, %c0_1] : memref<1x16x32xf32, #tpu.memory_space<vmem>>, vector<1x8x32xf32>
    %7 = vector.shape_cast %6 : vector<1x8x32xf32> to vector<8x32xf32>
    %c0_2 = arith.constant 0 : index
    %c0_3 = arith.constant 0 : index
    %8 = vector.load %arg4[%c0_2, %c0_3] : memref<1x32xf32, #tpu.memory_space<vmem>>, vector<1x32xf32>
    %c0_4 = arith.constant 0 : index
    %c0_5 = arith.constant 0 : index
    %9 = vector.load %arg5[%c0_4, %c0_5] : memref<1x32xf32, #tpu.memory_space<vmem>>, vector<1x32xf32>
    %cst = arith.constant dense<0.000000e+00> : vector<8xf32>
    %10 = vector.multi_reduction <add>, %7, %cst [1] : vector<8x32xf32> to vector<8xf32>
    %11 = vector.shape_cast %10 : vector<8xf32> to vector<8x1xf32>
    %cst_6 = arith.constant 3.200000e+01 : f32
    %12 = vector.broadcast %cst_6 : f32 to vector<8x1xf32>
    %13 = arith.divf %11, %12 : vector<8x1xf32>
    %14 = vector.broadcast %13 : vector<8x1xf32> to vector<8x32xf32>
    %15 = arith.subf %7, %14 : vector<8x32xf32>
    %16 = arith.mulf %15, %15 : vector<8x32xf32>
    %cst_7 = arith.constant dense<0.000000e+00> : vector<8xf32>
    %17 = vector.multi_reduction <add>, %16, %cst_7 [1] : vector<8x32xf32> to vector<8xf32>
    %18 = vector.shape_cast %17 : vector<8xf32> to vector<8x1xf32>
    %cst_8 = arith.constant 3.200000e+01 : f32
    %19 = vector.broadcast %cst_8 : f32 to vector<8x1xf32>
    %20 = arith.divf %18, %19 : vector<8x1xf32>
    %21 = vector.broadcast %13 : vector<8x1xf32> to vector<8x32xf32>
    %22 = arith.subf %7, %21 : vector<8x32xf32>
    %cst_9 = arith.constant 9.99999997E-7 : f32
    %23 = vector.broadcast %cst_9 : f32 to vector<8x1xf32>
    %24 = arith.addf %20, %23 : vector<8x1xf32>
    %25 = math.rsqrt %24 : vector<8x1xf32>
    %26 = vector.broadcast %25 : vector<8x1xf32> to vector<8x32xf32>
    %27 = arith.mulf %22, %26 : vector<8x32xf32>
    %28 = vector.broadcast %8 : vector<1x32xf32> to vector<8x32xf32>
    %29 = arith.mulf %27, %28 : vector<8x32xf32>
    %30 = vector.broadcast %9 : vector<1x32xf32> to vector<8x32xf32>
    %31 = arith.addf %29, %30 : vector<8x32xf32>
    %32 = arith.truncf %31 : vector<8x32xf32> to vector<8x32xbf16>
    %c0_10 = arith.constant 0 : index
    %c0_11 = arith.constant 0 : index
    %33 = vector.load %arg6[%c0_10, %c0_11] : memref<32x32xbf16, #tpu.memory_space<vmem>>, vector<32x32xbf16>
    %cst_12 = arith.constant dense<0.000000e+00> : vector<8x32xf32>
    %34 = tpu.matmul %32, %33, %cst_12 {dimension_numbers = #tpu.dot_dimension_numbers<[1], [0], [0], [1], [0, 0, 1, 1], [], []>} : vector<8x32xbf16>, vector<32x32xbf16>, vector<8x32xf32> -> vector<8x32xf32>
    %c0_13 = arith.constant 0 : index
    %c0_14 = arith.constant 0 : index
    %35 = vector.load %arg7[%c0_13, %c0_14] : memref<1x32xf32, #tpu.memory_space<vmem>>, vector<1x32xf32>
    %36 = vector.broadcast %35 : vector<1x32xf32> to vector<8x32xf32>
    %37 = arith.addf %34, %36 : vector<8x32xf32>
    %38 = arith.truncf %37 : vector<8x32xf32> to vector<8x32xbf16>
    %c0_15 = arith.constant 0 : index
    %c0_16 = arith.constant 0 : index
    %c0_17 = arith.constant 0 : index
    %39 = vector.load %arg2[%c0_15, %c0_16, %c0_17] : memref<1x8x32xf32, #tpu.memory_space<vmem>>, vector<1x8x32xf32>
    %40 = vector.shape_cast %39 : vector<1x8x32xf32> to vector<8x32xf32>
    %c0_18 = arith.constant 0 : index
    %c0_19 = arith.constant 0 : index
    %41 = vector.load %arg13[%c0_18, %c0_19] : memref<1x32xf32, #tpu.memory_space<vmem>>, vector<1x32xf32>
    %42 = vector.broadcast %41 : vector<1x32xf32> to vector<8x32xf32>
    %43 = arith.addf %40, %42 : vector<8x32xf32>
    %44 = vector.extract_strided_slice %38 {offsets = [0, 0], sizes = [8, 8], strides = [1, 1]} : vector<8x32xbf16> to vector<8x8xbf16>
    %c0_20 = arith.constant 0 : index
    %c0_21 = arith.constant 0 : index
    %c0_22 = arith.constant 0 : index
    %c0_23 = arith.constant 0 : index
    %45 = vector.load %arg22[%c0_20, %c0_21, %c0_22, %c0_23] : memref<2x4x16x8xbf16, #tpu.memory_space<vmem>>, vector<1x1x16x8xbf16>
    %46 = vector.shape_cast %45 : vector<1x1x16x8xbf16> to vector<16x8xbf16>
    %c1 = arith.constant 1 : index
    %c0_24 = arith.constant 0 : index
    %c0_25 = arith.constant 0 : index
    %c0_26 = arith.constant 0 : index
    %47 = vector.load %arg22[%c1, %c0_24, %c0_25, %c0_26] : memref<2x4x16x8xbf16, #tpu.memory_space<vmem>>, vector<1x1x16x8xbf16>
    %48 = vector.shape_cast %47 : vector<1x1x16x8xbf16> to vector<16x8xbf16>
    %cst_27 = arith.constant dense<0.000000e+00> : vector<8x16xf32>
    %49 = tpu.matmul %44, %46, %cst_27 {dimension_numbers = #tpu.dot_dimension_numbers<[1], [1], [0], [0], [0, 0, 1, 0], [], []>} : vector<8x8xbf16>, vector<16x8xbf16>, vector<8x16xf32> -> vector<8x16xf32>
    %cst_28 = arith.constant dense<0xFF800000> : vector<8xf32>
    %50 = vector.multi_reduction <maximumf>, %49, %cst_28 [1] : vector<8x16xf32> to vector<8xf32>
    %51 = vector.shape_cast %50 : vector<8xf32> to vector<8x1xf32>
    %52 = vector.broadcast %51 : vector<8x1xf32> to vector<8x16xf32>
    %53 = arith.subf %49, %52 : vector<8x16xf32>
    %54 = math.exp %53 : vector<8x16xf32>
    %cst_29 = arith.constant dense<0.000000e+00> : vector<8xf32>
    %55 = vector.multi_reduction <add>, %54, %cst_29 [1] : vector<8x16xf32> to vector<8xf32>
    %56 = vector.shape_cast %55 : vector<8xf32> to vector<8x1xf32>
    %57 = arith.truncf %54 : vector<8x16xf32> to vector<8x16xbf16>
    %cst_30 = arith.constant dense<0.000000e+00> : vector<8x8xf32>
    %58 = tpu.matmul %57, %48, %cst_30 {dimension_numbers = #tpu.dot_dimension_numbers<[1], [0], [0], [1], [0, 0, 1, 1], [], []>} : vector<8x16xbf16>, vector<16x8xbf16>, vector<8x8xf32> -> vector<8x8xf32>
    %59 = tpu.reciprocal %56 {approx = true} : vector<8x1xf32> -> vector<8x1xf32>
    %60 = vector.broadcast %59 : vector<8x1xf32> to vector<8x8xf32>
    %61 = arith.mulf %58, %60 : vector<8x8xf32>
    %62 = arith.truncf %61 : vector<8x8xf32> to vector<8x8xbf16>
    %c0_31 = arith.constant 0 : index
    %c0_32 = arith.constant 0 : index
    %63 = vector.load %arg12[%c0_31, %c0_32] : memref<32x32xbf16, #tpu.memory_space<vmem>>, vector<8x32xbf16>
    %cst_33 = arith.constant dense<0.000000e+00> : vector<8x32xf32>
    %64 = tpu.matmul %62, %63, %cst_33 {dimension_numbers = #tpu.dot_dimension_numbers<[1], [0], [0], [1], [0, 0, 1, 1], [], []>} : vector<8x8xbf16>, vector<8x32xbf16>, vector<8x32xf32> -> vector<8x32xf32>
    %65 = arith.addf %43, %64 : vector<8x32xf32>
    %66 = vector.extract_strided_slice %38 {offsets = [0, 8], sizes = [8, 8], strides = [1, 1]} : vector<8x32xbf16> to vector<8x8xbf16>
    %c0_34 = arith.constant 0 : index
    %c1_35 = arith.constant 1 : index
    %c0_36 = arith.constant 0 : index
    %c0_37 = arith.constant 0 : index
    %67 = vector.load %arg22[%c0_34, %c1_35, %c0_36, %c0_37] : memref<2x4x16x8xbf16, #tpu.memory_space<vmem>>, vector<1x1x16x8xbf16>
    %68 = vector.shape_cast %67 : vector<1x1x16x8xbf16> to vector<16x8xbf16>
    %c1_38 = arith.constant 1 : index
    %c1_39 = arith.constant 1 : index
    %c0_40 = arith.constant 0 : index
    %c0_41 = arith.constant 0 : index
    %69 = vector.load %arg22[%c1_38, %c1_39, %c0_40, %c0_41] : memref<2x4x16x8xbf16, #tpu.memory_space<vmem>>, vector<1x1x16x8xbf16>
    %70 = vector.shape_cast %69 : vector<1x1x16x8xbf16> to vector<16x8xbf16>
    %cst_42 = arith.constant dense<0.000000e+00> : vector<8x16xf32>
    %71 = tpu.matmul %66, %68, %cst_42 {dimension_numbers = #tpu.dot_dimension_numbers<[1], [1], [0], [0], [0, 0, 1, 0], [], []>} : vector<8x8xbf16>, vector<16x8xbf16>, vector<8x16xf32> -> vector<8x16xf32>
    %cst_43 = arith.constant dense<0xFF800000> : vector<8xf32>
    %72 = vector.multi_reduction <maximumf>, %71, %cst_43 [1] : vector<8x16xf32> to vector<8xf32>
    %73 = vector.shape_cast %72 : vector<8xf32> to vector<8x1xf32>
    %74 = vector.broadcast %73 : vector<8x1xf32> to vector<8x16xf32>
    %75 = arith.subf %71, %74 : vector<8x16xf32>
    %76 = math.exp %75 : vector<8x16xf32>
    %cst_44 = arith.constant dense<0.000000e+00> : vector<8xf32>
    %77 = vector.multi_reduction <add>, %76, %cst_44 [1] : vector<8x16xf32> to vector<8xf32>
    %78 = vector.shape_cast %77 : vector<8xf32> to vector<8x1xf32>
    %79 = arith.truncf %76 : vector<8x16xf32> to vector<8x16xbf16>
    %cst_45 = arith.constant dense<0.000000e+00> : vector<8x8xf32>
    %80 = tpu.matmul %79, %70, %cst_45 {dimension_numbers = #tpu.dot_dimension_numbers<[1], [0], [0], [1], [0, 0, 1, 1], [], []>} : vector<8x16xbf16>, vector<16x8xbf16>, vector<8x8xf32> -> vector<8x8xf32>
    %81 = tpu.reciprocal %78 {approx = true} : vector<8x1xf32> -> vector<8x1xf32>
    %82 = vector.broadcast %81 : vector<8x1xf32> to vector<8x8xf32>
    %83 = arith.mulf %80, %82 : vector<8x8xf32>
    %84 = arith.truncf %83 : vector<8x8xf32> to vector<8x8xbf16>
    %c8 = arith.constant 8 : index
    %c0_46 = arith.constant 0 : index
    %85 = vector.load %arg12[%c8, %c0_46] : memref<32x32xbf16, #tpu.memory_space<vmem>>, vector<8x32xbf16>
    %cst_47 = arith.constant dense<0.000000e+00> : vector<8x32xf32>
    %86 = tpu.matmul %84, %85, %cst_47 {dimension_numbers = #tpu.dot_dimension_numbers<[1], [0], [0], [1], [0, 0, 1, 1], [], []>} : vector<8x8xbf16>, vector<8x32xbf16>, vector<8x32xf32> -> vector<8x32xf32>
    %87 = arith.addf %65, %86 : vector<8x32xf32>
    %88 = vector.extract_strided_slice %38 {offsets = [0, 16], sizes = [8, 8], strides = [1, 1]} : vector<8x32xbf16> to vector<8x8xbf16>
    %c0_48 = arith.constant 0 : index
    %c2 = arith.constant 2 : index
    %c0_49 = arith.constant 0 : index
    %c0_50 = arith.constant 0 : index
    %89 = vector.load %arg22[%c0_48, %c2, %c0_49, %c0_50] : memref<2x4x16x8xbf16, #tpu.memory_space<vmem>>, vector<1x1x16x8xbf16>
    %90 = vector.shape_cast %89 : vector<1x1x16x8xbf16> to vector<16x8xbf16>
    %c1_51 = arith.constant 1 : index
    %c2_52 = arith.constant 2 : index
    %c0_53 = arith.constant 0 : index
    %c0_54 = arith.constant 0 : index
    %91 = vector.load %arg22[%c1_51, %c2_52, %c0_53, %c0_54] : memref<2x4x16x8xbf16, #tpu.memory_space<vmem>>, vector<1x1x16x8xbf16>
    %92 = vector.shape_cast %91 : vector<1x1x16x8xbf16> to vector<16x8xbf16>
    %cst_55 = arith.constant dense<0.000000e+00> : vector<8x16xf32>
    %93 = tpu.matmul %88, %90, %cst_55 {dimension_numbers = #tpu.dot_dimension_numbers<[1], [1], [0], [0], [0, 0, 1, 0], [], []>} : vector<8x8xbf16>, vector<16x8xbf16>, vector<8x16xf32> -> vector<8x16xf32>
    %cst_56 = arith.constant dense<0xFF800000> : vector<8xf32>
    %94 = vector.multi_reduction <maximumf>, %93, %cst_56 [1] : vector<8x16xf32> to vector<8xf32>
    %95 = vector.shape_cast %94 : vector<8xf32> to vector<8x1xf32>
    %96 = vector.broadcast %95 : vector<8x1xf32> to vector<8x16xf32>
    %97 = arith.subf %93, %96 : vector<8x16xf32>
    %98 = math.exp %97 : vector<8x16xf32>
    %cst_57 = arith.constant dense<0.000000e+00> : vector<8xf32>
    %99 = vector.multi_reduction <add>, %98, %cst_57 [1] : vector<8x16xf32> to vector<8xf32>
    %100 = vector.shape_cast %99 : vector<8xf32> to vector<8x1xf32>
    %101 = arith.truncf %98 : vector<8x16xf32> to vector<8x16xbf16>
    %cst_58 = arith.constant dense<0.000000e+00> : vector<8x8xf32>
    %102 = tpu.matmul %101, %92, %cst_58 {dimension_numbers = #tpu.dot_dimension_numbers<[1], [0], [0], [1], [0, 0, 1, 1], [], []>} : vector<8x16xbf16>, vector<16x8xbf16>, vector<8x8xf32> -> vector<8x8xf32>
    %103 = tpu.reciprocal %100 {approx = true} : vector<8x1xf32> -> vector<8x1xf32>
    %104 = vector.broadcast %103 : vector<8x1xf32> to vector<8x8xf32>
    %105 = arith.mulf %102, %104 : vector<8x8xf32>
    %106 = arith.truncf %105 : vector<8x8xf32> to vector<8x8xbf16>
    %c16 = arith.constant 16 : index
    %c0_59 = arith.constant 0 : index
    %107 = vector.load %arg12[%c16, %c0_59] : memref<32x32xbf16, #tpu.memory_space<vmem>>, vector<8x32xbf16>
    %cst_60 = arith.constant dense<0.000000e+00> : vector<8x32xf32>
    %108 = tpu.matmul %106, %107, %cst_60 {dimension_numbers = #tpu.dot_dimension_numbers<[1], [0], [0], [1], [0, 0, 1, 1], [], []>} : vector<8x8xbf16>, vector<8x32xbf16>, vector<8x32xf32> -> vector<8x32xf32>
    %109 = arith.addf %87, %108 : vector<8x32xf32>
    %110 = vector.extract_strided_slice %38 {offsets = [0, 24], sizes = [8, 8], strides = [1, 1]} : vector<8x32xbf16> to vector<8x8xbf16>
    %c0_61 = arith.constant 0 : index
    %c3 = arith.constant 3 : index
    %c0_62 = arith.constant 0 : index
    %c0_63 = arith.constant 0 : index
    %111 = vector.load %arg22[%c0_61, %c3, %c0_62, %c0_63] : memref<2x4x16x8xbf16, #tpu.memory_space<vmem>>, vector<1x1x16x8xbf16>
    %112 = vector.shape_cast %111 : vector<1x1x16x8xbf16> to vector<16x8xbf16>
    %c1_64 = arith.constant 1 : index
    %c3_65 = arith.constant 3 : index
    %c0_66 = arith.constant 0 : index
    %c0_67 = arith.constant 0 : index
    %113 = vector.load %arg22[%c1_64, %c3_65, %c0_66, %c0_67] : memref<2x4x16x8xbf16, #tpu.memory_space<vmem>>, vector<1x1x16x8xbf16>
    %114 = vector.shape_cast %113 : vector<1x1x16x8xbf16> to vector<16x8xbf16>
    %cst_68 = arith.constant dense<0.000000e+00> : vector<8x16xf32>
    %115 = tpu.matmul %110, %112, %cst_68 {dimension_numbers = #tpu.dot_dimension_numbers<[1], [1], [0], [0], [0, 0, 1, 0], [], []>} : vector<8x8xbf16>, vector<16x8xbf16>, vector<8x16xf32> -> vector<8x16xf32>
    %cst_69 = arith.constant dense<0xFF800000> : vector<8xf32>
    %116 = vector.multi_reduction <maximumf>, %115, %cst_69 [1] : vector<8x16xf32> to vector<8xf32>
    %117 = vector.shape_cast %116 : vector<8xf32> to vector<8x1xf32>
    %118 = vector.broadcast %117 : vector<8x1xf32> to vector<8x16xf32>
    %119 = arith.subf %115, %118 : vector<8x16xf32>
    %120 = math.exp %119 : vector<8x16xf32>
    %cst_70 = arith.constant dense<0.000000e+00> : vector<8xf32>
    %121 = vector.multi_reduction <add>, %120, %cst_70 [1] : vector<8x16xf32> to vector<8xf32>
    %122 = vector.shape_cast %121 : vector<8xf32> to vector<8x1xf32>
    %123 = arith.truncf %120 : vector<8x16xf32> to vector<8x16xbf16>
    %cst_71 = arith.constant dense<0.000000e+00> : vector<8x8xf32>
    %124 = tpu.matmul %123, %114, %cst_71 {dimension_numbers = #tpu.dot_dimension_numbers<[1], [0], [0], [1], [0, 0, 1, 1], [], []>} : vector<8x16xbf16>, vector<16x8xbf16>, vector<8x8xf32> -> vector<8x8xf32>
    %125 = tpu.reciprocal %122 {approx = true} : vector<8x1xf32> -> vector<8x1xf32>
    %126 = vector.broadcast %125 : vector<8x1xf32> to vector<8x8xf32>
    %127 = arith.mulf %124, %126 : vector<8x8xf32>
    %128 = arith.truncf %127 : vector<8x8xf32> to vector<8x8xbf16>
    %c24 = arith.constant 24 : index
    %c0_72 = arith.constant 0 : index
    %129 = vector.load %arg12[%c24, %c0_72] : memref<32x32xbf16, #tpu.memory_space<vmem>>, vector<8x32xbf16>
    %cst_73 = arith.constant dense<0.000000e+00> : vector<8x32xf32>
    %130 = tpu.matmul %128, %129, %cst_73 {dimension_numbers = #tpu.dot_dimension_numbers<[1], [0], [0], [1], [0, 0, 1, 1], [], []>} : vector<8x8xbf16>, vector<8x32xbf16>, vector<8x32xf32> -> vector<8x32xf32>
    %131 = arith.addf %109, %130 : vector<8x32xf32>
    %c0_74 = arith.constant 0 : index
    %c0_75 = arith.constant 0 : index
    %c0_76 = arith.constant 0 : index
    %132 = vector.load %arg20[%c0_74, %c0_75, %c0_76] : memref<1x8x32xf32, #tpu.memory_space<vmem>>, vector<1x8x32xf32>
    %133 = vector.shape_cast %132 : vector<1x8x32xf32> to vector<8x32xf32>
    %134 = vector.shape_cast %131 : vector<8x32xf32> to vector<1x8x32xf32>
    tpu.vector_store %arg20[%c0_74, %c0_75, %c0_76], %134 {strides = array<i32>} : memref<1x8x32xf32, #tpu.memory_space<vmem>>, vector<1x8x32xf32>,
    %c0_77 = arith.constant 0 : index
    %c0_78 = arith.constant 0 : index
    %135 = vector.load %arg14[%c0_77, %c0_78] : memref<1x32xf32, #tpu.memory_space<vmem>>, vector<1x32xf32>
    %c0_79 = arith.constant 0 : index
    %c0_80 = arith.constant 0 : index
    %136 = vector.load %arg15[%c0_79, %c0_80] : memref<1x32xf32, #tpu.memory_space<vmem>>, vector<1x32xf32>
    %cst_81 = arith.constant dense<0.000000e+00> : vector<8xf32>
    %137 = vector.multi_reduction <add>, %131, %cst_81 [1] : vector<8x32xf32> to vector<8xf32>
    %138 = vector.shape_cast %137 : vector<8xf32> to vector<8x1xf32>
    %cst_82 = arith.constant 3.200000e+01 : f32
    %139 = vector.broadcast %cst_82 : f32 to vector<8x1xf32>
    %140 = arith.divf %138, %139 : vector<8x1xf32>
    %141 = vector.broadcast %140 : vector<8x1xf32> to vector<8x32xf32>
    %142 = arith.subf %131, %141 : vector<8x32xf32>
    %143 = arith.mulf %142, %142 : vector<8x32xf32>
    %cst_83 = arith.constant dense<0.000000e+00> : vector<8xf32>
    %144 = vector.multi_reduction <add>, %143, %cst_83 [1] : vector<8x32xf32> to vector<8xf32>
    %145 = vector.shape_cast %144 : vector<8xf32> to vector<8x1xf32>
    %cst_84 = arith.constant 3.200000e+01 : f32
    %146 = vector.broadcast %cst_84 : f32 to vector<8x1xf32>
    %147 = arith.divf %145, %146 : vector<8x1xf32>
    %148 = vector.broadcast %140 : vector<8x1xf32> to vector<8x32xf32>
    %149 = arith.subf %131, %148 : vector<8x32xf32>
    %cst_85 = arith.constant 9.99999974E-6 : f32
    %150 = vector.broadcast %cst_85 : f32 to vector<8x1xf32>
    %151 = arith.addf %147, %150 : vector<8x1xf32>
    %152 = math.rsqrt %151 : vector<8x1xf32>
    %153 = vector.broadcast %152 : vector<8x1xf32> to vector<8x32xf32>
    %154 = arith.mulf %149, %153 : vector<8x32xf32>
    %155 = vector.broadcast %135 : vector<1x32xf32> to vector<8x32xf32>
    %156 = arith.mulf %154, %155 : vector<8x32xf32>
    %157 = vector.broadcast %136 : vector<1x32xf32> to vector<8x32xf32>
    %158 = arith.addf %156, %157 : vector<8x32xf32>
    %159 = arith.truncf %158 : vector<8x32xf32> to vector<8x32xbf16>
    %c0_86 = arith.constant 0 : index
    %c0_87 = arith.constant 0 : index
    %160 = vector.load %arg19[%c0_86, %c0_87] : memref<1x32xf32, #tpu.memory_space<vmem>>, vector<1x32xf32>
    %161 = vector.broadcast %160 : vector<1x32xf32> to vector<8x32xf32>
    %162 = arith.addf %7, %161 : vector<8x32xf32>
    %c0_88 = arith.constant 0 : index
    %c0_89 = arith.constant 0 : index
    %163 = vector.load %arg16[%c0_88, %c0_89] : memref<32x128xbf16, #tpu.memory_space<vmem>>, vector<32x128xbf16>
    %cst_90 = arith.constant dense<0.000000e+00> : vector<8x128xf32>
    %164 = tpu.matmul %159, %163, %cst_90 {dimension_numbers = #tpu.dot_dimension_numbers<[1], [0], [0], [1], [0, 0, 1, 1], [], []>} : vector<8x32xbf16>, vector<32x128xbf16>, vector<8x128xf32> -> vector<8x128xf32>
    %c0_91 = arith.constant 0 : index
    %c0_92 = arith.constant 0 : index
    %165 = vector.load %arg17[%c0_91, %c0_92] : memref<1x128xf32, #tpu.memory_space<vmem>>, vector<1x128xf32>
    %166 = vector.broadcast %165 : vector<1x128xf32> to vector<8x128xf32>
    %167 = arith.addf %164, %166 : vector<8x128xf32>
    %cst_93 = arith.constant 5.000000e-01 : f32
    %168 = vector.broadcast %cst_93 : f32 to vector<8x128xf32>
    %169 = arith.mulf %168, %167 : vector<8x128xf32>
    %cst_94 = arith.constant 0.707106769 : f32
    %170 = vector.broadcast %cst_94 : f32 to vector<8x128xf32>
    %171 = arith.mulf %167, %170 : vector<8x128xf32>
    %172 = math.erf %171 : vector<8x128xf32>
    %cst_95 = arith.constant 1.000000e+00 : f32
    %173 = vector.broadcast %cst_95 : f32 to vector<8x128xf32>
    %174 = arith.addf %173, %172 : vector<8x128xf32>
    %175 = arith.mulf %169, %174 : vector<8x128xf32>
    %176 = arith.truncf %175 : vector<8x128xf32> to vector<8x128xbf16>
    %c0_96 = arith.constant 0 : index
    %c0_97 = arith.constant 0 : index
    %177 = vector.load %arg18[%c0_96, %c0_97] : memref<128x32xbf16, #tpu.memory_space<vmem>>, vector<128x32xbf16>
    %cst_98 = arith.constant dense<0.000000e+00> : vector<8x32xf32>
    %178 = tpu.matmul %176, %177, %cst_98 {dimension_numbers = #tpu.dot_dimension_numbers<[1], [0], [0], [1], [0, 0, 1, 1], [], []>} : vector<8x128xbf16>, vector<128x32xbf16>, vector<8x32xf32> -> vector<8x32xf32>
    %179 = arith.addf %162, %178 : vector<8x32xf32>
    %c0_99 = arith.constant 0 : index
    %c0_100 = arith.constant 0 : index
    %c0_101 = arith.constant 0 : index
    %180 = vector.load %arg21[%c0_99, %c0_100, %c0_101] : memref<1x8x32xf32, #tpu.memory_space<vmem>>, vector<1x8x32xf32>
    %181 = vector.shape_cast %180 : vector<1x8x32xf32> to vector<8x32xf32>
    %182 = vector.shape_cast %179 : vector<8x32xf32> to vector<1x8x32xf32>
    tpu.vector_store %arg21[%c0_99, %c0_100, %c0_101], %182 {strides = array<i32>} : memref<1x8x32xf32, #tpu.memory_space<vmem>>, vector<1x8x32xf32>,
    return
  }
  func.func @transform_0(%arg0: i32, %arg1: i32) -> (i32, i32, i32) {
    %c0_i32 = arith.constant 0 : i32
    %c0_i32_0 = arith.constant 0 : i32
    return %arg0, %arg1, %c0_i32 : i32, i32, i32
  }
  func.func @transform_1(%arg0: i32, %arg1: i32) -> (i32, i32, i32) {
    %c0_i32 = arith.constant 0 : i32
    %c0_i32_0 = arith.constant 0 : i32
    %c0_i32_1 = arith.constant 0 : i32
    return %arg0, %c0_i32, %c0_i32_0 : i32, i32, i32
  }
  func.func @transform_2(%arg0: i32, %arg1: i32) -> (i32, i32) {
    %c0_i32 = arith.constant 0 : i32
    %c0_i32_0 = arith.constant 0 : i32
    %c0_i32_1 = arith.constant 0 : i32
    return %c0_i32, %c0_i32_0 : i32, i32
  }
  func.func @transform_3(%arg0: i32, %arg1: i32) -> (i32, i32) {
    %c0_i32 = arith.constant 0 : i32
    %c0_i32_0 = arith.constant 0 : i32
    %c0_i32_1 = arith.constant 0 : i32
    return %c0_i32, %c0_i32_0 : i32, i32
  }
  func.func @transform_4(%arg0: i32, %arg1: i32) -> (i32, i32) {
    %c0_i32 = arith.constant 0 : i32
    %c0_i32_0 = arith.constant 0 : i32
    %c0_i32_1 = arith.constant 0 : i32
    return %c0_i32, %c0_i32_0 : i32, i32
  }
  func.func @transform_5(%arg0: i32, %arg1: i32) -> (i32, i32) {
    %c0_i32 = arith.constant 0 : i32
    %c0_i32_0 = arith.constant 0 : i32
    %c0_i32_1 = arith.constant 0 : i32
    return %c0_i32, %c0_i32_0 : i32, i32
  }
  func.func @transform_6(%arg0: i32, %arg1: i32) -> (i32, i32) {
    %c0_i32 = arith.constant 0 : i32
    %c0_i32_0 = arith.constant 0 : i32
    %c0_i32_1 = arith.constant 0 : i32
    return %c0_i32, %c0_i32_0 : i32, i32
  }
  func.func @transform_7(%arg0: i32, %arg1: i32) -> (i32, i32) {
    %c0_i32 = arith.constant 0 : i32
    %c0_i32_0 = arith.constant 0 : i32
    %c0_i32_1 = arith.constant 0 : i32
    return %c0_i32, %c0_i32_0 : i32, i32
  }
  func.func @transform_8(%arg0: i32, %arg1: i32) -> (i32, i32) {
    %c0_i32 = arith.constant 0 : i32
    %c0_i32_0 = arith.constant 0 : i32
    %c0_i32_1 = arith.constant 0 : i32
    return %c0_i32, %c0_i32_0 : i32, i32
  }
  func.func @transform_9(%arg0: i32, %arg1: i32) -> (i32, i32) {
    %c0_i32 = arith.constant 0 : i32
    %c0_i32_0 = arith.constant 0 : i32
    %c0_i32_1 = arith.constant 0 : i32
    return %c0_i32, %c0_i32_0 : i32, i32
  }
  func.func @transform_10(%arg0: i32, %arg1: i32) -> (i32, i32) {
    %c0_i32 = arith.constant 0 : i32
    %c0_i32_0 = arith.constant 0 : i32
    %c0_i32_1 = arith.constant 0 : i32
    return %c0_i32, %c0_i32_0 : i32, i32
  }
  func.func @transform_11(%arg0: i32, %arg1: i32) -> (i32, i32) {
    %c0_i32 = arith.constant 0 : i32
    %c0_i32_0 = arith.constant 0 : i32
    %c0_i32_1 = arith.constant 0 : i32
    return %c0_i32, %c0_i32_0 : i32, i32
  }
  func.func @transform_12(%arg0: i32, %arg1: i32) -> (i32, i32) {
    %c0_i32 = arith.constant 0 : i32
    %c0_i32_0 = arith.constant 0 : i32
    %c0_i32_1 = arith.constant 0 : i32
    return %c0_i32, %c0_i32_0 : i32, i32
  }
  func.func @transform_13(%arg0: i32, %arg1: i32) -> (i32, i32) {
    %c0_i32 = arith.constant 0 : i32
    %c0_i32_0 = arith.constant 0 : i32
    %c0_i32_1 = arith.constant 0 : i32
    return %c0_i32, %c0_i32_0 : i32, i32
  }
  func.func @transform_14(%arg0: i32, %arg1: i32) -> (i32, i32) {
    %c0_i32 = arith.constant 0 : i32
    %c0_i32_0 = arith.constant 0 : i32
    %c0_i32_1 = arith.constant 0 : i32
    return %c0_i32, %c0_i32_0 : i32, i32
  }
  func.func @transform_15(%arg0: i32, %arg1: i32) -> (i32, i32) {
    %c0_i32 = arith.constant 0 : i32
    %c0_i32_0 = arith.constant 0 : i32
    %c0_i32_1 = arith.constant 0 : i32
    return %c0_i32, %c0_i32_0 : i32, i32
  }
  func.func @transform_16(%arg0: i32, %arg1: i32) -> (i32, i32) {
    %c0_i32 = arith.constant 0 : i32
    %c0_i32_0 = arith.constant 0 : i32
    %c0_i32_1 = arith.constant 0 : i32
    return %c0_i32, %c0_i32_0 : i32, i32
  }
  func.func @transform_17(%arg0: i32, %arg1: i32) -> (i32, i32) {
    %c0_i32 = arith.constant 0 : i32
    %c0_i32_0 = arith.constant 0 : i32
    %c0_i32_1 = arith.constant 0 : i32
    return %c0_i32, %c0_i32_0 : i32, i32
  }
  func.func @transform_18(%arg0: i32, %arg1: i32) -> (i32, i32, i32) {
    %c0_i32 = arith.constant 0 : i32
    %c0_i32_0 = arith.constant 0 : i32
    return %arg0, %arg1, %c0_i32 : i32, i32, i32
  }
  func.func @transform_19(%arg0: i32, %arg1: i32) -> (i32, i32, i32) {
    %c0_i32 = arith.constant 0 : i32
    %c0_i32_0 = arith.constant 0 : i32
    return %arg0, %arg1, %c0_i32 : i32, i32, i32
  }
}

module attributes {stable_mosaic.version = 11 : i64} {
  func.func @_rev_block_kernel(%arg0: i32, %arg1: i32, %arg2: memref<1x8x32xf32, #tpu.memory_space<vmem>>, %arg3: memref<1x16x32xf32, #tpu.memory_space<vmem>>, %arg4: memref<1x32xf32, #tpu.memory_space<vmem>>, %arg5: memref<1x32xf32, #tpu.memory_space<vmem>>, %arg6: memref<32x32xbf16, #tpu.memory_space<vmem>>, %arg7: memref<1x32xf32, #tpu.memory_space<vmem>>, %arg8: memref<32x32xbf16, #tpu.memory_space<vmem>>, %arg9: memref<1x32xf32, #tpu.memory_space<vmem>>, %arg10: memref<32x32xbf16, #tpu.memory_space<vmem>>, %arg11: memref<1x32xf32, #tpu.memory_space<vmem>>, %arg12: memref<32x32xbf16, #tpu.memory_space<vmem>>, %arg13: memref<1x32xf32, #tpu.memory_space<vmem>>, %arg14: memref<1x32xf32, #tpu.memory_space<vmem>>, %arg15: memref<1x32xf32, #tpu.memory_space<vmem>>, %arg16: memref<32x128xbf16, #tpu.memory_space<vmem>>, %arg17: memref<1x128xf32, #tpu.memory_space<vmem>>, %arg18: memref<128x32xbf16, #tpu.memory_space<vmem>>, %arg19: memref<1x32xf32, #tpu.memory_space<vmem>>, %arg20: memref<1x8x32xf32, #tpu.memory_space<vmem>>, %arg21: memref<1x8x32xf32, #tpu.memory_space<vmem>>, %arg22: memref<2x4x16x8xbf16, #tpu.memory_space<vmem>>) attributes {dimension_semantics = [#tpu.dimension_semantics<parallel>, #tpu.dimension_semantics<arbitrary>], iteration_bounds = array<i64: 2, 2>, scalar_prefetch = 0 : i64, scratch_operands = 1 : i64, tpu.core_type = #tpu.core_type<tc>, window_params = [{transform_indices = @transform_0, window_bounds = array<i64: 1, 8, 32>}, {transform_indices = @transform_1, window_bounds = array<i64: 1, 16, 32>}, {pipeline_mode = #tpu.pipeline_mode<synchronous>, transform_indices = @transform_2, window_bounds = array<i64: 1, 32>}, {pipeline_mode = #tpu.pipeline_mode<synchronous>, transform_indices = @transform_3, window_bounds = array<i64: 1, 32>}, {pipeline_mode = #tpu.pipeline_mode<synchronous>, transform_indices = @transform_4, window_bounds = array<i64: 32, 32>}, {pipeline_mode = #tpu.pipeline_mode<synchronous>, transform_indices = @transform_5, window_bounds = array<i64: 1, 32>}, {pipeline_mode = #tpu.pipeline_mode<synchronous>, transform_indices = @transform_6, window_bounds = array<i64: 32, 32>}, {pipeline_mode = #tpu.pipeline_mode<synchronous>, transform_indices = @transform_7, window_bounds = array<i64: 1, 32>}, {pipeline_mode = #tpu.pipeline_mode<synchronous>, transform_indices = @transform_8, window_bounds = array<i64: 32, 32>}, {pipeline_mode = #tpu.pipeline_mode<synchronous>, transform_indices = @transform_9, window_bounds = array<i64: 1, 32>}, {pipeline_mode = #tpu.pipeline_mode<synchronous>, transform_indices = @transform_10, window_bounds = array<i64: 32, 32>}, {pipeline_mode = #tpu.pipeline_mode<synchronous>, transform_indices = @transform_11, window_bounds = array<i64: 1, 32>}, {pipeline_mode = #tpu.pipeline_mode<synchronous>, transform_indices = @transform_12, window_bounds = array<i64: 1, 32>}, {pipeline_mode = #tpu.pipeline_mode<synchronous>, transform_indices = @transform_13, window_bounds = array<i64: 1, 32>}, {pipeline_mode = #tpu.pipeline_mode<synchronous>, transform_indices = @transform_14, window_bounds = array<i64: 32, 128>}, {pipeline_mode = #tpu.pipeline_mode<synchronous>, transform_indices = @transform_15, window_bounds = array<i64: 1, 128>}, {pipeline_mode = #tpu.pipeline_mode<synchronous>, transform_indices = @transform_16, window_bounds = array<i64: 128, 32>}, {pipeline_mode = #tpu.pipeline_mode<synchronous>, transform_indices = @transform_17, window_bounds = array<i64: 1, 32>}, {transform_indices = @transform_18, window_bounds = array<i64: 1, 8, 32>}, {transform_indices = @transform_19, window_bounds = array<i64: 1, 8, 32>}]} {
    %c0_i32 = arith.constant 0 : i32
    %0 = arith.cmpi eq, %arg1, %c0_i32 : i32
    %1 = arith.extui %0 : i1 to i32
    %c0_i32_0 = arith.constant 0 : i32
    %2 = arith.cmpi ne, %1, %c0_i32_0 : i32
    scf.if %2 {
      %c0_102 = arith.constant 0 : index
      %c0_103 = arith.constant 0 : index
      %c0_104 = arith.constant 0 : index
      %183 = vector.load %arg3[%c0_102, %c0_103, %c0_104] : memref<1x16x32xf32, #tpu.memory_space<vmem>>, vector<1x16x32xf32>
      %184 = vector.shape_cast %183 : vector<1x16x32xf32> to vector<16x32xf32>
      %c0_105 = arith.constant 0 : index
      %c0_106 = arith.constant 0 : index
      %185 = vector.load %arg4[%c0_105, %c0_106] : memref<1x32xf32, #tpu.memory_space<vmem>>, vector<1x32xf32>
      %c0_107 = arith.constant 0 : index
      %c0_108 = arith.constant 0 : index
      %186 = vector.load %arg5[%c0_107, %c0_108] : memref<1x32xf32, #tpu.memory_space<vmem>>, vector<1x32xf32>
      %cst_109 = arith.constant dense<0.000000e+00> : vector<16xf32>
      %187 = vector.multi_reduction <add>, %184, %cst_109 [1] : vector<16x32xf32> to vector<16xf32>
      %188 = vector.shape_cast %187 : vector<16xf32> to vector<16x1xf32>
      %cst_110 = arith.constant 3.200000e+01 : f32
      %189 = vector.broadcast %cst_110 : f32 to vector<16x1xf32>
      %190 = arith.divf %188, %189 : vector<16x1xf32>
      %191 = vector.broadcast %190 : vector<16x1xf32> to vector<16x32xf32>
      %192 = arith.subf %184, %191 : vector<16x32xf32>
      %193 = arith.mulf %192, %192 : vector<16x32xf32>
      %cst_111 = arith.constant dense<0.000000e+00> : vector<16xf32>
      %194 = vector.multi_reduction <add>, %193, %cst_111 [1] : vector<16x32xf32> to vector<16xf32>
      %195 = vector.shape_cast %194 : vector<16xf32> to vector<16x1xf32>
      %cst_112 = arith.constant 3.200000e+01 : f32
      %196 = vector.broadcast %cst_112 : f32 to vector<16x1xf32>
      %197 = arith.divf %195, %196 : vector<16x1xf32>
      %198 = vector.broadcast %190 : vector<16x1xf32> to vector<16x32xf32>
      %199 = arith.subf %184, %198 : vector<16x32xf32>
      %cst_113 = arith.constant 9.99999997E-7 : f32
      %200 = vector.broadcast %cst_113 : f32 to vector<16x1xf32>
      %201 = arith.addf %197, %200 : vector<16x1xf32>
      %202 = math.rsqrt %201 : vector<16x1xf32>
      %203 = vector.broadcast %202 : vector<16x1xf32> to vector<16x32xf32>
      %204 = arith.mulf %199, %203 : vector<16x32xf32>
      %205 = vector.broadcast %185 : vector<1x32xf32> to vector<16x32xf32>
      %206 = arith.mulf %204, %205 : vector<16x32xf32>
      %207 = vector.broadcast %186 : vector<1x32xf32> to vector<16x32xf32>
      %208 = arith.addf %206, %207 : vector<16x32xf32>
      %209 = arith.truncf %208 : vector<16x32xf32> to vector<16x32xbf16>
      %c0_114 = arith.constant 0 : index
      %c0_115 = arith.constant 0 : index
      %210 = vector.load %arg8[%c0_114, %c0_115] : memref<32x32xbf16, #tpu.memory_space<vmem>>, vector<32x32xbf16>
      %cst_116 = arith.constant dense<0.000000e+00> : vector<16x32xf32>
      %211 = tpu.matmul %209, %210, %cst_116 {dimension_numbers = #tpu.dot_dimension_numbers<[1], [0], [0], [1], [0, 0, 1, 1], [], []>} : vector<16x32xbf16>, vector<32x32xbf16>, vector<16x32xf32> -> vector<16x32xf32>
      %c0_117 = arith.constant 0 : index
      %c0_118 = arith.constant 0 : index
      %212 = vector.load %arg9[%c0_117, %c0_118] : memref<1x32xf32, #tpu.memory_space<vmem>>, vector<1x32xf32>
      %213 = vector.broadcast %212 : vector<1x32xf32> to vector<16x32xf32>
      %214 = arith.addf %211, %213 : vector<16x32xf32>
      %c0_119 = arith.constant 0 : index
      %c0_120 = arith.constant 0 : index
      %215 = vector.load %arg10[%c0_119, %c0_120] : memref<32x32xbf16, #tpu.memory_space<vmem>>, vector<32x32xbf16>
      %cst_121 = arith.constant dense<0.000000e+00> : vector<16x32xf32>
      %216 = tpu.matmul %209, %215, %cst_121 {dimension_numbers = #tpu.dot_dimension_numbers<[1], [0], [0], [1], [0, 0, 1, 1], [], []>} : vector<16x32xbf16>, vector<32x32xbf16>, vector<16x32xf32> -> vector<16x32xf32>
      %c0_122 = arith.constant 0 : index
      %c0_123 = arith.constant 0 : index
      %217 = vector.load %arg11[%c0_122, %c0_123] : memref<1x32xf32, #tpu.memory_space<vmem>>, vector<1x32xf32>
      %218 = vector.broadcast %217 : vector<1x32xf32> to vector<16x32xf32>
      %219 = arith.addf %216, %218 : vector<16x32xf32>
      %220 = vector.extract_strided_slice %214 {offsets = [0, 0], sizes = [16, 8], strides = [1, 1]} : vector<16x32xf32> to vector<16x8xf32>
      %221 = arith.truncf %220 : vector<16x8xf32> to vector<16x8xbf16>
      %c0_124 = arith.constant 0 : index
      %c0_125 = arith.constant 0 : index
      %c0_126 = arith.constant 0 : index
      %c0_127 = arith.constant 0 : index
      %222 = vector.load %arg22[%c0_124, %c0_125, %c0_126, %c0_127] : memref<2x4x16x8xbf16, #tpu.memory_space<vmem>>, vector<1x1x16x8xbf16>
      %223 = vector.shape_cast %222 : vector<1x1x16x8xbf16> to vector<16x8xbf16>
      %224 = vector.shape_cast %221 : vector<16x8xbf16> to vector<1x1x16x8xbf16>
      tpu.vector_store %arg22[%c0_124, %c0_125, %c0_126, %c0_127], %224 {strides = array<i32>} : memref<2x4x16x8xbf16, #tpu.memory_space<vmem>>, vector<1x1x16x8xbf16>,
      %225 = vector.extract_strided_slice %219 {offsets = [0, 0], sizes = [16, 8], strides = [1, 1]} : vector<16x32xf32> to vector<16x8xf32>
      %226 = arith.truncf %225 : vector<16x8xf32> to vector<16x8xbf16>
      %c1_128 = arith.constant 1 : index
      %c0_129 = arith.constant 0 : index
      %c0_130 = arith.constant 0 : index
      %c0_131 = arith.constant 0 : index
      %227 = vector.load %arg22[%c1_128, %c0_129, %c0_130, %c0_131] : memref<2x4x16x8xbf16, #tpu.memory_space<vmem>>, vector<1x1x16x8xbf16>
      %228 = vector.shape_cast %227 : vector<1x1x16x8xbf16> to vector<16x8xbf16>
      %229 = vector.shape_cast %226 : vector<16x8xbf16> to vector<1x1x16x8xbf16>
      tpu.vector_store %arg22[%c1_128, %c0_129, %c0_130, %c0_131], %229 {strides = array<i32>} : memref<2x4x16x8xbf16, #tpu.memory_space<vmem>>, vector<1x1x16x8xbf16>,
      %230 = vector.extract_strided_slice %214 {offsets = [0, 8], sizes = [16, 8], strides = [1, 1]} : vector<16x32xf32> to vector<16x8xf32>
      %231 = arith.truncf %230 : vector<16x8xf32> to vector<16x8xbf16>
      %c0_132 = arith.constant 0 : index
      %c1_133 = arith.constant 1 : index
      %c0_134 = arith.constant 0 : index
      %c0_135 = arith.constant 0 : index
      %232 = vector.load %arg22[%c0_132, %c1_133, %c0_134, %c0_135] : memref<2x4x16x8xbf16, #tpu.memory_space<vmem>>, vector<1x1x16x8xbf16>
      %233 = vector.shape_cast %232 : vector<1x1x16x8xbf16> to vector<16x8xbf16>
      %234 = vector.shape_cast %231 : vector<16x8xbf16> to vector<1x1x16x8xbf16>
      tpu.vector_store %arg22[%c0_132, %c1_133, %c0_134, %c0_135], %234 {strides = array<i32>} : memref<2x4x16x8xbf16, #tpu.memory_space<vmem>>, vector<1x1x16x8xbf16>,
      %235 = vector.extract_strided_slice %219 {offsets = [0, 8], sizes = [16, 8], strides = [1, 1]} : vector<16x32xf32> to vector<16x8xf32>
      %236 = arith.truncf %235 : vector<16x8xf32> to vector<16x8xbf16>
      %c1_136 = arith.constant 1 : index
      %c1_137 = arith.constant 1 : index
      %c0_138 = arith.constant 0 : index
      %c0_139 = arith.constant 0 : index
      %237 = vector.load %arg22[%c1_136, %c1_137, %c0_138, %c0_139] : memref<2x4x16x8xbf16, #tpu.memory_space<vmem>>, vector<1x1x16x8xbf16>
      %238 = vector.shape_cast %237 : vector<1x1x16x8xbf16> to vector<16x8xbf16>
      %239 = vector.shape_cast %236 : vector<16x8xbf16> to vector<1x1x16x8xbf16>
      tpu.vector_store %arg22[%c1_136, %c1_137, %c0_138, %c0_139], %239 {strides = array<i32>} : memref<2x4x16x8xbf16, #tpu.memory_space<vmem>>, vector<1x1x16x8xbf16>,
      %240 = vector.extract_strided_slice %214 {offsets = [0, 16], sizes = [16, 8], strides = [1, 1]} : vector<16x32xf32> to vector<16x8xf32>
      %241 = arith.truncf %240 : vector<16x8xf32> to vector<16x8xbf16>
      %c0_140 = arith.constant 0 : index
      %c2_141 = arith.constant 2 : index
      %c0_142 = arith.constant 0 : index
      %c0_143 = arith.constant 0 : index
      %242 = vector.load %arg22[%c0_140, %c2_141, %c0_142, %c0_143] : memref<2x4x16x8xbf16, #tpu.memory_space<vmem>>, vector<1x1x16x8xbf16>
      %243 = vector.shape_cast %242 : vector<1x1x16x8xbf16> to vector<16x8xbf16>
      %244 = vector.shape_cast %241 : vector<16x8xbf16> to vector<1x1x16x8xbf16>
      tpu.vector_store %arg22[%c0_140, %c2_141, %c0_142, %c0_143], %244 {strides = array<i32>} : memref<2x4x16x8xbf16, #tpu.memory_space<vmem>>, vector<1x1x16x8xbf16>,
      %245 = vector.extract_strided_slice %219 {offsets = [0, 16], sizes = [16, 8], strides = [1, 1]} : vector<16x32xf32> to vector<16x8xf32>
      %246 = arith.truncf %245 : vector<16x8xf32> to vector<16x8xbf16>
      %c1_144 = arith.constant 1 : index
      %c2_145 = arith.constant 2 : index
      %c0_146 = arith.constant 0 : index
      %c0_147 = arith.constant 0 : index
      %247 = vector.load %arg22[%c1_144, %c2_145, %c0_146, %c0_147] : memref<2x4x16x8xbf16, #tpu.memory_space<vmem>>, vector<1x1x16x8xbf16>
      %248 = vector.shape_cast %247 : vector<1x1x16x8xbf16> to vector<16x8xbf16>
      %249 = vector.shape_cast %246 : vector<16x8xbf16> to vector<1x1x16x8xbf16>
      tpu.vector_store %arg22[%c1_144, %c2_145, %c0_146, %c0_147], %249 {strides = array<i32>} : memref<2x4x16x8xbf16, #tpu.memory_space<vmem>>, vector<1x1x16x8xbf16>,
      %250 = vector.extract_strided_slice %214 {offsets = [0, 24], sizes = [16, 8], strides = [1, 1]} : vector<16x32xf32> to vector<16x8xf32>
      %251 = arith.truncf %250 : vector<16x8xf32> to vector<16x8xbf16>
      %c0_148 = arith.constant 0 : index
      %c3_149 = arith.constant 3 : index
      %c0_150 = arith.constant 0 : index
      %c0_151 = arith.constant 0 : index
      %252 = vector.load %arg22[%c0_148, %c3_149, %c0_150, %c0_151] : memref<2x4x16x8xbf16, #tpu.memory_space<vmem>>, vector<1x1x16x8xbf16>
      %253 = vector.shape_cast %252 : vector<1x1x16x8xbf16> to vector<16x8xbf16>
      %254 = vector.shape_cast %251 : vector<16x8xbf16> to vector<1x1x16x8xbf16>
      tpu.vector_store %arg22[%c0_148, %c3_149, %c0_150, %c0_151], %254 {strides = array<i32>} : memref<2x4x16x8xbf16, #tpu.memory_space<vmem>>, vector<1x1x16x8xbf16>,
      %255 = vector.extract_strided_slice %219 {offsets = [0, 24], sizes = [16, 8], strides = [1, 1]} : vector<16x32xf32> to vector<16x8xf32>
      %256 = arith.truncf %255 : vector<16x8xf32> to vector<16x8xbf16>
      %c1_152 = arith.constant 1 : index
      %c3_153 = arith.constant 3 : index
      %c0_154 = arith.constant 0 : index
      %c0_155 = arith.constant 0 : index
      %257 = vector.load %arg22[%c1_152, %c3_153, %c0_154, %c0_155] : memref<2x4x16x8xbf16, #tpu.memory_space<vmem>>, vector<1x1x16x8xbf16>
      %258 = vector.shape_cast %257 : vector<1x1x16x8xbf16> to vector<16x8xbf16>
      %259 = vector.shape_cast %256 : vector<16x8xbf16> to vector<1x1x16x8xbf16>
      tpu.vector_store %arg22[%c1_152, %c3_153, %c0_154, %c0_155], %259 {strides = array<i32>} : memref<2x4x16x8xbf16, #tpu.memory_space<vmem>>, vector<1x1x16x8xbf16>,
    } else {
    }
    %c8_i32 = arith.constant 8 : i32
    %3 = arith.muli %arg1, %c8_i32 : i32
    %4 = tpu.assume_multiple %3, 8 : i32
    %c0 = arith.constant 0 : index
    %5 = arith.index_cast %4 : i32 to index
    %c0_1 = arith.constant 0 : index
    %6 = vector.load %arg3[%c0, %5, %c0_1] : memref<1x16x32xf32, #tpu.memory_space<vmem>>, vector<1x8x32xf32>
    %7 = vector.shape_cast %6 : vector<1x8x32xf32> to vector<8x32xf32>
    %c0_2 = arith.constant 0 : index
    %c0_3 = arith.constant 0 : index
    %8 = vector.load %arg4[%c0_2, %c0_3] : memref<1x32xf32, #tpu.memory_space<vmem>>, vector<1x32xf32>
    %c0_4 = arith.constant 0 : index
    %c0_5 = arith.constant 0 : index
    %9 = vector.load %arg5[%c0_4, %c0_5] : memref<1x32xf32, #tpu.memory_space<vmem>>, vector<1x32xf32>
    %cst = arith.constant dense<0.000000e+00> : vector<8xf32>
    %10 = vector.multi_reduction <add>, %7, %cst [1] : vector<8x32xf32> to vector<8xf32>
    %11 = vector.shape_cast %10 : vector<8xf32> to vector<8x1xf32>
    %cst_6 = arith.constant 3.200000e+01 : f32
    %12 = vector.broadcast %cst_6 : f32 to vector<8x1xf32>
    %13 = arith.divf %11, %12 : vector<8x1xf32>
    %14 = vector.broadcast %13 : vector<8x1xf32> to vector<8x32xf32>
    %15 = arith.subf %7, %14 : vector<8x32xf32>
    %16 = arith.mulf %15, %15 : vector<8x32xf32>
    %cst_7 = arith.constant dense<0.000000e+00> : vector<8xf32>
    %17 = vector.multi_reduction <add>, %16, %cst_7 [1] : vector<8x32xf32> to vector<8xf32>
    %18 = vector.shape_cast %17 : vector<8xf32> to vector<8x1xf32>
    %cst_8 = arith.constant 3.200000e+01 : f32
    %19 = vector.broadcast %cst_8 : f32 to vector<8x1xf32>
    %20 = arith.divf %18, %19 : vector<8x1xf32>
    %21 = vector.broadcast %13 : vector<8x1xf32> to vector<8x32xf32>
    %22 = arith.subf %7, %21 : vector<8x32xf32>
    %cst_9 = arith.constant 9.99999997E-7 : f32
    %23 = vector.broadcast %cst_9 : f32 to vector<8x1xf32>
    %24 = arith.addf %20, %23 : vector<8x1xf32>
    %25 = math.rsqrt %24 : vector<8x1xf32>
    %26 = vector.broadcast %25 : vector<8x1xf32> to vector<8x32xf32>
    %27 = arith.mulf %22, %26 : vector<8x32xf32>
    %28 = vector.broadcast %8 : vector<1x32xf32> to vector<8x32xf32>
    %29 = arith.mulf %27, %28 : vector<8x32xf32>
    %30 = vector.broadcast %9 : vector<1x32xf32> to vector<8x32xf32>
    %31 = arith.addf %29, %30 : vector<8x32xf32>
    %32 = arith.truncf %31 : vector<8x32xf32> to vector<8x32xbf16>
    %c0_10 = arith.constant 0 : index
    %c0_11 = arith.constant 0 : index
    %33 = vector.load %arg6[%c0_10, %c0_11] : memref<32x32xbf16, #tpu.memory_space<vmem>>, vector<32x32xbf16>
    %cst_12 = arith.constant dense<0.000000e+00> : vector<8x32xf32>
    %34 = tpu.matmul %32, %33, %cst_12 {dimension_numbers = #tpu.dot_dimension_numbers<[1], [0], [0], [1], [0, 0, 1, 1], [], []>} : vector<8x32xbf16>, vector<32x32xbf16>, vector<8x32xf32> -> vector<8x32xf32>
    %c0_13 = arith.constant 0 : index
    %c0_14 = arith.constant 0 : index
    %35 = vector.load %arg7[%c0_13, %c0_14] : memref<1x32xf32, #tpu.memory_space<vmem>>, vector<1x32xf32>
    %36 = vector.broadcast %35 : vector<1x32xf32> to vector<8x32xf32>
    %37 = arith.addf %34, %36 : vector<8x32xf32>
    %38 = arith.truncf %37 : vector<8x32xf32> to vector<8x32xbf16>
    %c0_15 = arith.constant 0 : index
    %c0_16 = arith.constant 0 : index
    %c0_17 = arith.constant 0 : index
    %39 = vector.load %arg2[%c0_15, %c0_16, %c0_17] : memref<1x8x32xf32, #tpu.memory_space<vmem>>, vector<1x8x32xf32>
    %40 = vector.shape_cast %39 : vector<1x8x32xf32> to vector<8x32xf32>
    %c0_18 = arith.constant 0 : index
    %c0_19 = arith.constant 0 : index
    %41 = vector.load %arg13[%c0_18, %c0_19] : memref<1x32xf32, #tpu.memory_space<vmem>>, vector<1x32xf32>
    %42 = vector.broadcast %41 : vector<1x32xf32> to vector<8x32xf32>
    %43 = arith.addf %40, %42 : vector<8x32xf32>
    %44 = vector.extract_strided_slice %38 {offsets = [0, 0], sizes = [8, 8], strides = [1, 1]} : vector<8x32xbf16> to vector<8x8xbf16>
    %c0_20 = arith.constant 0 : index
    %c0_21 = arith.constant 0 : index
    %c0_22 = arith.constant 0 : index
    %c0_23 = arith.constant 0 : index
    %45 = vector.load %arg22[%c0_20, %c0_21, %c0_22, %c0_23] : memref<2x4x16x8xbf16, #tpu.memory_space<vmem>>, vector<1x1x16x8xbf16>
    %46 = vector.shape_cast %45 : vector<1x1x16x8xbf16> to vector<16x8xbf16>
    %c1 = arith.constant 1 : index
    %c0_24 = arith.constant 0 : index
    %c0_25 = arith.constant 0 : index
    %c0_26 = arith.constant 0 : index
    %47 = vector.load %arg22[%c1, %c0_24, %c0_25, %c0_26] : memref<2x4x16x8xbf16, #tpu.memory_space<vmem>>, vector<1x1x16x8xbf16>
    %48 = vector.shape_cast %47 : vector<1x1x16x8xbf16> to vector<16x8xbf16>
    %cst_27 = arith.constant dense<0.000000e+00> : vector<8x16xf32>
    %49 = tpu.matmul %44, %46, %cst_27 {dimension_numbers = #tpu.dot_dimension_numbers<[1], [1], [0], [0], [0, 0, 1, 0], [], []>} : vector<8x8xbf16>, vector<16x8xbf16>, vector<8x16xf32> -> vector<8x16xf32>
    %cst_28 = arith.constant dense<0xFF800000> : vector<8xf32>
    %50 = vector.multi_reduction <maximumf>, %49, %cst_28 [1] : vector<8x16xf32> to vector<8xf32>
    %51 = vector.shape_cast %50 : vector<8xf32> to vector<8x1xf32>
    %52 = vector.broadcast %51 : vector<8x1xf32> to vector<8x16xf32>
    %53 = arith.subf %49, %52 : vector<8x16xf32>
    %54 = math.exp %53 : vector<8x16xf32>
    %cst_29 = arith.constant dense<0.000000e+00> : vector<8xf32>
    %55 = vector.multi_reduction <add>, %54, %cst_29 [1] : vector<8x16xf32> to vector<8xf32>
    %56 = vector.shape_cast %55 : vector<8xf32> to vector<8x1xf32>
    %57 = arith.truncf %54 : vector<8x16xf32> to vector<8x16xbf16>
    %cst_30 = arith.constant dense<0.000000e+00> : vector<8x8xf32>
    %58 = tpu.matmul %57, %48, %cst_30 {dimension_numbers = #tpu.dot_dimension_numbers<[1], [0], [0], [1], [0, 0, 1, 1], [], []>} : vector<8x16xbf16>, vector<16x8xbf16>, vector<8x8xf32> -> vector<8x8xf32>
    %59 = tpu.reciprocal %56 {approx = true} : vector<8x1xf32> -> vector<8x1xf32>
    %60 = vector.broadcast %59 : vector<8x1xf32> to vector<8x8xf32>
    %61 = arith.mulf %58, %60 : vector<8x8xf32>
    %62 = arith.truncf %61 : vector<8x8xf32> to vector<8x8xbf16>
    %c0_31 = arith.constant 0 : index
    %c0_32 = arith.constant 0 : index
    %63 = vector.load %arg12[%c0_31, %c0_32] : memref<32x32xbf16, #tpu.memory_space<vmem>>, vector<8x32xbf16>
    %cst_33 = arith.constant dense<0.000000e+00> : vector<8x32xf32>
    %64 = tpu.matmul %62, %63, %cst_33 {dimension_numbers = #tpu.dot_dimension_numbers<[1], [0], [0], [1], [0, 0, 1, 1], [], []>} : vector<8x8xbf16>, vector<8x32xbf16>, vector<8x32xf32> -> vector<8x32xf32>
    %65 = arith.addf %43, %64 : vector<8x32xf32>
    %66 = vector.extract_strided_slice %38 {offsets = [0, 8], sizes = [8, 8], strides = [1, 1]} : vector<8x32xbf16> to vector<8x8xbf16>
    %c0_34 = arith.constant 0 : index
    %c1_35 = arith.constant 1 : index
    %c0_36 = arith.constant 0 : index
    %c0_37 = arith.constant 0 : index
    %67 = vector.load %arg22[%c0_34, %c1_35, %c0_36, %c0_37] : memref<2x4x16x8xbf16, #tpu.memory_space<vmem>>, vector<1x1x16x8xbf16>
    %68 = vector.shape_cast %67 : vector<1x1x16x8xbf16> to vector<16x8xbf16>
    %c1_38 = arith.constant 1 : index
    %c1_39 = arith.constant 1 : index
    %c0_40 = arith.constant 0 : index
    %c0_41 = arith.constant 0 : index
    %69 = vector.load %arg22[%c1_38, %c1_39, %c0_40, %c0_41] : memref<2x4x16x8xbf16, #tpu.memory_space<vmem>>, vector<1x1x16x8xbf16>
    %70 = vector.shape_cast %69 : vector<1x1x16x8xbf16> to vector<16x8xbf16>
    %cst_42 = arith.constant dense<0.000000e+00> : vector<8x16xf32>
    %71 = tpu.matmul %66, %68, %cst_42 {dimension_numbers = #tpu.dot_dimension_numbers<[1], [1], [0], [0], [0, 0, 1, 0], [], []>} : vector<8x8xbf16>, vector<16x8xbf16>, vector<8x16xf32> -> vector<8x16xf32>
    %cst_43 = arith.constant dense<0xFF800000> : vector<8xf32>
    %72 = vector.multi_reduction <maximumf>, %71, %cst_43 [1] : vector<8x16xf32> to vector<8xf32>
    %73 = vector.shape_cast %72 : vector<8xf32> to vector<8x1xf32>
    %74 = vector.broadcast %73 : vector<8x1xf32> to vector<8x16xf32>
    %75 = arith.subf %71, %74 : vector<8x16xf32>
    %76 = math.exp %75 : vector<8x16xf32>
    %cst_44 = arith.constant dense<0.000000e+00> : vector<8xf32>
    %77 = vector.multi_reduction <add>, %76, %cst_44 [1] : vector<8x16xf32> to vector<8xf32>
    %78 = vector.shape_cast %77 : vector<8xf32> to vector<8x1xf32>
    %79 = arith.truncf %76 : vector<8x16xf32> to vector<8x16xbf16>
    %cst_45 = arith.constant dense<0.000000e+00> : vector<8x8xf32>
    %80 = tpu.matmul %79, %70, %cst_45 {dimension_numbers = #tpu.dot_dimension_numbers<[1], [0], [0], [1], [0, 0, 1, 1], [], []>} : vector<8x16xbf16>, vector<16x8xbf16>, vector<8x8xf32> -> vector<8x8xf32>
    %81 = tpu.reciprocal %78 {approx = true} : vector<8x1xf32> -> vector<8x1xf32>
    %82 = vector.broadcast %81 : vector<8x1xf32> to vector<8x8xf32>
    %83 = arith.mulf %80, %82 : vector<8x8xf32>
    %84 = arith.truncf %83 : vector<8x8xf32> to vector<8x8xbf16>
    %c8 = arith.constant 8 : index
    %c0_46 = arith.constant 0 : index
    %85 = vector.load %arg12[%c8, %c0_46] : memref<32x32xbf16, #tpu.memory_space<vmem>>, vector<8x32xbf16>
    %cst_47 = arith.constant dense<0.000000e+00> : vector<8x32xf32>
    %86 = tpu.matmul %84, %85, %cst_47 {dimension_numbers = #tpu.dot_dimension_numbers<[1], [0], [0], [1], [0, 0, 1, 1], [], []>} : vector<8x8xbf16>, vector<8x32xbf16>, vector<8x32xf32> -> vector<8x32xf32>
    %87 = arith.addf %65, %86 : vector<8x32xf32>
    %88 = vector.extract_strided_slice %38 {offsets = [0, 16], sizes = [8, 8], strides = [1, 1]} : vector<8x32xbf16> to vector<8x8xbf16>
    %c0_48 = arith.constant 0 : index
    %c2 = arith.constant 2 : index
    %c0_49 = arith.constant 0 : index
    %c0_50 = arith.constant 0 : index
    %89 = vector.load %arg22[%c0_48, %c2, %c0_49, %c0_50] : memref<2x4x16x8xbf16, #tpu.memory_space<vmem>>, vector<1x1x16x8xbf16>
    %90 = vector.shape_cast %89 : vector<1x1x16x8xbf16> to vector<16x8xbf16>
    %c1_51 = arith.constant 1 : index
    %c2_52 = arith.constant 2 : index
    %c0_53 = arith.constant 0 : index
    %c0_54 = arith.constant 0 : index
    %91 = vector.load %arg22[%c1_51, %c2_52, %c0_53, %c0_54] : memref<2x4x16x8xbf16, #tpu.memory_space<vmem>>, vector<1x1x16x8xbf16>
    %92 = vector.shape_cast %91 : vector<1x1x16x8xbf16> to vector<16x8xbf16>
    %cst_55 = arith.constant dense<0.000000e+00> : vector<8x16xf32>
    %93 = tpu.matmul %88, %90, %cst_55 {dimension_numbers = #tpu.dot_dimension_numbers<[1], [1], [0], [0], [0, 0, 1, 0], [], []>} : vector<8x8xbf16>, vector<16x8xbf16>, vector<8x16xf32> -> vector<8x16xf32>
    %cst_56 = arith.constant dense<0xFF800000> : vector<8xf32>
    %94 = vector.multi_reduction <maximumf>, %93, %cst_56 [1] : vector<8x16xf32> to vector<8xf32>
    %95 = vector.shape_cast %94 : vector<8xf32> to vector<8x1xf32>
    %96 = vector.broadcast %95 : vector<8x1xf32> to vector<8x16xf32>
    %97 = arith.subf %93, %96 : vector<8x16xf32>
    %98 = math.exp %97 : vector<8x16xf32>
    %cst_57 = arith.constant dense<0.000000e+00> : vector<8xf32>
    %99 = vector.multi_reduction <add>, %98, %cst_57 [1] : vector<8x16xf32> to vector<8xf32>
    %100 = vector.shape_cast %99 : vector<8xf32> to vector<8x1xf32>
    %101 = arith.truncf %98 : vector<8x16xf32> to vector<8x16xbf16>
    %cst_58 = arith.constant dense<0.000000e+00> : vector<8x8xf32>
    %102 = tpu.matmul %101, %92, %cst_58 {dimension_numbers = #tpu.dot_dimension_numbers<[1], [0], [0], [1], [0, 0, 1, 1], [], []>} : vector<8x16xbf16>, vector<16x8xbf16>, vector<8x8xf32> -> vector<8x8xf32>
    %103 = tpu.reciprocal %100 {approx = true} : vector<8x1xf32> -> vector<8x1xf32>
    %104 = vector.broadcast %103 : vector<8x1xf32> to vector<8x8xf32>
    %105 = arith.mulf %102, %104 : vector<8x8xf32>
    %106 = arith.truncf %105 : vector<8x8xf32> to vector<8x8xbf16>
    %c16 = arith.constant 16 : index
    %c0_59 = arith.constant 0 : index
    %107 = vector.load %arg12[%c16, %c0_59] : memref<32x32xbf16, #tpu.memory_space<vmem>>, vector<8x32xbf16>
    %cst_60 = arith.constant dense<0.000000e+00> : vector<8x32xf32>
    %108 = tpu.matmul %106, %107, %cst_60 {dimension_numbers = #tpu.dot_dimension_numbers<[1], [0], [0], [1], [0, 0, 1, 1], [], []>} : vector<8x8xbf16>, vector<8x32xbf16>, vector<8x32xf32> -> vector<8x32xf32>
    %109 = arith.addf %87, %108 : vector<8x32xf32>
    %110 = vector.extract_strided_slice %38 {offsets = [0, 24], sizes = [8, 8], strides = [1, 1]} : vector<8x32xbf16> to vector<8x8xbf16>
    %c0_61 = arith.constant 0 : index
    %c3 = arith.constant 3 : index
    %c0_62 = arith.constant 0 : index
    %c0_63 = arith.constant 0 : index
    %111 = vector.load %arg22[%c0_61, %c3, %c0_62, %c0_63] : memref<2x4x16x8xbf16, #tpu.memory_space<vmem>>, vector<1x1x16x8xbf16>
    %112 = vector.shape_cast %111 : vector<1x1x16x8xbf16> to vector<16x8xbf16>
    %c1_64 = arith.constant 1 : index
    %c3_65 = arith.constant 3 : index
    %c0_66 = arith.constant 0 : index
    %c0_67 = arith.constant 0 : index
    %113 = vector.load %arg22[%c1_64, %c3_65, %c0_66, %c0_67] : memref<2x4x16x8xbf16, #tpu.memory_space<vmem>>, vector<1x1x16x8xbf16>
    %114 = vector.shape_cast %113 : vector<1x1x16x8xbf16> to vector<16x8xbf16>
    %cst_68 = arith.constant dense<0.000000e+00> : vector<8x16xf32>
    %115 = tpu.matmul %110, %112, %cst_68 {dimension_numbers = #tpu.dot_dimension_numbers<[1], [1], [0], [0], [0, 0, 1, 0], [], []>} : vector<8x8xbf16>, vector<16x8xbf16>, vector<8x16xf32> -> vector<8x16xf32>
    %cst_69 = arith.constant dense<0xFF800000> : vector<8xf32>
    %116 = vector.multi_reduction <maximumf>, %115, %cst_69 [1] : vector<8x16xf32> to vector<8xf32>
    %117 = vector.shape_cast %116 : vector<8xf32> to vector<8x1xf32>
    %118 = vector.broadcast %117 : vector<8x1xf32> to vector<8x16xf32>
    %119 = arith.subf %115, %118 : vector<8x16xf32>
    %120 = math.exp %119 : vector<8x16xf32>
    %cst_70 = arith.constant dense<0.000000e+00> : vector<8xf32>
    %121 = vector.multi_reduction <add>, %120, %cst_70 [1] : vector<8x16xf32> to vector<8xf32>
    %122 = vector.shape_cast %121 : vector<8xf32> to vector<8x1xf32>
    %123 = arith.truncf %120 : vector<8x16xf32> to vector<8x16xbf16>
    %cst_71 = arith.constant dense<0.000000e+00> : vector<8x8xf32>
    %124 = tpu.matmul %123, %114, %cst_71 {dimension_numbers = #tpu.dot_dimension_numbers<[1], [0], [0], [1], [0, 0, 1, 1], [], []>} : vector<8x16xbf16>, vector<16x8xbf16>, vector<8x8xf32> -> vector<8x8xf32>
    %125 = tpu.reciprocal %122 {approx = true} : vector<8x1xf32> -> vector<8x1xf32>
    %126 = vector.broadcast %125 : vector<8x1xf32> to vector<8x8xf32>
    %127 = arith.mulf %124, %126 : vector<8x8xf32>
    %128 = arith.truncf %127 : vector<8x8xf32> to vector<8x8xbf16>
    %c24 = arith.constant 24 : index
    %c0_72 = arith.constant 0 : index
    %129 = vector.load %arg12[%c24, %c0_72] : memref<32x32xbf16, #tpu.memory_space<vmem>>, vector<8x32xbf16>
    %cst_73 = arith.constant dense<0.000000e+00> : vector<8x32xf32>
    %130 = tpu.matmul %128, %129, %cst_73 {dimension_numbers = #tpu.dot_dimension_numbers<[1], [0], [0], [1], [0, 0, 1, 1], [], []>} : vector<8x8xbf16>, vector<8x32xbf16>, vector<8x32xf32> -> vector<8x32xf32>
    %131 = arith.addf %109, %130 : vector<8x32xf32>
    %c0_74 = arith.constant 0 : index
    %c0_75 = arith.constant 0 : index
    %c0_76 = arith.constant 0 : index
    %132 = vector.load %arg20[%c0_74, %c0_75, %c0_76] : memref<1x8x32xf32, #tpu.memory_space<vmem>>, vector<1x8x32xf32>
    %133 = vector.shape_cast %132 : vector<1x8x32xf32> to vector<8x32xf32>
    %134 = vector.shape_cast %131 : vector<8x32xf32> to vector<1x8x32xf32>
    tpu.vector_store %arg20[%c0_74, %c0_75, %c0_76], %134 {strides = array<i32>} : memref<1x8x32xf32, #tpu.memory_space<vmem>>, vector<1x8x32xf32>,
    %c0_77 = arith.constant 0 : index
    %c0_78 = arith.constant 0 : index
    %135 = vector.load %arg14[%c0_77, %c0_78] : memref<1x32xf32, #tpu.memory_space<vmem>>, vector<1x32xf32>
    %c0_79 = arith.constant 0 : index
    %c0_80 = arith.constant 0 : index
    %136 = vector.load %arg15[%c0_79, %c0_80] : memref<1x32xf32, #tpu.memory_space<vmem>>, vector<1x32xf32>
    %cst_81 = arith.constant dense<0.000000e+00> : vector<8xf32>
    %137 = vector.multi_reduction <add>, %131, %cst_81 [1] : vector<8x32xf32> to vector<8xf32>
    %138 = vector.shape_cast %137 : vector<8xf32> to vector<8x1xf32>
    %cst_82 = arith.constant 3.200000e+01 : f32
    %139 = vector.broadcast %cst_82 : f32 to vector<8x1xf32>
    %140 = arith.divf %138, %139 : vector<8x1xf32>
    %141 = vector.broadcast %140 : vector<8x1xf32> to vector<8x32xf32>
    %142 = arith.subf %131, %141 : vector<8x32xf32>
    %143 = arith.mulf %142, %142 : vector<8x32xf32>
    %cst_83 = arith.constant dense<0.000000e+00> : vector<8xf32>
    %144 = vector.multi_reduction <add>, %143, %cst_83 [1] : vector<8x32xf32> to vector<8xf32>
    %145 = vector.shape_cast %144 : vector<8xf32> to vector<8x1xf32>
    %cst_84 = arith.constant 3.200000e+01 : f32
    %146 = vector.broadcast %cst_84 : f32 to vector<8x1xf32>
    %147 = arith.divf %145, %146 : vector<8x1xf32>
    %148 = vector.broadcast %140 : vector<8x1xf32> to vector<8x32xf32>
    %149 = arith.subf %131, %148 : vector<8x32xf32>
    %cst_85 = arith.constant 9.99999974E-6 : f32
    %150 = vector.broadcast %cst_85 : f32 to vector<8x1xf32>
    %151 = arith.addf %147, %150 : vector<8x1xf32>
    %152 = math.rsqrt %151 : vector<8x1xf32>
    %153 = vector.broadcast %152 : vector<8x1xf32> to vector<8x32xf32>
    %154 = arith.mulf %149, %153 : vector<8x32xf32>
    %155 = vector.broadcast %135 : vector<1x32xf32> to vector<8x32xf32>
    %156 = arith.mulf %154, %155 : vector<8x32xf32>
    %157 = vector.broadcast %136 : vector<1x32xf32> to vector<8x32xf32>
    %158 = arith.addf %156, %157 : vector<8x32xf32>
    %159 = arith.truncf %158 : vector<8x32xf32> to vector<8x32xbf16>
    %c0_86 = arith.constant 0 : index
    %c0_87 = arith.constant 0 : index
    %160 = vector.load %arg19[%c0_86, %c0_87] : memref<1x32xf32, #tpu.memory_space<vmem>>, vector<1x32xf32>
    %161 = vector.broadcast %160 : vector<1x32xf32> to vector<8x32xf32>
    %162 = arith.addf %7, %161 : vector<8x32xf32>
    %c0_88 = arith.constant 0 : index
    %c0_89 = arith.constant 0 : index
    %163 = vector.load %arg16[%c0_88, %c0_89] : memref<32x128xbf16, #tpu.memory_space<vmem>>, vector<32x128xbf16>
    %cst_90 = arith.constant dense<0.000000e+00> : vector<8x128xf32>
    %164 = tpu.matmul %159, %163, %cst_90 {dimension_numbers = #tpu.dot_dimension_numbers<[1], [0], [0], [1], [0, 0, 1, 1], [], []>} : vector<8x32xbf16>, vector<32x128xbf16>, vector<8x128xf32> -> vector<8x128xf32>
    %c0_91 = arith.constant 0 : index
    %c0_92 = arith.constant 0 : index
    %165 = vector.load %arg17[%c0_91, %c0_92] : memref<1x128xf32, #tpu.memory_space<vmem>>, vector<1x128xf32>
    %166 = vector.broadcast %165 : vector<1x128xf32> to vector<8x128xf32>
    %167 = arith.addf %164, %166 : vector<8x128xf32>
    %cst_93 = arith.constant 5.000000e-01 : f32
    %168 = vector.broadcast %cst_93 : f32 to vector<8x128xf32>
    %169 = arith.mulf %168, %167 : vector<8x128xf32>
    %cst_94 = arith.constant 0.707106769 : f32
    %170 = vector.broadcast %cst_94 : f32 to vector<8x128xf32>
    %171 = arith.mulf %167, %170 : vector<8x128xf32>
    %172 = math.erf %171 : vector<8x128xf32>
    %cst_95 = arith.constant 1.000000e+00 : f32
    %173 = vector.broadcast %cst_95 : f32 to vector<8x128xf32>
    %174 = arith.addf %173, %172 : vector<8x128xf32>
    %175 = arith.mulf %169, %174 : vector<8x128xf32>
    %176 = arith.truncf %175 : vector<8x128xf32> to vector<8x128xbf16>
    %c0_96 = arith.constant 0 : index
    %c0_97 = arith.constant 0 : index
    %177 = vector.load %arg18[%c0_96, %c0_97] : memref<128x32xbf16, #tpu.memory_space<vmem>>, vector<128x32xbf16>
    %cst_98 = arith.constant dense<0.000000e+00> : vector<8x32xf32>
    %178 = tpu.matmul %176, %177, %cst_98 {dimension_numbers = #tpu.dot_dimension_numbers<[1], [0], [0], [1], [0, 0, 1, 1], [], []>} : vector<8x128xbf16>, vector<128x32xbf16>, vector<8x32xf32> -> vector<8x32xf32>
    %179 = arith.addf %162, %178 : vector<8x32xf32>
    %c0_99 = arith.constant 0 : index
    %c0_100 = arith.constant 0 : index
    %c0_101 = arith.constant 0 : index
    %180 = vector.load %arg21[%c0_99, %c0_100, %c0_101] : memref<1x8x32xf32, #tpu.memory_space<vmem>>, vector<1x8x32xf32>
    %181 = vector.shape_cast %180 : vector<1x8x32xf32> to vector<8x32xf32>
    %182 = vector.shape_cast %179 : vector<8x32xf32> to vector<1x8x32xf32>
    tpu.vector_store %arg21[%c0_99, %c0_100, %c0_101], %182 {strides = array<i32>} : memref<1x8x32xf32, #tpu.memory_space<vmem>>, vector<1x8x32xf32>,
    return
  }
  func.func @transform_0(%arg0: i32, %arg1: i32) -> (i32, i32, i32) {
    %c0_i32 = arith.constant 0 : i32
    %c0_i32_0 = arith.constant 0 : i32
    return %arg0, %arg1, %c0_i32 : i32, i32, i32
  }
  func.func @transform_1(%arg0: i32, %arg1: i32) -> (i32, i32, i32) {
    %c0_i32 = arith.constant 0 : i32
    %c0_i32_0 = arith.constant 0 : i32
    %c0_i32_1 = arith.constant 0 : i32
    return %arg0, %c0_i32, %c0_i32_0 : i32, i32, i32
  }
  func.func @transform_2(%arg0: i32, %arg1: i32) -> (i32, i32) {
    %c0_i32 = arith.constant 0 : i32
    %c0_i32_0 = arith.constant 0 : i32
    %c0_i32_1 = arith.constant 0 : i32
    return %c0_i32, %c0_i32_0 : i32, i32
  }
  func.func @transform_3(%arg0: i32, %arg1: i32) -> (i32, i32) {
    %c0_i32 = arith.constant 0 : i32
    %c0_i32_0 = arith.constant 0 : i32
    %c0_i32_1 = arith.constant 0 : i32
    return %c0_i32, %c0_i32_0 : i32, i32
  }
  func.func @transform_4(%arg0: i32, %arg1: i32) -> (i32, i32) {
    %c0_i32 = arith.constant 0 : i32
    %c0_i32_0 = arith.constant 0 : i32
    %c0_i32_1 = arith.constant 0 : i32
    return %c0_i32, %c0_i32_0 : i32, i32
  }
  func.func @transform_5(%arg0: i32, %arg1: i32) -> (i32, i32) {
    %c0_i32 = arith.constant 0 : i32
    %c0_i32_0 = arith.constant 0 : i32
    %c0_i32_1 = arith.constant 0 : i32
    return %c0_i32, %c0_i32_0 : i32, i32
  }
  func.func @transform_6(%arg0: i32, %arg1: i32) -> (i32, i32) {
    %c0_i32 = arith.constant 0 : i32
    %c0_i32_0 = arith.constant 0 : i32
    %c0_i32_1 = arith.constant 0 : i32
    return %c0_i32, %c0_i32_0 : i32, i32
  }
  func.func @transform_7(%arg0: i32, %arg1: i32) -> (i32, i32) {
    %c0_i32 = arith.constant 0 : i32
    %c0_i32_0 = arith.constant 0 : i32
    %c0_i32_1 = arith.constant 0 : i32
    return %c0_i32, %c0_i32_0 : i32, i32
  }
  func.func @transform_8(%arg0: i32, %arg1: i32) -> (i32, i32) {
    %c0_i32 = arith.constant 0 : i32
    %c0_i32_0 = arith.constant 0 : i32
    %c0_i32_1 = arith.constant 0 : i32
    return %c0_i32, %c0_i32_0 : i32, i32
  }
  func.func @transform_9(%arg0: i32, %arg1: i32) -> (i32, i32) {
    %c0_i32 = arith.constant 0 : i32
    %c0_i32_0 = arith.constant 0 : i32
    %c0_i32_1 = arith.constant 0 : i32
    return %c0_i32, %c0_i32_0 : i32, i32
  }
  func.func @transform_10(%arg0: i32, %arg1: i32) -> (i32, i32) {
    %c0_i32 = arith.constant 0 : i32
    %c0_i32_0 = arith.constant 0 : i32
    %c0_i32_1 = arith.constant 0 : i32
    return %c0_i32, %c0_i32_0 : i32, i32
  }
  func.func @transform_11(%arg0: i32, %arg1: i32) -> (i32, i32) {
    %c0_i32 = arith.constant 0 : i32
    %c0_i32_0 = arith.constant 0 : i32
    %c0_i32_1 = arith.constant 0 : i32
    return %c0_i32, %c0_i32_0 : i32, i32
  }
  func.func @transform_12(%arg0: i32, %arg1: i32) -> (i32, i32) {
    %c0_i32 = arith.constant 0 : i32
    %c0_i32_0 = arith.constant 0 : i32
    %c0_i32_1 = arith.constant 0 : i32
    return %c0_i32, %c0_i32_0 : i32, i32
  }
  func.func @transform_13(%arg0: i32, %arg1: i32) -> (i32, i32) {
    %c0_i32 = arith.constant 0 : i32
    %c0_i32_0 = arith.constant 0 : i32
    %c0_i32_1 = arith.constant 0 : i32
    return %c0_i32, %c0_i32_0 : i32, i32
  }
  func.func @transform_14(%arg0: i32, %arg1: i32) -> (i32, i32) {
    %c0_i32 = arith.constant 0 : i32
    %c0_i32_0 = arith.constant 0 : i32
    %c0_i32_1 = arith.constant 0 : i32
    return %c0_i32, %c0_i32_0 : i32, i32
  }
  func.func @transform_15(%arg0: i32, %arg1: i32) -> (i32, i32) {
    %c0_i32 = arith.constant 0 : i32
    %c0_i32_0 = arith.constant 0 : i32
    %c0_i32_1 = arith.constant 0 : i32
    return %c0_i32, %c0_i32_0 : i32, i32
  }
  func.func @transform_16(%arg0: i32, %arg1: i32) -> (i32, i32) {
    %c0_i32 = arith.constant 0 : i32
    %c0_i32_0 = arith.constant 0 : i32
    %c0_i32_1 = arith.constant 0 : i32
    return %c0_i32, %c0_i32_0 : i32, i32
  }
  func.func @transform_17(%arg0: i32, %arg1: i32) -> (i32, i32) {
    %c0_i32 = arith.constant 0 : i32
    %c0_i32_0 = arith.constant 0 : i32
    %c0_i32_1 = arith.constant 0 : i32
    return %c0_i32, %c0_i32_0 : i32, i32
  }
  func.func @transform_18(%arg0: i32, %arg1: i32) -> (i32, i32, i32) {
    %c0_i32 = arith.constant 0 : i32
    %c0_i32_0 = arith.constant 0 : i32
    return %arg0, %arg1, %c0_i32 : i32, i32, i32
  }
  func.func @transform_19(%arg0: i32, %arg1: i32) -> (i32, i32, i32) {
    %c0_i32 = arith.constant 0 : i32
    %c0_i32_0 = arith.constant 0 : i32
    return %arg0, %arg1, %c0_i32 : i32, i32, i32
  }
}

</mosaic_0001>

<bundles_post_ra>
// kernel: tpu_custom_call.1
= control target key start
LH: loop header
LB: loop body
LE: loop exit
PB: predicated region body
PF: predicated region fallthrough
CT: control target
= control target key end

     0   :  { %s3706_s0 = inlined_call_operand.vmem [shape: f32[2,16,32], index: 0, kind: input, shape index: {}]   ;;  %s3707_s1 = inlined_call_operand.vmem [shape: f32[2,16,32], index: 1, kind: input, shape index: {}]   ;;  %s3708_s2 = inlined_call_operand.hbm [shape: f32[1,32], index: 2, kind: input, shape index: {}]   ;;  %s3709_s3 = inlined_call_operand.hbm [shape: f32[1,32], index: 3, kind: input, shape index: {}]   ;;  %s3710_s4 = inlined_call_operand.vmem [shape: bf16[32,32], index: 4, kind: input, shape index: {}]   ;;  %s3711_s5 = inlined_call_operand.hbm [shape: f32[1,32], index: 5, kind: input, shape index: {}]   ;;  %s3712_s6 = inlined_call_operand.hbm [shape: bf16[32,32], index: 6, kind: input, shape index: {}]   ;;  %s3713_s7 = inlined_call_operand.hbm [shape: f32[1,32], index: 7, kind: input, shape index: {}]   ;;  %s3714_s8 = inlined_call_operand.hbm [shape: bf16[32,32], index: 8, kind: input, shape index: {}]   ;;  %s3715_s9 = inlined_call_operand.hbm [shape: f32[1,32], index: 9, kind: input, shape index: {}]   ;;  %s3716_s10 = inlined_call_operand.vmem [shape: bf16[32,32], index: 10, kind: input, shape index: {}]   ;;  %s3717_s11 = inlined_call_operand.vmem [shape: f32[1,32], index: 11, kind: input, shape index: {}]   ;;  %s3718_s12 = inlined_call_operand.vmem [shape: f32[1,32], index: 12, kind: input, shape index: {}]   ;;  %s3719_s13 = inlined_call_operand.vmem [shape: f32[1,32], index: 13, kind: input, shape index: {}]   ;;  %s3720_s14 = inlined_call_operand.hbm [shape: bf16[32,128], index: 14, kind: input, shape index: {}]   ;;  %s3721_s15 = inlined_call_operand.vmem [shape: f32[1,128], index: 15, kind: input, shape index: {}]   ;;  %s3722_s16 = inlined_call_operand.vmem [shape: bf16[128,32], index: 16, kind: input, shape index: {}]   ;;  %s3723_s17 = inlined_call_operand.vmem [shape: f32[1,32], index: 17, kind: input, shape index: {}]   ;;  %s3724_s18 = inlined_call_operand.hbm [shape: f32[2,16,32], index: 18, kind: output, shape index: {0}]   ;;  %s3725_s19 = inlined_call_operand.hbm [shape: f32[2,16,32], index: 19, kind: output, shape index: {1}]  }
   0x1   :  { %3742 = sst [smem:[#allocation36_spill]] %s3706_s0 }
   0x2   :  { %3743 = sst [smem:[#allocation37_spill]] %s3707_s1 }
   0x3   :  { %3744 = sst [smem:[#allocation38_spill]] %s3708_s2 }
   0x4   :  { %3745 = sst [smem:[#allocation39_spill]] %s3709_s3 }
   0x5   :  { %3746 = sst [smem:[#allocation40_spill]] %s3711_s5 }
   0x6   :  { %3747 = sst [smem:[#allocation41_spill]] %s3712_s6 }
   0x7   :  { %3748 = sst [smem:[#allocation42_spill]] %s3713_s7 }
   0x8   :  { %3749 = sst [smem:[#allocation43_spill]] %s3714_s8 }
   0x9   :  { %3750 = sst [smem:[#allocation44_spill]] %s3723_s17 }
   0xa   :  { %3751 = sst [smem:[#allocation45_spill]] %s3724_s18 }
   0xb   :  { %3752 = sst [smem:[#allocation46_spill]] %s3725_s19 }
   0xc   :  { %25 = vsyncpa [#allocation4], 0 }
   0xd   :  { %26 = vsyncpa [#allocation7], 0 }
   0xe   :  { %27 = vsyncpa [#allocation10], 0 }
   0xf   :  { %28 = vsyncpa [#allocation13], 0 }
  0x10   :  { %29 = vsyncpa [#allocation16], 0 }
  0x11   :  { %30 = vsyncpa [#allocation5], 0 }
  0x12   :  { %32 = vsyncpa [#allocation5 + $0x1], 0 }
  0x13   :  { %33 = vsyncpa [#allocation19], 0 }
  0x14   :  { %35 = vsyncpa [#allocation19 + $0x1], 0  ;;  %s3233_s0 = smov 0   ;;  %s3235_s30 = smov 0  }
  0x15   :  { %s3237_s20 = smov 0   ;;  %s3239_s21 = smov 0  }
  0x16   :  { %s3241_s1 = smov 0   ;;  %s3243_s22 = smov 0  }
  0x17   :  { %s3245_s2 = smov 0   ;;  %s3247_s23 = smov 0  }
  0x18 LB: > { %3753 = sst [smem:[#allocation27_spill]] %s3081_s0  ;;  %s2273_s24 = sadd.s32 4294967295, %s3109_s23   ;;  %s3109_s23 = sphi %s3247_s23, %s41_s23   ;;  %s3105_s2 = sphi %s3245_s2, %s3792_s2   ;;  %s3101_s22 = sphi %s3243_s22, %s3791_s22   ;;  %s3097_s1 = sphi %s3241_s1, %s3790_s1   ;;  %s3093_s21 = sphi %s3239_s21, %s3789_s21   ;;  %s3089_s20 = sphi %s3237_s20, %s3788_s20   ;;  %s3085_s30 = sphi %s3235_s30, %s3794_s30   ;;  %s3081_s0 = sphi %s3233_s0, %s3793_s0  }
  0x19   : > { %3754 = sst [smem:[#allocation28_spill]] %s3089_s20  ;;  %s2274_s25 = sadd.s32 4294967294, %s3109_s23  }
  0x1a   : > { %3755 = sst [smem:[#allocation29_spill]] %s3101_s22  ;;  %s50_s3 = sadd.s32 1, %s3101_s22 }
  0x1b   : > { %3756 = sst [smem:[#allocation30_spill]] %s3105_s2  ;;  %s53_s26 = sadd.s32 1, %s3105_s2 }
  0x1c   : > { %3757 = sst [smem:[#allocation31_spill]] %s3109_s23  ;;  %p51_p0 = scmp.ge.s32.totalorder %s50_s3, 2 }
  0x1d   : > { %s452_s27 = sadd.s32 1, %s3089_s20  ;;  %p462_p1 = scmp.ne.s32.totalorder %s3089_s20, %s3085_s30 }
  0x1e   : > { %p463_p2 = scmp.eq.s32.totalorder %s2273_s24, 3  ;;  %s3796_s3 = smov (%p51_p0, %s50_s3), 0 }
  0x1f   : > { %3758 = sst [smem:[#allocation32_spill]] %s3796_s3  ;;  %s3798_s26 = smov (!%p51_p0, %s53_s26), %s3105_s2 }
  0x20   : > { %s448_s28 = ssub.s32 %s3101_s22, %s3796_s3  ;;  %p3285_p3 = por %p463_p2, %p462_p1 }
  0x21   : > { %p55_p4 = scmp.ge.s32.totalorder %s3798_s26, 2  ;;  %p468_p5 = scmp.ne.s32.totalorder %s3085_s30, %s3081_s0 }
  0x22   : > { %s3759_s29 = scalar_select %p3285_p3, 1, 0 }
  0x23   : > { %p469_p6 = scmp.eq.s32.totalorder %s2274_s25, 3  ;;  %p2275_p7 = scmp.ge.s32.totalorder %s3109_s23, 1 }
  0x24   : > { %s3800_s26 = smov (%p55_p4, %s3798_s26), 0  ;;  %p504_p9 = scmp.lt.s32.totalorder %s3109_s23, 5 }
  0x25   : > { %3760 = sst [smem:[#allocation33_spill]] %s3800_s26  ;;  %p3294_p8 = por %p469_p6, %p468_p5 }
  0x26   : > { %s447_s17 = ssub.s32 %s3105_s2, %s3800_s26  ;;  %p3301_p10 = pnand %p2275_p7, %p504_p9 }
  0x27   : > { %s3761_s19 = scalar_select %p3294_p8, 1, 0 }
  0x28   : > { %s449_s18 = sor.u32 %s448_s28, %s447_s17  ;;  %p3305_p12 = scmp.eq.s32.totalorder %s2273_s24, 0 }
  0x29   : > { %3762 = sst [smem:[#allocation34_spill]] %s3761_s19  ;;  %p450_p11 = scmp.eq.s32.totalorder %s449_s18, 0 }
  0x2a   : > { %s3763_s3 = scalar_select %p3301_p10, 1, 0 }
  0x2b   : > { %s3764_s22 = scalar_select %p3305_p12, 1, 0 }
  0x2c   : > { %p2576_p13 = pneg %p3301_p10  ;;  %s3111_s17 = smov [#allocation6]  }
  0x2d   : > { %s3312_s25 = scalar_select %p450_p11, %s3089_s20, %s452_s27  }
  0x2e   : > { %p3316_p0 = pnand %p3305_p12, %p2576_p13  ;;  %s528_s28 = sshll.u32 %s3111_s17, 4  ;;  %s529_s28 = int_to_ptr.vmem [resolvable:$true] %s528_s28 }
  0x2f   : > { %3765 = sst [smem:[#allocation35_spill]] %s3312_s25  ;;  %s3112_s26 = smov [#allocation9]  }
  0x30   : > { %s552_s18 = sshll.u32 %s3112_s26, 4  ;;  %p3322_p1 = pneg %p3316_p0  ;;  %s553_s18 = int_to_ptr.vmem [resolvable:$true] %s552_s18 }
  0x31   : > { %s2770_s2 = scalar_lea.vmem %s529_s28, 16  ;;  %s2777_s27 = scalar_lea.vmem %s529_s28, 32 }
  0x32   : > { %p2771_p2 = scmp.ne.s32.totalorder %s529_s28, %s2770_s2  ;;  %p2778_p6 = scmp.lt.s32.totalorder %s529_s28, %s529_s28 }
  0x33   : > { %p2779_p7 = scmp.lt.s32.totalorder %s2777_s27, %s2770_s2 }
  0x34   : > { %p2773_p4 = pnand %p2771_p2, %p3322_p1 }
  0x35   : > { %p2780_p9 = por %p2779_p7, %p2778_p6 }
  0x36   : > { %p2774_p5 = pneg %p2773_p4 }
  0x38   : > { %p2781_p11 = pnand %p2780_p9, %p2774_p5 }
  0x3a   : > { %2784 = shalt.err (!%p2781_p11)
}
  0x3b   : > { %s3768_s25 = sld [smem:[#allocation39_spill]]  ;;  %s2796_s20 = scalar_lea.vmem %s553_s18, 256 }
  0x3c   : > { %p2797_p13 = scmp.ne.s32.totalorder %s553_s18, %s2796_s20  ;;  %p2804_p4 = scmp.lt.s32.totalorder %s553_s18, %s553_s18 }
  0x3d   : > { %p2805_p3 = scmp.lt.s32.totalorder %s2796_s20, %s2796_s20 }
  0x3e   : > { %p2799_p8 = pnand %p2797_p13, %p3322_p1 }
  0x3f   : > { %p2806_p12 = por %p2805_p3, %p2804_p4 }
  0x40   : > { %p2800_p2 = pneg %p2799_p8 }
  0x41   : > { %2582 = dma.hbm_to_vmem [thread:$0]  (!%p3316_p0), %s3768_s25, 16, %s529_s28, [#allocation7]  }
  0x42   : > { %p2807_p10 = pnand %p2806_p12, %p2800_p2 }
  0x44   : > { %2810 = shalt.err (!%p2807_p10)
}
  0x45   : > { %s3741_s2 = smov 64   ;;  %s3114_s27 = smov 4  }
  0x46   : > { %s3769_s6 = sld [smem:[#allocation41_spill]]  ;;  %s3115_s26 = smov [#allocation12]  }
  0x47   : > { %s576_s17 = sshll.u32 %s3115_s26, 4  ;;  %s577_s17 = int_to_ptr.vmem [resolvable:$true] %s576_s17 }
  0x48   : > { %s2822_s0 = scalar_lea.vmem %s577_s17, 256  ;;  %p2830_p12 = scmp.lt.s32.totalorder %s577_s17, %s577_s17 }
  0x49   : > { %p2823_p8 = scmp.ne.s32.totalorder %s577_s17, %s2822_s0  ;;  %p2831_p5 = scmp.lt.s32.totalorder %s2822_s0, %s2822_s0 }
  0x4b   : > { %p2825_p3 = pnand %p2823_p8, %p3322_p1  ;;  %p2832_p6 = por %p2831_p5, %p2830_p12 }
  0x4c   : > { %2588 = dma.hbm_to_vmem [thread:$0]  (!%p3316_p0), %s3769_s6, 256, %s553_s18, [#allocation10], %s3741_s2, %s3741_s2, %s3114_s27  }
  0x4d   : > { %p2826_p10 = pneg %p2825_p3 }
  0x4f   : > { %p2833_p7 = pnand %p2832_p6, %p2826_p10 }
  0x51   : > { %2836 = shalt.err (!%p2833_p7)
}
  0x52   : > { %s3770_s8 = sld [smem:[#allocation43_spill]]  ;;  %s3116_s25 = smov [#allocation3]  }
  0x53   : > { %s517_s28 = sshll.u32 %s3116_s25, 4  ;;  %s3117_s26 = smov [#allocation8]   ;;  %s518_s28 = int_to_ptr.vmem [resolvable:$true] %s517_s28 }
  0x54   : > { %s542_s6 = sshll.u32 %s3117_s26, 4  ;;  %s2848_s0 = scalar_lea.vmem %s518_s28, 16  ;;  %s543_s6 = int_to_ptr.vmem [resolvable:$true] %s542_s6 }
  0x55   : > { %p2849_p9 = scmp.ne.s32.totalorder %s518_s28, %s2848_s0  ;;  %s2855_s23 = scalar_lea.vmem %s518_s28, 32 }
  0x56   : > { %p2856_p2 = scmp.lt.s32.totalorder %s518_s28, %s518_s28  ;;  %p2857_p4 = scmp.lt.s32.totalorder %s2855_s23, %s2848_s0 }
  0x57   : > { %p2851_p11 = pnand %p2849_p9, %p3322_p1 }
  0x58   : > { %2594 = dma.hbm_to_vmem [thread:$0]  (!%p3316_p0), %s3770_s8, 256, %s577_s17, [#allocation13], %s3741_s2, %s3741_s2, %s3114_s27  }
  0x59   : > { %p2852_p13 = pneg %p2851_p11  ;;  %p2858_p8 = por %p2857_p4, %p2856_p2 }
  0x5b   : > { %p2859_p3 = pnand %p2858_p8, %p2852_p13 }
  0x5d   : > { %2862 = shalt.err (!%p2859_p3)
}
  0x5e   : > { %s3771_s18 = sld [smem:[#allocation38_spill]]  ;;  %s2874_s25 = scalar_lea.vmem %s543_s6, 16 }
  0x5f   : > { %p2875_p10 = scmp.ne.s32.totalorder %s543_s6, %s2874_s25  ;;  %s2881_s26 = scalar_lea.vmem %s543_s6, 32 }
  0x60   : > { %p2882_p6 = scmp.lt.s32.totalorder %s543_s6, %s543_s6  ;;  %p2883_p7 = scmp.lt.s32.totalorder %s2881_s26, %s2874_s25 }
  0x61   : > { %p2877_p12 = pnand %p2875_p10, %p3322_p1 }
  0x62   : > { %p2884_p9 = por %p2883_p7, %p2882_p6 }
  0x63   : > { %p2878_p5 = pneg %p2877_p12 }
  0x64   : > { %2579 = dma.hbm_to_vmem [thread:$0]  (!%p3316_p0), %s3771_s18, 16, %s518_s28, [#allocation4]  }
  0x65   : > { %p2885_p11 = pnand %p2884_p9, %p2878_p5 }
  0x67   : > { %2888 = shalt.err (!%p2885_p11)
}
  0x68   : > { %s3772_s5 = sld [smem:[#allocation40_spill]]  ;;  %s3118_s17 = smov [#allocation11]  }
  0x69   : > { %s566_s28 = sshll.u32 %s3118_s17, 4  ;;  %s3119_s20 = smov [#allocation14]   ;;  %s567_s28 = int_to_ptr.vmem [resolvable:$true] %s566_s28 }
  0x6a   : > { %s590_s18 = sshll.u32 %s3119_s20, 4  ;;  %s2900_s2 = scalar_lea.vmem %s567_s28, 16  ;;  %s591_s18 = int_to_ptr.vmem [resolvable:$true] %s590_s18 }
  0x6b   : > { %p2901_p13 = scmp.ne.s32.totalorder %s567_s28, %s2900_s2  ;;  %s2907_s25 = scalar_lea.vmem %s567_s28, 32 }
  0x6c   : > { %p2908_p8 = scmp.lt.s32.totalorder %s567_s28, %s567_s28  ;;  %p2909_p3 = scmp.lt.s32.totalorder %s2907_s25, %s2900_s2 }
  0x6d   : > { %p2903_p2 = pnand %p2901_p13, %p3322_p1 }
  0x6e   : > { %2585 = dma.hbm_to_vmem [thread:$0]  (!%p3316_p0), %s3772_s5, 16, %s543_s6, [#allocation7]  }
  0x6f   : > { %p2904_p4 = pneg %p2903_p2  ;;  %p2910_p10 = por %p2909_p3, %p2908_p8 }
  0x71   : > { %p2911_p12 = pnand %p2910_p10, %p2904_p4 }
  0x73   : > { %2914 = shalt.err (!%p2911_p12)
}
  0x74   : > { %s3773_s7 = sld [smem:[#allocation42_spill]]  ;;  %s2926_s23 = scalar_lea.vmem %s591_s18, 16 }
  0x75   : > { %p2927_p5 = scmp.ne.s32.totalorder %s591_s18, %s2926_s23  ;;  %s2933_s0 = scalar_lea.vmem %s591_s18, 32 }
  0x76   : > { %p2934_p9 = scmp.lt.s32.totalorder %s591_s18, %s591_s18  ;;  %p2935_p11 = scmp.lt.s32.totalorder %s2933_s0, %s2926_s23 }
  0x77   : > { %p2929_p6 = pnand %p2927_p5, %p3322_p1 }
  0x78   : > { %p2936_p13 = por %p2935_p11, %p2934_p9 }
  0x79   : > { %p2930_p7 = pneg %p2929_p6 }
  0x7a   : > { %2591 = dma.hbm_to_vmem [thread:$0]  (!%p3316_p0), %s3773_s7, 16, %s567_s28, [#allocation10]  }
  0x7b   : > { %p2937_p2 = pnand %p2936_p13, %p2930_p7 }
  0x7d   : > { %2940 = shalt.err (!%p2937_p2)
}
  0x7e   : > { %2597 = dma.hbm_to_vmem [thread:$0]  (!%p3316_p0), %s3715_s9, 16, %s591_s18, [#allocation13]  }
  0x7f   : > { %s3120_s20 = smov [#allocation15]  }
  0x80   : > { %s612_s28 = sshll.u32 %s3120_s20, 4  ;;  %s613_s28 = int_to_ptr.vmem [resolvable:$true] %s612_s28 }
  0x81   : > { %s2952_s25 = scalar_lea.vmem %s613_s28, 256  ;;  %p2960_p10 = scmp.lt.s32.totalorder %s613_s28, %s613_s28 }
  0x82   : > { %p2953_p4 = scmp.ne.s32.totalorder %s613_s28, %s2952_s25  ;;  %p2961_p12 = scmp.lt.s32.totalorder %s2952_s25, %s2952_s25 }
  0x84   : > { %p2955_p8 = pnand %p2953_p4, %p3322_p1  ;;  %p2962_p5 = por %p2961_p12, %p2960_p10 }
  0x86   : > { %p2956_p3 = pneg %p2955_p8 }
  0x88   : > { %p2963_p6 = pnand %p2962_p5, %p2956_p3 }
  0x8a   : > { %2966 = shalt.err (!%p2963_p6)
}
  0x8b   : > { %s3774_s6 = smov 64   ;;  %p3775_p7 = scmp.ne.s32.totalorder %s3763_s3, 0 }
  0x8c   : > { %2600 = dma.hbm_to_vmem [thread:$0]  (!%p3316_p0), %s3720_s14, 256, %s613_s28, [#allocation16], %s3774_s6, %s3774_s6, %s3114_s27  }
  0x8d   : > { %656 = sbr.rel (%p3775_p7) target bundleno = 3737 (0xe99), region = 92  ;;  %p3776_p1 = scmp.ne.s32.totalorder (!%p3775_p7), %s3764_s22, 0 }
  0x92   : > { %3052 = dma.done.wait (%p3776_p1), [#allocation4], 16  }
  0x93   : > { %3054 = vsyncadd (%p3776_p1), [#allocation4], 4294967280 }
  0x94   : > { %3056 = dma.done.wait (%p3776_p1), [#allocation7], 32  }
  0x95   : > { %3058 = vsyncadd (%p3776_p1), [#allocation7], 4294967264 }
  0x96   : > { %3060 = dma.done.wait (%p3776_p1), [#allocation10], 272  }
  0x97   : > { %3062 = vsyncadd (%p3776_p1), [#allocation10], 4294967024 }
  0x98   : > { %3064 = dma.done.wait (%p3776_p1), [#allocation13], 272  }
  0x99   : > { %3066 = vsyncadd (%p3776_p1), [#allocation13], 4294967024 }
  0x9a   : > { %3068 = dma.done.wait (%p3776_p1), [#allocation16], 256  }
  0x9b   : > { %3070 = vsyncadd (%p3776_p1), [#allocation16], 4294967040  ;;  %s3414_s19 = sand.u32 1, %s3085_s30   ;;  %p753_p0 = scmp.lt.s32.totalorder %s3097_s1, 1 }
  0x9c   : > { %s2294_s3 = sshll.u32 %s3414_s19, 3  ;;  %p755_p9 = scmp.lt.s32.totalorder %s3093_s21, 1 }
  0x9d   : > { %s754_s24 = scalar_select %p753_p0, %s3097_s1, 1 }
  0x9e   : > { %s756_s27 = scalar_select %p755_p9, %s3093_s21, 1 }
  0x9f   : > { %s2296_s23 = sshll.u32 %s754_s24, 1  ;;  %s2366_s0 = sshll.u32 %s754_s24, 4 }
  0xa0   : > { %s758_s2 = sadd.s32 %s2296_s23, %s756_s27  ;;  %s3777_s22 = sld [smem:[#allocation37_spill]] }
  0xa1   : > { %s2297_s25 = sshll.u32 %s758_s2, 3  ;;  %s3778_s18 = sld [smem:[#allocation36_spill]] }
  0xa2   : > { %s3431_s7 = scalar_lea.vmem [#allocation17], %s2294_s3  ;;  %s3433_s8 = scalar_lea.vmem [#allocation18], %s2294_s3 }
  0xa3   : > { %p2300_p11 = scmp.ne.s32.totalorder %s3093_s21, 0 }
  0xa4   : > { %s3123_s3 = smov (!%p2300_p11), 120   ;;  %s3124_s24 = smov (!%p2300_p11), 112  }
  0xa5   : > { %770 = sbr.rel (%p2300_p11) target bundleno = 822 (0x336), region = 128  ;;  %s3125_s27 = smov (!%p2300_p11), 104  }
  0xa6   : > { %s3424_s28 = scalar_lea.vmem %s3777_s22, %s2366_s0 }
  0xa7   : > { %s3429_s5 = scalar_lea.vmem %s3778_s18, %s2297_s25 }
  0xaa   : > { %v771_v0 = vld [vmem:[%s3424_s28] sm:$0xff]  ;;  %vm775_vm0 = vcmask 261120   ;;  %v772_v1 = vld [vmem:[%s3424_s28 + $0x8] sm:$0xff]  ;;  %v3121_v16 = vmov 0.0   ;;  %v2712_v18 = vld [vmem:[#allocation12] sm:$0xff]   ;;  %vm3122_vm1 = vmmov 0  }
  0xab   : > { %v776_v2 = vsel %vm775_vm0, %v771_v0, 0.0  ;;  %v779_v3 = vsel %vm775_vm0, %v772_v1, 0.0  ;;  %v2709_v14 = vld [vmem:[#allocation9 + $0x8] sm:$0xff]   ;;  %v2710_v15 = vld [vmem:[#allocation12 + $0x8] sm:$0xff]   ;;  %2416 = vmatprep.subr.bf16.mxu0 %v3121_v16  ;;  %2424 = vmatprep.subr.bf16.mxu1 %v3121_v16  ;;  %v2303_v36 = vld [vmem:[#allocation11] ss:$0 sm:$0xff] }
  0xac   : > { %777 = vadd.xlane.f32.xlu0 %v776_v2  ;;  %2417 = vmatpush3.bf16.msra.mxu0 %v2709_v14  ;;  %v2711_v17 = vld [vmem:[#allocation9] sm:$0xff]   ;;  %v2301_v27 = vld [vmem:[#allocation3] ss:$0 sm:$0xff]  ;;  %v2302_v31 = vld [vmem:[#allocation6] ss:$0 sm:$0xff]  ;;  %vm959_vm2 = vcmask 60416  }
  0xad   : > { %2425 = vmatpush3.bf16.msra.mxu1 %v2710_v15  ;;  %2418 = vmatprep.subr.bf16.mxu0 %v3121_v16  ;;  %v2307_v37 = vld [vmem:[#allocation14] ss:$0 sm:$0xff] }
  0xae   : > { %2426 = vmatprep.subr.bf16.mxu1 %v3121_v16  ;;  %2420 = vmatprep.mubr.msk.bf16.mxu0 %vm3122_vm1, %v3121_v16 }
  0xaf   : > { %2428 = vmatprep.mubr.msk.bf16.mxu1 %vm3122_vm1, %v3121_v16 }
  0xb0   : > { %780 = vadd.xlane.f32.xlu0 %v779_v3  ;;  %2419 = vmatpush3.bf16.msra.mxu0 %v2711_v17 }
  0xb1   : > { %2427 = vmatpush3.bf16.msra.mxu1 %v2712_v18 }
 0x135   : > { %v778_v4 = vpop.xlane.xlu0 %777 }
 0x136   : > { %v783_v5 = vmul.f32 0.03125, %v778_v4 }
 0x138   : > { %v785_v6 = vsub.f32 %v771_v0, %v783_v5 }
 0x139   : > { %v781_v7 = vpop.xlane.xlu0 %780 }
 0x13a   : > { %v784_v8 = vmul.f32 0.03125, %v781_v7  ;;  %v787_v9 = vmul.f32 %v785_v6, %v785_v6 }
 0x13c   : > { %v786_v10 = vsub.f32 %v772_v1, %v784_v8  ;;  %v789_v11 = vsel %vm775_vm0, %v787_v9, 0.0 }
 0x13d   : > { %790 = vadd.xlane.f32.xlu1 %v789_v11 }
 0x13e   : > { %v788_v12 = vmul.f32 %v786_v10, %v786_v10 }
 0x140   : > { %v792_v13 = vsel %vm775_vm0, %v788_v12, 0.0 }
 0x141   : > { %793 = vadd.xlane.f32.xlu1 %v792_v13 }
 0x1c6   : > { %v791_v19 = vpop.xlane.xlu1 %790 }
 0x1c7   : > { %v795_v20 = vmul.f32 0.03125, %v791_v19 }
 0x1c9   : > { %v797_v21 = vadd.f32 1e-06, %v795_v20 }
 0x1ca   : > { %v794_v22 = vpop.xlane.xlu1 %793 }
 0x1cb   : > { %2713 = vrsqrt.f32 %v797_v21  ;;  %v796_v23 = vmul.f32 0.03125, %v794_v22 }
 0x1cd   : > { %v798_v24 = vadd.f32 1e-06, %v796_v23 }
 0x1cf   : > { %2715 = vrsqrt.f32 %v798_v24 }
 0x1d8   : > { %v2714_v25 = vpop.eup %2713 }
 0x1d9   : > { %v801_v26 = vmul.f32 %v2714_v25, %v785_v6 }
 0x1db   : > { %v809_v30 = vmul.f32 %v2301_v27, %v801_v26 }
 0x1dc   : > { %v2716_v28 = vpop.eup %2715 }
 0x1dd   : > { %v802_v29 = vmul.f32 %v2716_v28, %v786_v10  ;;  %v817_v33 = vadd.f32 %v2302_v31, %v809_v30 }
 0x1df   : > { %v810_v32 = vmul.f32 %v2301_v27, %v802_v29 }
 0x1e1   : > { %v818_v34 = vadd.f32 %v2302_v31, %v810_v32 }
 0x1e3   : > { %v819_v35 = vpack.c.bf16 %v818_v34, %v817_v33 }
 0x1e5   : > { %2421 = vmatmul.mubr.msk.bf16.vlgmr.msra.gmra.mxu0 %vm775_vm0, %v819_v35  ;;  %2429 = vmatmul.mubr.msk.bf16.vlgmr.msra.gmra.mxu1 %vm775_vm0, %v819_v35 }
 0x2a5   : > { %v880_v38 = vpop.f32.mrf.mxu0  ;;  %v944_v39 = vpop.f32.mrf.mxu1 }
 0x2a6   : > { %v881_v40 = vadd.f32 %v2303_v36, %v880_v38  ;;  %v945_v41 = vadd.f32 %v2307_v37, %v944_v39 }
 0x2a7   : > { %v2422_v42 = vpop.f32.mrf.mxu0  ;;  %v2430_v43 = vpop.f32.mrf.mxu1 }
 0x2a8   : > { %v2367_v44 = vpack.c.bf16 %v881_v40, %v881_v40  ;;  %v2369_v45 = vpack.c.bf16 %v945_v41, %v945_v41 }
 0x2a9   : > { %v883_v46 = vpop.f32.mrf.mxu0  ;;  %v947_v47 = vpop.f32.mrf.mxu1 }
 0x2aa   : > { %960 = vst.msk [vmem:[#allocation2] sm:$0xf] %vm959_vm2, %v2367_v44  ;;  %971 = vst.msk [vmem:[#allocation2 + $0x20] sm:$0xf] %vm959_vm2, %v2369_v45  ;;  %v884_v48 = vadd.f32 %v2303_v36, %v883_v46  ;;  %v948_v49 = vadd.f32 %v2307_v37, %v947_v47  ;;  %982 = vrot.lane.b32.xlu1 %v2369_v45, %s3123_s3  ;;  %973 = vrot.lane.b32.xlu0 %v2367_v44, %s3123_s3 }
 0x2ab   : > { %v2423_v50 = vpop.f32.mrf.mxu0  ;;  %v2431_v51 = vpop.f32.mrf.mxu1 }
 0x2ac   : > { %v2368_v52 = vpack.c.bf16 %v884_v48, %v884_v48  ;;  %v2370_v53 = vpack.c.bf16 %v948_v49, %v948_v49 }
 0x2ae   : > { %961 = vst.msk [vmem:[#allocation2 + $0x4] sm:$0xf] %vm959_vm2, %v2368_v52  ;;  %972 = vst.msk [vmem:[#allocation2 + $0x24] sm:$0xf] %vm959_vm2, %v2370_v53  ;;  %991 = vrot.lane.b32.xlu0 %v2367_v44, %s3124_s24  ;;  %975 = vrot.lane.b32.xlu1 %v2368_v52, %s3123_s3 }
 0x2b2   : > { %1000 = vrot.lane.b32.xlu0 %v2369_v45, %s3124_s24  ;;  %984 = vrot.lane.b32.xlu1 %v2370_v53, %s3123_s3 }
 0x2b6   : > { %1009 = vrot.lane.b32.xlu0 %v2367_v44, %s3125_s27  ;;  %993 = vrot.lane.b32.xlu1 %v2368_v52, %s3124_s24 }
 0x2ba   : > { %1018 = vrot.lane.b32.xlu0 %v2369_v45, %s3125_s27  ;;  %1002 = vrot.lane.b32.xlu1 %v2370_v53, %s3124_s24 }
 0x2be   : > { %1011 = vrot.lane.b32.xlu1 %v2368_v52, %s3125_s27 }
 0x2c2   : > { %1020 = vrot.lane.b32.xlu1 %v2370_v53, %s3125_s27 }
 0x31c   : > { %v983_v54 = vpop.permute.xlu1 %982  ;;  %v974_v55 = vpop.permute.xlu0 %973 }
 0x31d   : > { %989 = vst.msk [vmem:[#allocation2 + $0x28] sm:$0xf] %vm959_vm2, %v983_v54  ;;  %980 = vst.msk [vmem:[#allocation2 + $0x8] sm:$0xf] %vm959_vm2, %v974_v55 }
 0x320   : > { %v992_v56 = vpop.permute.xlu0 %991  ;;  %v976_v57 = vpop.permute.xlu1 %975 }
 0x321   : > { %998 = vst.msk [vmem:[#allocation2 + $0x10] sm:$0xf] %vm959_vm2, %v992_v56  ;;  %981 = vst.msk [vmem:[#allocation2 + $0xc] sm:$0xf] %vm959_vm2, %v976_v57 }
 0x324   : > { %v1001_v58 = vpop.permute.xlu0 %1000  ;;  %v985_v59 = vpop.permute.xlu1 %984 }
 0x325   : > { %1007 = vst.msk [vmem:[#allocation2 + $0x30] sm:$0xf] %vm959_vm2, %v1001_v58  ;;  %990 = vst.msk [vmem:[#allocation2 + $0x2c] sm:$0xf] %vm959_vm2, %v985_v59 }
 0x328   : > { %v1010_v60 = vpop.permute.xlu0 %1009  ;;  %v994_v61 = vpop.permute.xlu1 %993 }
 0x329   : > { %1016 = vst.msk [vmem:[#allocation2 + $0x18] sm:$0xf] %vm959_vm2, %v1010_v60  ;;  %999 = vst.msk [vmem:[#allocation2 + $0x14] sm:$0xf] %vm959_vm2, %v994_v61 }
 0x32c   : > { %v1019_v62 = vpop.permute.xlu0 %1018  ;;  %v1003_v63 = vpop.permute.xlu1 %1002 }
 0x32d   : > { %1025 = vst.msk [vmem:[#allocation2 + $0x38] sm:$0xf] %vm959_vm2, %v1019_v62  ;;  %1008 = vst.msk [vmem:[#allocation2 + $0x34] sm:$0xf] %vm959_vm2, %v1003_v63 }
 0x330   : > { %v1012_v0 = vpop.permute.xlu1 %1011 }
 0x331   : > { %1017 = vst.msk [vmem:[#allocation2 + $0x1c] sm:$0xf] %vm959_vm2, %v1012_v0 }
 0x334   : > { %v1021_v1 = vpop.permute.xlu1 %1020 }
 0x335   : > { %1026 = vst.msk [vmem:[#allocation2 + $0x3c] sm:$0xf] %vm959_vm2, %v1021_v1 }
 0x336 PF: > { %s2315_s23 = sshll.u32 %s3093_s21, 3  ;;  %vm1032_vm3 = vcmask 261120   ;;  %v2717_v9 = vld [vmem:[%s3710_s4 + $0x8] sm:$0xff]   ;;  %v3126_v10 = vmov 0.0   ;;  %vm3127_vm4 = vmmov 0   ;;  %v2718_v11 = vld [vmem:[%s3710_s4] sm:$0xff]  }
 0x337   : > { %s1028_s0 = scalar_lea.vmem %s3424_s28, %s2315_s23  ;;  %2432 = vmatprep.subr.bf16.mxu1 %v3126_v10  ;;  %2436 = vmatprep.mubr.msk.bf16.mxu1 %vm3127_vm4, %v3126_v10  ;;  %v2316_v16 = vld [vmem:[#allocation3] ss:$0 sm:$0xff]  ;;  %v2317_v18 = vld [vmem:[#allocation6] ss:$0 sm:$0xff]  ;;  %vm1148_vm5 = vcmask 64512   ;;  %v2720_v24 = vld [vmem:[#allocation2 + $0x8] sm:$0xff]  }
 0x338   : > { %v3462_v2 = vld [vmem:[%s1028_s0] sm:$0xff]  ;;  %2433 = vmatpush3.bf16.msra.mxu1 %v2717_v9  ;;  %2458 = vmatprep.subr.bf16.mxu0 %v3126_v10  ;;  %v1325_v25 = vsel %vm1148_vm5, %v2720_v24, 0  ;;  %s3128_s28 = smov 120   ;;  %vm1195_vm6 = vcmask 130048   ;;  %s3129_s25 = smov 112   ;;  %vm1262_vm7 = vcmask 1043456  }
 0x339   : > { %v1033_v3 = vsel %vm1032_vm3, %v3462_v2, 0.0  ;;  %2434 = vmatprep.subr.bf16.mxu1 %v3126_v10  ;;  %2460 = vmatprep.mubr.msk.bf16.mxu0 %vm3127_vm4, %v3126_v10  ;;  %v2719_v20 = vld [vmem:[#allocation2] sm:$0xff]   ;;  %v2722_v63 = vld [vmem:[#allocation2 + $0x28] sm:$0xff]   ;;  %s3130_s24 = smov 104   ;;  %s2360_s3 = sshll.u32 %s3097_s1, 1 }
 0x33a   : > { %1034 = vadd.xlane.f32.xlu0 %v1033_v3  ;;  %v1153_v23 = vsel %vm1148_vm5, %v2719_v20, 0  ;;  %2459 = vmatpush3.bf16.xpose.msra.mxu0 %v1325_v25  ;;  %v2318_v26 = vld [vmem:[#allocation8] ss:$0 sm:$0xff]  ;;  %v1258_v51 = vld [vmem:[%s3716_s10] sm:$0xf]  ;;  %s2053_s23 = sshll.u32 %s3431_s7, 4  ;;  %s2054_s23 = int_to_ptr.vmem [resolvable:$true] %s2053_s23 }
 0x33b   : > { %2470 = vmatprep.subr.bf16.mxu0 %v3126_v10  ;;  %v2721_v39 = vld [vmem:[#allocation2 + $0x20] sm:$0xff]   ;;  %v1264_v52 = vsel %vm1262_vm7, %v1258_v51, 0  ;;  %s2033_s20 = scalar_lea.sflag [#allocation5], %s3414_s19  ;;  %s2967_s22 = scalar_lea.vmem %s2054_s23, 128 }
 0x33c   : > { %2435 = vmatpush3.bf16.msra.mxu1 %v2718_v11  ;;  %p2968_p13 = scmp.ne.s32.totalorder %s2054_s23, %s2967_s22  ;;  %p3780_p2 = scmp.ne.s32.totalorder %s3759_s29, 0 }
 0x33d   : > { %2440 = vmatprep.subr.bf16.mxu1 %v3126_v10 }
 0x33e   : > { %p2969_p4 = pnand %p2968_p13, %p3780_p2 }
 0x340   : > { %p2970_p8 = pneg %p2969_p4 }
 0x3c3   : > { %v1035_v4 = vpop.xlane.xlu0 %1034 }
 0x3c4   : > { %v1037_v5 = vmul.f32 0.03125, %v1035_v4  ;;  %v2723_v4 = vld [vmem:[#allocation2 + $0x10] sm:$0xff]  }
 0x3c6   : > { %v1038_v6 = vsub.f32 %v3462_v2, %v1037_v5 }
 0x3c8   : > { %v1039_v7 = vmul.f32 %v1038_v6, %v1038_v6 }
 0x3ca   : > { %v1040_v8 = vsel %vm1032_vm3, %v1039_v7, 0.0 }
 0x3cb   : > { %1041 = vadd.xlane.f32.xlu0 %v1040_v8  ;;  %v1429_v8 = vld [vmem:[%s3716_s10 + $0x4] sm:$0xf] }
 0x3cc   : > { %v1434_v9 = vsel %vm1262_vm7, %v1429_v8, 0 }
 0x454   : > { %v1042_v12 = vpop.xlane.xlu0 %1041 }
 0x455   : > { %v1043_v13 = vmul.f32 0.03125, %v1042_v12 }
 0x457   : > { %v1044_v14 = vadd.f32 1e-06, %v1043_v13 }
 0x459   : > { %2737 = vrsqrt.f32 %v1044_v14 }
 0x466   : > { %v2738_v15 = vpop.eup %2737 }
 0x467   : > { %v1046_v17 = vmul.f32 %v2738_v15, %v1038_v6  ;;  %v1494_v6 = vsel %vm1148_vm5, %v2723_v4, 0 }
 0x469   : > { %v1053_v19 = vmul.f32 %v2316_v16, %v1046_v17 }
 0x46b   : > { %v1060_v21 = vadd.f32 %v2317_v18, %v1053_v19 }
 0x46d   : > { %v1061_v22 = vpack.c.bf16 %v1060_v21, %v1060_v21 }
 0x46f   : > { %2437 = vmatmul.mubr.msk.bf16.vlgmr.msra.gmra.mxu1 %vm1032_vm3, %v1061_v22 }
 0x470   : > { %2441 = vmatpush3.bf16.xpose.msra.mxu1 %v1153_v23  ;;  %2442 = vmatprep.mubr.msk.bf16.mxu1 %vm3127_vm4, %v3126_v10 }
 0x471   : > { %2446 = vmatprep.subr.bf16.mxu1 %v3126_v10 }
 0x52f   : > { %v1122_v27 = vpop.f32.mrf.mxu1 }
 0x530   : > { %v1123_v28 = vadd.f32 %v2318_v26, %v1122_v27 }
 0x531   : > { %v2438_v29 = vpop.f32.mrf.mxu1 }
 0x532   : > { %v3489_v30 = vpack.c.bf16 %v1123_v28, %v1123_v28  ;;  %v2724_v28 = vld [vmem:[#allocation2 + $0x30] sm:$0xff]  }
 0x533   : > { %v1125_v31 = vpop.f32.mrf.mxu1 }
 0x534   : > { %1314 = vrot.lane.b32.xlu1 %v3489_v30, %s3128_s28  ;;  %2443 = vmatmul.mubr.msk.bf16.vlgmr.msra.gmra.mxu1 %vm1148_vm5, %v3489_v30  ;;  %s3131_s28 = smov [#allocation17]  }
 0x535   : > { %v2439_v32 = vpop.f32.mrf.mxu1  ;;  %2448 = vmatprep.mubr.msk.bf16.mxu1 %vm3127_vm4, %v3126_v10  ;;  %2447 = vmatpush3.bf16.msra.mxu1 %v2721_v39  ;;  %v2322_v39 = vld [vmem:[%s3717_s11] ss:$0 sm:$0xff]  ;;  %s2971_s1 = sshll.u32 %s3131_s28, 4  ;;  %s2972_s1 = int_to_ptr.vmem [resolvable:$false] %s2971_s1 }
 0x536   : > { %2452 = vmatprep.subr.bf16.mxu1 %v3126_v10  ;;  %p2974_p3 = scmp.lt.s32.totalorder %s2054_s23, %s2972_s1 }
 0x5a6   : > { %v1315_v33 = vpop.permute.xlu1 %1314 }
 0x5a7   : > { %2461 = vmatmul.mubr.msk.bf16.vlgmr.msra.gmra.mxu0 %vm1148_vm5, %v1315_v33  ;;  %v2725_v33 = vld [vmem:[#allocation2 + $0x18] sm:$0xff]  }
 0x5a8   : > { %2472 = vmatprep.mubr.msk.bf16.mxu0 %vm3127_vm4, %v3126_v10  ;;  %2471 = vmatpush3.bf16.msra.mxu0 %v1434_v9 }
 0x5a9   : > { %2482 = vmatprep.subr.bf16.mxu0 %v3126_v10 }
 0x5f4   : > { %v1189_v34 = vpop.f32.mrf.mxu1 }
 0x5f5   : > { %v1196_v35 = vsel %vm1195_vm6, %v1189_v34, -inf }
 0x5f6   : > { %1197 = vmax.xlane.f32.xlu1 %v1196_v35  ;;  %v2444_v36 = vpop.f32.mrf.mxu1 }
 0x5f8   : > { %v1192_v37 = vpop.f32.mrf.mxu1 }
 0x5f9   : > { %v1663_v37 = vsel %vm1148_vm5, %v2725_v33, 0 }
 0x5fa   : > { %v2445_v38 = vpop.f32.mrf.mxu1 }
 0x5fb   : > { %v1129_v38 = vld [vmem:[%s3429_s5] sm:$0xff]  ;;  %s3779_s5 = sld [smem:[#allocation45_spill]] }
 0x667   : > { %v1361_v40 = vpop.f32.mrf.mxu0 }
 0x668   : > { %v1367_v50 = vsel %vm1195_vm6, %v1361_v40, -inf }
 0x669   : > { %v2462_v41 = vpop.f32.mrf.mxu0 }
 0x66b   : > { %v1364_v42 = vpop.f32.mrf.mxu0 }
 0x66d   : > { %v2463_v43 = vpop.f32.mrf.mxu0 }
 0x67f   : > { %v1198_v44 = vpop.xlane.xlu1 %1197 }
 0x680   : > { %v1199_v45 = vsub.f32 %v1189_v34, %v1198_v44 }
 0x682   : > { %v1200_v46 = vmul.f32 1.442695, %v1199_v45 }
 0x684   : > { %2739 = vpow2.f32 %v1200_v46 }
 0x691   : > { %v2740_v47 = vpop.eup %2739 }
 0x692   : > { %v1202_v48 = vsel %vm1195_vm6, %v2740_v47, 0.0  ;;  %v1205_v49 = vpack.c.bf16 %v2740_v47, %v2740_v47  ;;  %v1598_v47 = vld [vmem:[%s3716_s10 + $0x8] sm:$0xf] }
 0x693   : > { %1203 = vadd.xlane.f32.xlu0 %v1202_v48  ;;  %v1603_v48 = vsel %vm1262_vm7, %v1598_v47, 0  ;;  %v2731_v47 = vld [vmem:[%s3722_s16 + $0x28] sm:$0xff]  }
 0x694   : > { %2449 = vmatmul.mubr.msk.bf16.vlgmr.msra.gmra.mxu1 %vm1195_vm6, %v1205_v49 }
 0x695   : > { %2454 = vmatprep.mubr.msk.bf16.mxu1 %vm3127_vm4, %v3126_v10  ;;  %2453 = vmatpush3.bf16.msra.mxu1 %v1264_v52 }
 0x696   : > { %2464 = vmatprep.subr.bf16.mxu1 %v3126_v10 }
 0x697   : > { %1368 = vmax.xlane.f32.xlu0 %v1367_v50 }
 0x6ad   : > { %1483 = vrot.lane.b32.xlu0 %v3489_v30, %s3129_s25 }
 0x71c   : > { %v1204_v53 = vpop.xlane.xlu0 %1203 }
 0x720   : > { %v1369_v54 = vpop.xlane.xlu0 %1368 }
 0x721   : > { %v1370_v55 = vsub.f32 %v1361_v40, %v1369_v54  ;;  %v1137_v40 = vadd.f32 %v2322_v39, %v1129_v38 }
 0x723   : > { %v1371_v56 = vmul.f32 1.442695, %v1370_v55 }
 0x724   : > { %v1484_v7 = vpop.permute.xlu0 %1483 }
 0x725   : > { %2741 = vpow2.f32 %v1371_v56 }
 0x726   : > { %2743 = vrcp.f32 %v1204_v53 }
 0x732   : > { %v2742_v57 = vpop.eup %2741 }
 0x733   : > { %v1373_v58 = vsel %vm1195_vm6, %v2742_v57, 0.0  ;;  %v2744_v59 = vpop.eup %2743  ;;  %v1376_v5 = vpack.c.bf16 %v2742_v57, %v2742_v57 }
 0x734   : > { %1374 = vadd.xlane.f32.xlu0 %v1373_v58 }
 0x754   : > { %v1249_v60 = vpop.f32.mrf.mxu1 }
 0x755   : > { %v1256_v61 = vmul.f32 %v2744_v59, %v1249_v60 }
 0x756   : > { %v2450_v62 = vpop.f32.mrf.mxu1 }
 0x757   : > { %v1257_v0 = vpack.c.bf16 %v1256_v61, %v1256_v61  ;;  %v2726_v62 = vld [vmem:[#allocation2 + $0x38] sm:$0xff]  }
 0x758   : > { %v1252_v1 = vpop.f32.mrf.mxu1 }
 0x759   : > { %2455 = vmatmul.mubr.msk.bf16.vlgmr.msra.gmra.mxu1 %vm1148_vm5, %v1257_v0 }
 0x75a   : > { %2465 = vmatpush3.bf16.msra.mxu1 %v2722_v63  ;;  %v2451_v3 = vpop.f32.mrf.mxu1  ;;  %2466 = vmatprep.mubr.msk.bf16.mxu1 %vm3127_vm4, %v3126_v10 }
 0x75b   : > { %2476 = vmatprep.subr.bf16.mxu1 %v3126_v10 }
 0x761   : > { %2467 = vmatmul.mubr.msk.bf16.vlgmr.msra.gmra.mxu1 %vm1195_vm6, %v1376_v5 }
 0x762   : > { %2477 = vmatpush3.bf16.xpose.msra.mxu1 %v1494_v6  ;;  %2478 = vmatprep.mubr.msk.bf16.mxu1 %vm3127_vm4, %v3126_v10  ;;  %v1767_v6 = vld [vmem:[%s3716_s10 + $0xc] sm:$0xf] }
 0x763   : > { %2488 = vmatprep.subr.bf16.mxu1 %v3126_v10 }
 0x769   : > { %2479 = vmatmul.mubr.msk.bf16.vlgmr.msra.gmra.mxu1 %vm1148_vm5, %v1484_v7  ;;  %v1772_v7 = vsel %vm1262_vm7, %v1767_v6, 0 }
 0x76a   : > { %2490 = vmatprep.mubr.msk.bf16.mxu1 %vm3127_vm4, %v3126_v10  ;;  %2489 = vmatpush3.bf16.msra.mxu1 %v1603_v48  ;;  %v2732_v48 = vld [vmem:[%s3722_s16 + $0x20] sm:$0xff]  }
 0x76b   : > { %2500 = vmatprep.subr.bf16.mxu1 %v3126_v10 }
 0x7bd   : > { %v1375_v11 = vpop.xlane.xlu0 %1374 }
 0x7be   : > { %2745 = vrcp.f32 %v1375_v11 }
 0x7cb   : > { %v2746_v16 = vpop.eup %2745 }
 0x819   : > { %v1300_v12 = vpop.f32.mrf.mxu1 }
 0x81a   : > { %v1306_v41 = vadd.f32 %v1300_v12, %v1137_v40 }
 0x81b   : > { %v2456_v13 = vpop.f32.mrf.mxu1 }
 0x81d   : > { %v1303_v14 = vpop.f32.mrf.mxu1 }
 0x81f   : > { %v2457_v15 = vpop.f32.mrf.mxu1 }
 0x821   : > { %v1420_v17 = vpop.f32.mrf.mxu1 }
 0x822   : > { %v1427_v18 = vmul.f32 %v2746_v16, %v1420_v17 }
 0x823   : > { %v2468_v19 = vpop.f32.mrf.mxu1 }
 0x824   : > { %v1428_v20 = vpack.c.bf16 %v1427_v18, %v1427_v18 }
 0x825   : > { %v1423_v21 = vpop.f32.mrf.mxu1 }
 0x826   : > { %2473 = vmatmul.mubr.msk.bf16.vlgmr.msra.gmra.mxu0 %vm1148_vm5, %v1428_v20 }
 0x827   : > { %v2469_v22 = vpop.f32.mrf.mxu1  ;;  %2484 = vmatprep.mubr.msk.bf16.mxu0 %vm3127_vm4, %v3126_v10  ;;  %2483 = vmatpush3.bf16.msra.mxu0 %v2724_v28 }
 0x828   : > { %2494 = vmatprep.subr.bf16.mxu0 %v3126_v10 }
 0x829   : > { %v1530_v23 = vpop.f32.mrf.mxu1 }
 0x82a   : > { %v1536_v24 = vsel %vm1195_vm6, %v1530_v23, -inf }
 0x82b   : > { %1537 = vmax.xlane.f32.xlu1 %v1536_v24  ;;  %v2480_v25 = vpop.f32.mrf.mxu1 }
 0x82d   : > { %v1533_v26 = vpop.f32.mrf.mxu1 }
 0x82f   : > { %v2481_v27 = vpop.f32.mrf.mxu1 }
 0x83c   : > { %1652 = vrot.lane.b32.xlu1 %v3489_v30, %s3130_s24  ;;  %s3619_s24 = sadd.s32 %s3093_s21, %s2360_s3  ;;  %s2973_s21 = scalar_lea.vmem %s2972_s1, 256 }
 0x83d   : > { %s2361_s27 = sshll.u32 %s3619_s24, 7  ;;  %p2975_p10 = scmp.lt.s32.totalorder %s2973_s21, %s2967_s22 }
 0x83e   : > { %s2051_s17 = scalar_lea.hbm %s3779_s5, %s2361_s27 }
 0x83f   : > { %p2976_p12 = por %p2975_p10, %p2974_p3 }
 0x841   : > { %p2977_p5 = pnand %p2976_p12, %p2970_p8 }
 0x8b4   : > { %v1538_v29 = vpop.xlane.xlu1 %1537 }
 0x8b5   : > { %v1539_v31 = vsub.f32 %v1530_v23, %v1538_v29 }
 0x8b7   : > { %v1540_v32 = vmul.f32 1.442695, %v1539_v31 }
 0x8b8   : > { %v1653_v30 = vpop.permute.xlu1 %1652 }
 0x8b9   : > { %2747 = vpow2.f32 %v1540_v32 }
 0x8c6   : > { %v2748_v34 = vpop.eup %2747 }
 0x8c7   : > { %v1542_v35 = vsel %vm1195_vm6, %v2748_v34, 0.0  ;;  %v1545_v36 = vpack.c.bf16 %v2748_v34, %v2748_v34  ;;  %v2727_v34 = vld [vmem:[#allocation15 + $0x8] sm:$0xff]  }
 0x8c8   : > { %1543 = vadd.xlane.f32.xlu1 %v1542_v35  ;;  %v2728_v35 = vld [vmem:[#allocation15] sm:$0xff]  }
 0x8c9   : > { %2485 = vmatmul.mubr.msk.bf16.vlgmr.msra.gmra.mxu0 %vm1195_vm6, %v1545_v36  ;;  %v2729_v36 = vld [vmem:[%s3722_s16 + $0x38] sm:$0xff]  }
 0x8ca   : > { %2495 = vmatpush3.bf16.xpose.msra.mxu0 %v1663_v37  ;;  %2496 = vmatprep.mubr.msk.bf16.mxu0 %vm3127_vm4, %v3126_v10  ;;  %v2730_v37 = vld [vmem:[%s3722_s16 + $0x30] sm:$0xff]  }
 0x8cb   : > { %2506 = vmatprep.subr.bf16.mxu0 %v3126_v10 }
 0x8d1   : > { %2497 = vmatmul.mubr.msk.bf16.vlgmr.msra.gmra.mxu0 %vm1148_vm5, %v1653_v30 }
 0x8d2   : > { %2508 = vmatprep.mubr.msk.bf16.mxu0 %vm3127_vm4, %v3126_v10  ;;  %2507 = vmatpush3.bf16.msra.mxu0 %v1772_v7 }
 0x8d3   : > { %2520 = vmatprep.subr.bf16.mxu0 %v3126_v10 }
 0x8e6   : > { %v1470_v42 = vpop.f32.mrf.mxu0 }
 0x8e7   : > { %v1476_v43 = vadd.f32 %v1470_v42, %v1306_v41  ;;  %v2343_v41 = vld [vmem:[%s3718_s12] ss:$0 sm:$0xff] }
 0x8e8   : > { %v2474_v44 = vpop.f32.mrf.mxu0 }
 0x8ea   : > { %v1473_v45 = vpop.f32.mrf.mxu0 }
 0x8ec   : > { %v2475_v46 = vpop.f32.mrf.mxu0 }
 0x951   : > { %v1544_v49 = vpop.xlane.xlu1 %1543 }
 0x952   : > { %2749 = vrcp.f32 %v1544_v49  ;;  %v2733_v49 = vld [vmem:[%s3722_s16 + $0x18] sm:$0xff]  }
 0x95f   : > { %v2750_v50 = vpop.eup %2749 }
 0x989   : > { %v1589_v51 = vpop.f32.mrf.mxu0 }
 0x98a   : > { %v1596_v52 = vmul.f32 %v2750_v50, %v1589_v51  ;;  %v2734_v50 = vld [vmem:[%s3722_s16 + $0x10] sm:$0xff]   ;;  %v2735_v51 = vld [vmem:[%s3722_s16 + $0x8] sm:$0xff]  }
 0x98b   : > { %v2486_v53 = vpop.f32.mrf.mxu0 }
 0x98c   : > { %v1597_v54 = vpack.c.bf16 %v1596_v52, %v1596_v52  ;;  %v2736_v52 = vld [vmem:[%s3722_s16] sm:$0xff]  }
 0x98d   : > { %v1592_v55 = vpop.f32.mrf.mxu0  ;;  %v2346_v53 = vld [vmem:[%s3721_s15] ss:$0 sm:$0xff] }
 0x98e   : > { %2491 = vmatmul.mubr.msk.bf16.vlgmr.msra.gmra.mxu1 %vm1148_vm5, %v1597_v54 }
 0x98f   : > { %v2487_v56 = vpop.f32.mrf.mxu0  ;;  %2502 = vmatprep.mubr.msk.bf16.mxu1 %vm3127_vm4, %v3126_v10  ;;  %2501 = vmatpush3.bf16.msra.mxu1 %v2726_v62 }
 0x990   : > { %2512 = vmatprep.subr.bf16.mxu1 %v3126_v10 }
 0x991   : > { %v1699_v57 = vpop.f32.mrf.mxu0 }
 0x992   : > { %v1705_v58 = vsel %vm1195_vm6, %v1699_v57, -inf }
 0x993   : > { %1706 = vmax.xlane.f32.xlu0 %v1705_v58  ;;  %v2498_v59 = vpop.f32.mrf.mxu0 }
 0x995   : > { %v1702_v60 = vpop.f32.mrf.mxu0 }
 0x997   : > { %v2499_v61 = vpop.f32.mrf.mxu0 }
 0xa1c   : > { %v1707_v63 = vpop.xlane.xlu0 %1706 }
 0xa1d   : > { %v1708_v0 = vsub.f32 %v1699_v57, %v1707_v63 }
 0xa1f   : > { %v1709_v1 = vmul.f32 1.442695, %v1708_v0 }
 0xa21   : > { %2751 = vpow2.f32 %v1709_v1 }
 0xa2e   : > { %v2752_v3 = vpop.eup %2751 }
 0xa2f   : > { %v1711_v4 = vsel %vm1195_vm6, %v2752_v3, 0.0  ;;  %v1714_v5 = vpack.c.bf16 %v2752_v3, %v2752_v3 }
 0xa30   : > { %1712 = vadd.xlane.f32.xlu0 %v1711_v4 }
 0xa31   : > { %2503 = vmatmul.mubr.msk.bf16.vlgmr.msra.gmra.mxu1 %vm1195_vm6, %v1714_v5 }
 0xa32   : > { %2516 = vmatprep.mubr.msk.bf16.mxu1 %vm3127_vm4, %v3126_v10  ;;  %2513 = vmatpush3.bf16.msra.mxu1 %v2727_v34 }
 0xa33   : > { %2514 = vmatprep.subr.bf16.mxu1 %v3126_v10 }
 0xa36   : > { %2515 = vmatpush3.bf16.msra.mxu1 %v2728_v35 }
 0xa4e   : > { %v1639_v8 = vpop.f32.mrf.mxu1 }
 0xa4f   : > { %v1645_v9 = vadd.f32 %v1639_v8, %v1476_v43  ;;  %v2344_v43 = vld [vmem:[%s3719_s13] ss:$0 sm:$0xff] }
 0xa50   : > { %v2492_v11 = vpop.f32.mrf.mxu1 }
 0xa52   : > { %v1642_v12 = vpop.f32.mrf.mxu1 }
 0xa54   : > { %v2493_v13 = vpop.f32.mrf.mxu1 }
 0xab9   : > { %v1713_v14 = vpop.xlane.xlu0 %1712 }
 0xaba   : > { %2753 = vrcp.f32 %v1713_v14 }
 0xac7   : > { %v2754_v15 = vpop.eup %2753 }
 0xaf1   : > { %v1758_v16 = vpop.f32.mrf.mxu1 }
 0xaf2   : > { %v1765_v17 = vmul.f32 %v2754_v15, %v1758_v16 }
 0xaf3   : > { %v2504_v18 = vpop.f32.mrf.mxu1 }
 0xaf4   : > { %v1766_v19 = vpack.c.bf16 %v1765_v17, %v1765_v17 }
 0xaf5   : > { %v1761_v20 = vpop.f32.mrf.mxu1 }
 0xaf6   : > { %2509 = vmatmul.mubr.msk.bf16.vlgmr.msra.gmra.mxu0 %vm1148_vm5, %v1766_v19 }
 0xaf7   : > { %v2505_v21 = vpop.f32.mrf.mxu1  ;;  %2536 = vmatprep.mubr.msk.bf16.mxu0 %vm3127_vm4, %v3126_v10  ;;  %2521 = vmatpush3.bf16.msra.mxu0 %v2729_v36 }
 0xaf8   : > { %2522 = vmatprep.subr.bf16.mxu0 %v3126_v10 }
 0xafb   : > { %2523 = vmatpush3.bf16.msra.mxu0 %v2730_v37 }
 0xafc   : > { %2524 = vmatprep.subr.bf16.mxu0 %v3126_v10 }
 0xaff   : > { %2525 = vmatpush3.bf16.msra.mxu0 %v2731_v47 }
 0xb00   : > { %2526 = vmatprep.subr.bf16.mxu0 %v3126_v10 }
 0xb03   : > { %2527 = vmatpush3.bf16.msra.mxu0 %v2732_v48 }
 0xb04   : > { %2528 = vmatprep.subr.bf16.mxu0 %v3126_v10 }
 0xb07   : > { %2529 = vmatpush3.bf16.msra.mxu0 %v2733_v49 }
 0xb08   : > { %2530 = vmatprep.subr.bf16.mxu0 %v3126_v10 }
 0xb0b   : > { %2531 = vmatpush3.bf16.msra.mxu0 %v2734_v50 }
 0xb0c   : > { %2532 = vmatprep.subr.bf16.mxu0 %v3126_v10 }
 0xb0f   : > { %2533 = vmatpush3.bf16.msra.mxu0 %v2735_v51 }
 0xb10   : > { %2534 = vmatprep.subr.bf16.mxu0 %v3126_v10 }
 0xb13   : > { %2535 = vmatpush3.bf16.msra.mxu0 %v2736_v52 }
 0xbb6   : > { %v1808_v22 = vpop.f32.mrf.mxu0 }
 0xbb7   : > { %v1814_v23 = vadd.f32 %v1808_v22, %v1645_v9 }
 0xbb8   : > { %v2510_v24 = vpop.f32.mrf.mxu0 }
 0xbb9   : > { %1815 = vst.msk [vmem:[%s3431_s7] sm:$0xff] %vm1032_vm3, %v1814_v23  ;;  %v1818_v25 = vsel %vm1032_vm3, %v1814_v23, 0.0 }
 0xbba   : > { %1819 = vadd.xlane.f32.xlu0 %v1818_v25  ;;  %v1811_v26 = vpop.f32.mrf.mxu0 }
 0xbbc   : > { %v2511_v27 = vpop.f32.mrf.mxu0 }
 0xc43   : > { %v1820_v28 = vpop.xlane.xlu0 %1819 }
 0xc44   : > { %v1821_v29 = vmul.f32 0.03125, %v1820_v28 }
 0xc46   : > { %v1822_v31 = vsub.f32 %v1814_v23, %v1821_v29 }
 0xc48   : > { %v1823_v32 = vmul.f32 %v1822_v31, %v1822_v31 }
 0xc4a   : > { %v1824_v33 = vsel %vm1032_vm3, %v1823_v32, 0.0 }
 0xc4b   : > { %1825 = vadd.xlane.f32.xlu0 %v1824_v33 }
 0xcd4   : > { %v1826_v30 = vpop.xlane.xlu0 %1825 }
 0xcd5   : > { %v1827_v38 = vmul.f32 0.03125, %v1826_v30 }
 0xcd7   : > { %v1828_v39 = vadd.f32 1e-05, %v1827_v38 }
 0xcd9   : > { %2755 = vrsqrt.f32 %v1828_v39 }
 0xce6   : > { %v2756_v40 = vpop.eup %2755 }
 0xce7   : > { %v1830_v42 = vmul.f32 %v2756_v40, %v1822_v31 }
 0xce9   : > { %v1837_v44 = vmul.f32 %v2343_v41, %v1830_v42 }
 0xceb   : > { %v1844_v45 = vadd.f32 %v2344_v43, %v1837_v44 }
 0xced   : > { %v1845_v46 = vpack.c.bf16 %v1844_v45, %v1844_v45 }
 0xcef   : > { %2517 = vmatmul.mubr.msk.bf16.vlgmr.msra.gmra.mxu1 %vm1032_vm3, %v1845_v46 }
 0xdaf   : > { %v1914_v54 = vpop.f32.mrf.mxu1 }
 0xdb0   : > { %v1915_v55 = vadd.f32 %v2346_v53, %v1914_v54 }
 0xdb1   : > { %v2518_v56 = vpop.f32.mrf.mxu1 }
 0xdb2   : > { %v1921_v57 = vmul.f32 0.70710677, %v1915_v55  ;;  %v1920_v60 = vmul.f32 0.5, %v1915_v55 }
 0xdb3   : > { %v1917_v58 = vpop.f32.mrf.mxu1 }
 0xdb4   : > { %2757 = verf.f32 %v1921_v57 }
 0xdb5   : > { %v2519_v10 = vpop.f32.mrf.mxu1 }
 0xdc1   : > { %v2758_v59 = vpop.eup %2757 }
 0xdc2   : > { %v1923_v61 = vadd.f32 1.0, %v2758_v59 }
 0xdc4   : > { %v1924_v62 = vmul.f32 %v1923_v61, %v1920_v60 }
 0xdc6   : > { %v1925_v63 = vpack.c.bf16 %v1924_v62, %v1924_v62 }
 0xdc8   : > { %2537 = vmatmul.mubr.bf16.vlgmr.msra.gmra.mxu0 %v1925_v63 }
 0xdc9   : > { %2980 = shalt.err (!%p2977_p5)
}
 0xdca   : > { %s2981_s7 = scalar_lea.hbm %s2051_s17, 128  ;;  %s2985_s26 = scalar_lea.hbm %s3779_s5, 512 }
 0xdcb   : > { %p2982_p6 = scmp.ne.s32.totalorder %s2051_s17, %s2981_s7  ;;  %p2986_p0 = scmp.lt.s32.totalorder %s2051_s17, %s3779_s5 }
 0xdcc   : > { %p2987_p9 = scmp.lt.s32.totalorder %s2985_s26, %s2981_s7 }
 0xdcd   : > { %p2983_p7 = pnand %p2982_p6, %p3780_p2 }
 0xdce   : > { %p2988_p11 = por %p2987_p9, %p2986_p0 }
 0xdcf   : > { %p2984_p1 = pneg %p2983_p7 }
 0xdd1   : > { %p2989_p13 = pnand %p2988_p11, %p2984_p1 }
 0xdd3   : > { %2992 = shalt.err (!%p2989_p13)
}
 0xdd4   : > { %2572 = dma.vmem_to_hbm [thread:$0]  (%p3780_p2), %s2054_s23, 128, %s2051_s17, %s2033_s20  }
 0xdd5   : > { %s3781_s22 = sld [smem:[#allocation44_spill]]  ;;  %s2068_s28 = sshll.u32 %s3433_s8, 4  ;;  %s3653_s28 = int_to_ptr.vmem [resolvable:$true] %s2068_s28 }
 0xdd6   : > { %s3782_s7 = sld [smem:[#allocation46_spill]]  ;;  %s2038_s23 = scalar_lea.sflag [#allocation19], %s3414_s19 }
 0xdd7   : > { %s2993_s17 = scalar_lea.vmem %s3653_s28, 128  ;;  %s3132_s24 = smov [#allocation18]  }
 0xdd8   : > { %p2994_p4 = scmp.ne.s32.totalorder %s3653_s28, %s2993_s17  ;;  %s2997_s20 = sshll.u32 %s3132_s24, 4  ;;  %s2998_s20 = int_to_ptr.vmem [resolvable:$false] %s2997_s20 }
 0xdd9   : > { %p3000_p10 = scmp.lt.s32.totalorder %s3653_s28, %s2998_s20 }
 0xdda   : > { %p2995_p8 = pnand %p2994_p4, %p3780_p2 }
 0xddb   : > { %v2345_v0 = vld [vmem:[%s3781_s22] ss:$0 sm:$0xff] }
 0xddc   : > { %v1853_v1 = vadd.f32 %v2345_v0, %v3462_v2  ;;  %s3651_s25 = scalar_lea.hbm %s3782_s7, %s2361_s27  ;;  %p2996_p3 = pneg %p2995_p8 }
 0xddd   : > { %s2999_s27 = scalar_lea.vmem %s2998_s20, 256 }
 0xdde   : > { %p3001_p12 = scmp.lt.s32.totalorder %s2999_s27, %s2993_s17 }
 0xde0   : > { %p3002_p5 = por %p3001_p12, %p3000_p10 }
 0xde2   : > { %p3003_p6 = pnand %p3002_p5, %p2996_p3 }
 0xe88   : > { %v2024_v3 = vpop.f32.mrf.mxu0 }
 0xe89   : > { %v2030_v4 = vadd.f32 %v2024_v3, %v1853_v1 }
 0xe8a   : > { %v2538_v5 = vpop.f32.mrf.mxu0 }
 0xe8b   : > { %2031 = vst.msk [vmem:[%s3433_s8] sm:$0xff] %vm1032_vm3, %v2030_v4 }
 0xe8c   : > { %v2027_v6 = vpop.f32.mrf.mxu0 }
 0xe8d   : > { %3006 = shalt.err (!%p3003_p6)
}
 0xe8e   : > { %s3007_s8 = scalar_lea.hbm %s3651_s25, 128  ;;  %s3011_s26 = scalar_lea.hbm %s3782_s7, 512 }
 0xe8f   : > { %p3008_p7 = scmp.ne.s32.totalorder %s3651_s25, %s3007_s8  ;;  %p3012_p9 = scmp.lt.s32.totalorder %s3651_s25, %s3782_s7 }
 0xe90   : > { %p3013_p11 = scmp.lt.s32.totalorder %s3011_s26, %s3007_s8 }
 0xe91   : > { %p3009_p1 = pnand %p3008_p7, %p3780_p2 }
 0xe92   : > { %p3014_p13 = por %p3013_p11, %p3012_p9 }
 0xe93   : > { %p3010_p0 = pneg %p3009_p1 }
 0xe95   : > { %p3015_p4 = pnand %p3014_p13, %p3010_p0 }
 0xe97   : > { %3018 = shalt.err (!%p3015_p4)
}
 0xe98   : > { %2573 = dma.vmem_to_hbm [thread:$0]  (%p3780_p2), %s3653_s28, 128, %s3651_s25, %s2038_s23   ;;  %v2539_v2 = vpop.f32.mrf.mxu0 }
 0xe99 PF: > { %s3783_s0 = sld [smem:[#allocation31_spill]] }
 0xe9a   : > { %s3784_s2 = sld [smem:[#allocation27_spill]] }
 0xe9b   : > { %s3785_s22 = sld [smem:[#allocation34_spill]] }
 0xe9f   : > { %p2624_p8 = scmp.ge.s32.totalorder %s3783_s0, 2 }
 0xea0   : > { %s2080_s1 = sand.u32 1, %s3784_s2  }
 0xea1   : > { %p3786_p3 = scmp.ne.s32.totalorder %s3785_s22, 0  ;;  %s2081_s21 = scalar_lea.sflag [#allocation5], %s2080_s1 }
 0xea3   : > { %p2602_p10 = pnand %p2624_p8, %p3786_p3 }
 0xea5   : > { %p2603_p12 = pneg %p2602_p10 }
 0xea7   : > { %3072 = dma.done.wait (%p2603_p12), %s2081_s21, 128  }
 0xea8   : > { %3074 = vsyncadd (%p2603_p12), %s2081_s21, 4294967168  ;;  %s2090_s17 = scalar_lea.sflag [#allocation19], %s2080_s1 }
 0xea9   : > { %3076 = dma.done.wait (%p2603_p12), %s2090_s17, 128  }
 0xeaa   : > { %3078 = vsyncadd (%p2603_p12), %s2090_s17, 4294967168  ;;  %s41_s23 = sadd.s32 1, %s3783_s0   ;;  %s3787_s29 = sld [smem:[#allocation28_spill]] }
 0xeab   : > { %p38_p5 = scmp.ge.s32.totalorder %s41_s23, 6   ;;  %s3788_s20 = sld [smem:[#allocation35_spill]] }
 0xeac   : > { %s3789_s21 = sld [smem:[#allocation29_spill]]  ;;  %s3793_s0 = smov %s3085_s30 }
 0xead   : > { %s3790_s1 = sld [smem:[#allocation30_spill]]  ;;  %40 = sbr.rel (!%p38_p5) target bundleno = 24 (0x18), region = 199 }
 0xeae   : > { %s3791_s22 = sld [smem:[#allocation32_spill]] }
 0xeaf   : > { %s3792_s2 = sld [smem:[#allocation33_spill]] }
 0xeb0   : > { %s3794_s30 = smov %s3787_s29 }
 0xeb2   :  { %2095 = vsyncpa [#allocation4], 1 }
 0xeb3   :  { %2097 = vsyncpa [#allocation4 + $0x1], 1 }
 0xeb4   :  { %2098 = vsyncpa [#allocation7], 1 }
 0xeb5   :  { %2099 = vsyncpa [#allocation10], 1 }
 0xeb6   :  { %2100 = vsyncpa [#allocation13], 1 }
 0xeb7   :  { %2101 = vsyncpa [#allocation16], 1 }
 0xeb8   :  { %2102 = vsyncpa [#allocation5], 1 }
 0xeb9   :  { %2104 = vsyncpa [#allocation5 + $0x1], 1 }
 0xeba   :  { %2105 = vsyncpa [#allocation19], 1 }
 0xebb   :  { %2107 = vsyncpa [#allocation19 + $0x1], 1 }

// kernel: tpu_custom_call.1
= control target key start
LH: loop header
LB: loop body
LE: loop exit
PB: predicated region body
PF: predicated region fallthrough
CT: control target
= control target key end

     0   :  { %s3706_s0 = inlined_call_operand.vmem [shape: f32[2,16,32], index: 0, kind: input, shape index: {}]   ;;  %s3707_s1 = inlined_call_operand.vmem [shape: f32[2,16,32], index: 1, kind: input, shape index: {}]   ;;  %s3708_s2 = inlined_call_operand.hbm [shape: f32[1,32], index: 2, kind: input, shape index: {}]   ;;  %s3709_s3 = inlined_call_operand.hbm [shape: f32[1,32], index: 3, kind: input, shape index: {}]   ;;  %s3710_s4 = inlined_call_operand.vmem [shape: bf16[32,32], index: 4, kind: input, shape index: {}]   ;;  %s3711_s5 = inlined_call_operand.hbm [shape: f32[1,32], index: 5, kind: input, shape index: {}]   ;;  %s3712_s6 = inlined_call_operand.hbm [shape: bf16[32,32], index: 6, kind: input, shape index: {}]   ;;  %s3713_s7 = inlined_call_operand.hbm [shape: f32[1,32], index: 7, kind: input, shape index: {}]   ;;  %s3714_s8 = inlined_call_operand.hbm [shape: bf16[32,32], index: 8, kind: input, shape index: {}]   ;;  %s3715_s9 = inlined_call_operand.hbm [shape: f32[1,32], index: 9, kind: input, shape index: {}]   ;;  %s3716_s10 = inlined_call_operand.vmem [shape: bf16[32,32], index: 10, kind: input, shape index: {}]   ;;  %s3717_s11 = inlined_call_operand.vmem [shape: f32[1,32], index: 11, kind: input, shape index: {}]   ;;  %s3718_s12 = inlined_call_operand.vmem [shape: f32[1,32], index: 12, kind: input, shape index: {}]   ;;  %s3719_s13 = inlined_call_operand.vmem [shape: f32[1,32], index: 13, kind: input, shape index: {}]   ;;  %s3720_s14 = inlined_call_operand.hbm [shape: bf16[32,128], index: 14, kind: input, shape index: {}]   ;;  %s3721_s15 = inlined_call_operand.vmem [shape: f32[1,128], index: 15, kind: input, shape index: {}]   ;;  %s3722_s16 = inlined_call_operand.vmem [shape: bf16[128,32], index: 16, kind: input, shape index: {}]   ;;  %s3723_s17 = inlined_call_operand.vmem [shape: f32[1,32], index: 17, kind: input, shape index: {}]   ;;  %s3724_s18 = inlined_call_operand.hbm [shape: f32[2,16,32], index: 18, kind: output, shape index: {0}]   ;;  %s3725_s19 = inlined_call_operand.hbm [shape: f32[2,16,32], index: 19, kind: output, shape index: {1}]  }
   0x1   :  { %3742 = sst [smem:[#allocation36_spill]] %s3706_s0 }
   0x2   :  { %3743 = sst [smem:[#allocation37_spill]] %s3707_s1 }
   0x3   :  { %3744 = sst [smem:[#allocation38_spill]] %s3708_s2 }
   0x4   :  { %3745 = sst [smem:[#allocation39_spill]] %s3709_s3 }
   0x5   :  { %3746 = sst [smem:[#allocation40_spill]] %s3711_s5 }
   0x6   :  { %3747 = sst [smem:[#allocation41_spill]] %s3712_s6 }
   0x7   :  { %3748 = sst [smem:[#allocation42_spill]] %s3713_s7 }
   0x8   :  { %3749 = sst [smem:[#allocation43_spill]] %s3714_s8 }
   0x9   :  { %3750 = sst [smem:[#allocation44_spill]] %s3723_s17 }
   0xa   :  { %3751 = sst [smem:[#allocation45_spill]] %s3724_s18 }
   0xb   :  { %3752 = sst [smem:[#allocation46_spill]] %s3725_s19 }
   0xc   :  { %25 = vsyncpa [#allocation4], 0 }
   0xd   :  { %26 = vsyncpa [#allocation7], 0 }
   0xe   :  { %27 = vsyncpa [#allocation10], 0 }
   0xf   :  { %28 = vsyncpa [#allocation13], 0 }
  0x10   :  { %29 = vsyncpa [#allocation16], 0 }
  0x11   :  { %30 = vsyncpa [#allocation5], 0 }
  0x12   :  { %32 = vsyncpa [#allocation5 + $0x1], 0 }
  0x13   :  { %33 = vsyncpa [#allocation19], 0 }
  0x14   :  { %35 = vsyncpa [#allocation19 + $0x1], 0  ;;  %s3233_s0 = smov 0   ;;  %s3235_s30 = smov 0  }
  0x15   :  { %s3237_s20 = smov 0   ;;  %s3239_s21 = smov 0  }
  0x16   :  { %s3241_s1 = smov 0   ;;  %s3243_s22 = smov 0  }
  0x17   :  { %s3245_s2 = smov 0   ;;  %s3247_s23 = smov 0  }
  0x18 LB: > { %3753 = sst [smem:[#allocation27_spill]] %s3081_s0  ;;  %s2273_s24 = sadd.s32 4294967295, %s3109_s23   ;;  %s3109_s23 = sphi %s3247_s23, %s41_s23   ;;  %s3105_s2 = sphi %s3245_s2, %s3792_s2   ;;  %s3101_s22 = sphi %s3243_s22, %s3791_s22   ;;  %s3097_s1 = sphi %s3241_s1, %s3790_s1   ;;  %s3093_s21 = sphi %s3239_s21, %s3789_s21   ;;  %s3089_s20 = sphi %s3237_s20, %s3788_s20   ;;  %s3085_s30 = sphi %s3235_s30, %s3794_s30   ;;  %s3081_s0 = sphi %s3233_s0, %s3793_s0  }
  0x19   : > { %3754 = sst [smem:[#allocation28_spill]] %s3089_s20  ;;  %s2274_s25 = sadd.s32 4294967294, %s3109_s23  }
  0x1a   : > { %3755 = sst [smem:[#allocation29_spill]] %s3101_s22  ;;  %s50_s3 = sadd.s32 1, %s3101_s22 }
  0x1b   : > { %3756 = sst [smem:[#allocation30_spill]] %s3105_s2  ;;  %s53_s26 = sadd.s32 1, %s3105_s2 }
  0x1c   : > { %3757 = sst [smem:[#allocation31_spill]] %s3109_s23  ;;  %p51_p0 = scmp.ge.s32.totalorder %s50_s3, 2 }
  0x1d   : > { %s452_s27 = sadd.s32 1, %s3089_s20  ;;  %p462_p1 = scmp.ne.s32.totalorder %s3089_s20, %s3085_s30 }
  0x1e   : > { %p463_p2 = scmp.eq.s32.totalorder %s2273_s24, 3  ;;  %s3796_s3 = smov (%p51_p0, %s50_s3), 0 }
  0x1f   : > { %3758 = sst [smem:[#allocation32_spill]] %s3796_s3  ;;  %s3798_s26 = smov (!%p51_p0, %s53_s26), %s3105_s2 }
  0x20   : > { %s448_s28 = ssub.s32 %s3101_s22, %s3796_s3  ;;  %p3285_p3 = por %p463_p2, %p462_p1 }
  0x21   : > { %p55_p4 = scmp.ge.s32.totalorder %s3798_s26, 2  ;;  %p468_p5 = scmp.ne.s32.totalorder %s3085_s30, %s3081_s0 }
  0x22   : > { %s3759_s29 = scalar_select %p3285_p3, 1, 0 }
  0x23   : > { %p469_p6 = scmp.eq.s32.totalorder %s2274_s25, 3  ;;  %p2275_p7 = scmp.ge.s32.totalorder %s3109_s23, 1 }
  0x24   : > { %s3800_s26 = smov (%p55_p4, %s3798_s26), 0  ;;  %p504_p9 = scmp.lt.s32.totalorder %s3109_s23, 5 }
  0x25   : > { %3760 = sst [smem:[#allocation33_spill]] %s3800_s26  ;;  %p3294_p8 = por %p469_p6, %p468_p5 }
  0x26   : > { %s447_s17 = ssub.s32 %s3105_s2, %s3800_s26  ;;  %p3301_p10 = pnand %p2275_p7, %p504_p9 }
  0x27   : > { %s3761_s19 = scalar_select %p3294_p8, 1, 0 }
  0x28   : > { %s449_s18 = sor.u32 %s448_s28, %s447_s17  ;;  %p3305_p12 = scmp.eq.s32.totalorder %s2273_s24, 0 }
  0x29   : > { %3762 = sst [smem:[#allocation34_spill]] %s3761_s19  ;;  %p450_p11 = scmp.eq.s32.totalorder %s449_s18, 0 }
  0x2a   : > { %s3763_s3 = scalar_select %p3301_p10, 1, 0 }
  0x2b   : > { %s3764_s22 = scalar_select %p3305_p12, 1, 0 }
  0x2c   : > { %p2576_p13 = pneg %p3301_p10  ;;  %s3111_s17 = smov [#allocation6]  }
  0x2d   : > { %s3312_s25 = scalar_select %p450_p11, %s3089_s20, %s452_s27  }
  0x2e   : > { %p3316_p0 = pnand %p3305_p12, %p2576_p13  ;;  %s528_s28 = sshll.u32 %s3111_s17, 4  ;;  %s529_s28 = int_to_ptr.vmem [resolvable:$true] %s528_s28 }
  0x2f   : > { %3765 = sst [smem:[#allocation35_spill]] %s3312_s25  ;;  %s3112_s26 = smov [#allocation9]  }
  0x30   : > { %s552_s18 = sshll.u32 %s3112_s26, 4  ;;  %p3322_p1 = pneg %p3316_p0  ;;  %s553_s18 = int_to_ptr.vmem [resolvable:$true] %s552_s18 }
  0x31   : > { %s2770_s2 = scalar_lea.vmem %s529_s28, 16  ;;  %s2777_s27 = scalar_lea.vmem %s529_s28, 32 }
  0x32   : > { %p2771_p2 = scmp.ne.s32.totalorder %s529_s28, %s2770_s2  ;;  %p2778_p6 = scmp.lt.s32.totalorder %s529_s28, %s529_s28 }
  0x33   : > { %p2779_p7 = scmp.lt.s32.totalorder %s2777_s27, %s2770_s2 }
  0x34   : > { %p2773_p4 = pnand %p2771_p2, %p3322_p1 }
  0x35   : > { %p2780_p9 = por %p2779_p7, %p2778_p6 }
  0x36   : > { %p2774_p5 = pneg %p2773_p4 }
  0x38   : > { %p2781_p11 = pnand %p2780_p9, %p2774_p5 }
  0x3a   : > { %2784 = shalt.err (!%p2781_p11)
}
  0x3b   : > { %s3768_s25 = sld [smem:[#allocation39_spill]]  ;;  %s2796_s20 = scalar_lea.vmem %s553_s18, 256 }
  0x3c   : > { %p2797_p13 = scmp.ne.s32.totalorder %s553_s18, %s2796_s20  ;;  %p2804_p4 = scmp.lt.s32.totalorder %s553_s18, %s553_s18 }
  0x3d   : > { %p2805_p3 = scmp.lt.s32.totalorder %s2796_s20, %s2796_s20 }
  0x3e   : > { %p2799_p8 = pnand %p2797_p13, %p3322_p1 }
  0x3f   : > { %p2806_p12 = por %p2805_p3, %p2804_p4 }
  0x40   : > { %p2800_p2 = pneg %p2799_p8 }
  0x41   : > { %2582 = dma.hbm_to_vmem [thread:$0]  (!%p3316_p0), %s3768_s25, 16, %s529_s28, [#allocation7]  }
  0x42   : > { %p2807_p10 = pnand %p2806_p12, %p2800_p2 }
  0x44   : > { %2810 = shalt.err (!%p2807_p10)
}
  0x45   : > { %s3741_s2 = smov 64   ;;  %s3114_s27 = smov 4  }
  0x46   : > { %s3769_s6 = sld [smem:[#allocation41_spill]]  ;;  %s3115_s26 = smov [#allocation12]  }
  0x47   : > { %s576_s17 = sshll.u32 %s3115_s26, 4  ;;  %s577_s17 = int_to_ptr.vmem [resolvable:$true] %s576_s17 }
  0x48   : > { %s2822_s0 = scalar_lea.vmem %s577_s17, 256  ;;  %p2830_p12 = scmp.lt.s32.totalorder %s577_s17, %s577_s17 }
  0x49   : > { %p2823_p8 = scmp.ne.s32.totalorder %s577_s17, %s2822_s0  ;;  %p2831_p5 = scmp.lt.s32.totalorder %s2822_s0, %s2822_s0 }
  0x4b   : > { %p2825_p3 = pnand %p2823_p8, %p3322_p1  ;;  %p2832_p6 = por %p2831_p5, %p2830_p12 }
  0x4c   : > { %2588 = dma.hbm_to_vmem [thread:$0]  (!%p3316_p0), %s3769_s6, 256, %s553_s18, [#allocation10], %s3741_s2, %s3741_s2, %s3114_s27  }
  0x4d   : > { %p2826_p10 = pneg %p2825_p3 }
  0x4f   : > { %p2833_p7 = pnand %p2832_p6, %p2826_p10 }
  0x51   : > { %2836 = shalt.err (!%p2833_p7)
}
  0x52   : > { %s3770_s8 = sld [smem:[#allocation43_spill]]  ;;  %s3116_s25 = smov [#allocation3]  }
  0x53   : > { %s517_s28 = sshll.u32 %s3116_s25, 4  ;;  %s3117_s26 = smov [#allocation8]   ;;  %s518_s28 = int_to_ptr.vmem [resolvable:$true] %s517_s28 }
  0x54   : > { %s542_s6 = sshll.u32 %s3117_s26, 4  ;;  %s2848_s0 = scalar_lea.vmem %s518_s28, 16  ;;  %s543_s6 = int_to_ptr.vmem [resolvable:$true] %s542_s6 }
  0x55   : > { %p2849_p9 = scmp.ne.s32.totalorder %s518_s28, %s2848_s0  ;;  %s2855_s23 = scalar_lea.vmem %s518_s28, 32 }
  0x56   : > { %p2856_p2 = scmp.lt.s32.totalorder %s518_s28, %s518_s28  ;;  %p2857_p4 = scmp.lt.s32.totalorder %s2855_s23, %s2848_s0 }
  0x57   : > { %p2851_p11 = pnand %p2849_p9, %p3322_p1 }
  0x58   : > { %2594 = dma.hbm_to_vmem [thread:$0]  (!%p3316_p0), %s3770_s8, 256, %s577_s17, [#allocation13], %s3741_s2, %s3741_s2, %s3114_s27  }
  0x59   : > { %p2852_p13 = pneg %p2851_p11  ;;  %p2858_p8 = por %p2857_p4, %p2856_p2 }
  0x5b   : > { %p2859_p3 = pnand %p2858_p8, %p2852_p13 }
  0x5d   : > { %2862 = shalt.err (!%p2859_p3)
}
  0x5e   : > { %s3771_s18 = sld [smem:[#allocation38_spill]]  ;;  %s2874_s25 = scalar_lea.vmem %s543_s6, 16 }
  0x5f   : > { %p2875_p10 = scmp.ne.s32.totalorder %s543_s6, %s2874_s25  ;;  %s2881_s26 = scalar_lea.vmem %s543_s6, 32 }
  0x60   : > { %p2882_p6 = scmp.lt.s32.totalorder %s543_s6, %s543_s6  ;;  %p2883_p7 = scmp.lt.s32.totalorder %s2881_s26, %s2874_s25 }
  0x61   : > { %p2877_p12 = pnand %p2875_p10, %p3322_p1 }
  0x62   : > { %p2884_p9 = por %p2883_p7, %p2882_p6 }
  0x63   : > { %p2878_p5 = pneg %p2877_p12 }
  0x64   : > { %2579 = dma.hbm_to_vmem [thread:$0]  (!%p3316_p0), %s3771_s18, 16, %s518_s28, [#allocation4]  }
  0x65   : > { %p2885_p11 = pnand %p2884_p9, %p2878_p5 }
  0x67   : > { %2888 = shalt.err (!%p2885_p11)
}
  0x68   : > { %s3772_s5 = sld [smem:[#allocation40_spill]]  ;;  %s3118_s17 = smov [#allocation11]  }
  0x69   : > { %s566_s28 = sshll.u32 %s3118_s17, 4  ;;  %s3119_s20 = smov [#allocation14]   ;;  %s567_s28 = int_to_ptr.vmem [resolvable:$true] %s566_s28 }
  0x6a   : > { %s590_s18 = sshll.u32 %s3119_s20, 4  ;;  %s2900_s2 = scalar_lea.vmem %s567_s28, 16  ;;  %s591_s18 = int_to_ptr.vmem [resolvable:$true] %s590_s18 }
  0x6b   : > { %p2901_p13 = scmp.ne.s32.totalorder %s567_s28, %s2900_s2  ;;  %s2907_s25 = scalar_lea.vmem %s567_s28, 32 }
  0x6c   : > { %p2908_p8 = scmp.lt.s32.totalorder %s567_s28, %s567_s28  ;;  %p2909_p3 = scmp.lt.s32.totalorder %s2907_s25, %s2900_s2 }
  0x6d   : > { %p2903_p2 = pnand %p2901_p13, %p3322_p1 }
  0x6e   : > { %2585 = dma.hbm_to_vmem [thread:$0]  (!%p3316_p0), %s3772_s5, 16, %s543_s6, [#allocation7]  }
  0x6f   : > { %p2904_p4 = pneg %p2903_p2  ;;  %p2910_p10 = por %p2909_p3, %p2908_p8 }
  0x71   : > { %p2911_p12 = pnand %p2910_p10, %p2904_p4 }
  0x73   : > { %2914 = shalt.err (!%p2911_p12)
}
  0x74   : > { %s3773_s7 = sld [smem:[#allocation42_spill]]  ;;  %s2926_s23 = scalar_lea.vmem %s591_s18, 16 }
  0x75   : > { %p2927_p5 = scmp.ne.s32.totalorder %s591_s18, %s2926_s23  ;;  %s2933_s0 = scalar_lea.vmem %s591_s18, 32 }
  0x76   : > { %p2934_p9 = scmp.lt.s32.totalorder %s591_s18, %s591_s18  ;;  %p2935_p11 = scmp.lt.s32.totalorder %s2933_s0, %s2926_s23 }
  0x77   : > { %p2929_p6 = pnand %p2927_p5, %p3322_p1 }
  0x78   : > { %p2936_p13 = por %p2935_p11, %p2934_p9 }
  0x79   : > { %p2930_p7 = pneg %p2929_p6 }
  0x7a   : > { %2591 = dma.hbm_to_vmem [thread:$0]  (!%p3316_p0), %s3773_s7, 16, %s567_s28, [#allocation10]  }
  0x7b   : > { %p2937_p2 = pnand %p2936_p13, %p2930_p7 }
  0x7d   : > { %2940 = shalt.err (!%p2937_p2)
}
  0x7e   : > { %2597 = dma.hbm_to_vmem [thread:$0]  (!%p3316_p0), %s3715_s9, 16, %s591_s18, [#allocation13]  }
  0x7f   : > { %s3120_s20 = smov [#allocation15]  }
  0x80   : > { %s612_s28 = sshll.u32 %s3120_s20, 4  ;;  %s613_s28 = int_to_ptr.vmem [resolvable:$true] %s612_s28 }
  0x81   : > { %s2952_s25 = scalar_lea.vmem %s613_s28, 256  ;;  %p2960_p10 = scmp.lt.s32.totalorder %s613_s28, %s613_s28 }
  0x82   : > { %p2953_p4 = scmp.ne.s32.totalorder %s613_s28, %s2952_s25  ;;  %p2961_p12 = scmp.lt.s32.totalorder %s2952_s25, %s2952_s25 }
  0x84   : > { %p2955_p8 = pnand %p2953_p4, %p3322_p1  ;;  %p2962_p5 = por %p2961_p12, %p2960_p10 }
  0x86   : > { %p2956_p3 = pneg %p2955_p8 }
  0x88   : > { %p2963_p6 = pnand %p2962_p5, %p2956_p3 }
  0x8a   : > { %2966 = shalt.err (!%p2963_p6)
}
  0x8b   : > { %s3774_s6 = smov 64   ;;  %p3775_p7 = scmp.ne.s32.totalorder %s3763_s3, 0 }
  0x8c   : > { %2600 = dma.hbm_to_vmem [thread:$0]  (!%p3316_p0), %s3720_s14, 256, %s613_s28, [#allocation16], %s3774_s6, %s3774_s6, %s3114_s27  }
  0x8d   : > { %656 = sbr.rel (%p3775_p7) target bundleno = 3737 (0xe99), region = 92  ;;  %p3776_p1 = scmp.ne.s32.totalorder (!%p3775_p7), %s3764_s22, 0 }
  0x92   : > { %3052 = dma.done.wait (%p3776_p1), [#allocation4], 16  }
  0x93   : > { %3054 = vsyncadd (%p3776_p1), [#allocation4], 4294967280 }
  0x94   : > { %3056 = dma.done.wait (%p3776_p1), [#allocation7], 32  }
  0x95   : > { %3058 = vsyncadd (%p3776_p1), [#allocation7], 4294967264 }
  0x96   : > { %3060 = dma.done.wait (%p3776_p1), [#allocation10], 272  }
  0x97   : > { %3062 = vsyncadd (%p3776_p1), [#allocation10], 4294967024 }
  0x98   : > { %3064 = dma.done.wait (%p3776_p1), [#allocation13], 272  }
  0x99   : > { %3066 = vsyncadd (%p3776_p1), [#allocation13], 4294967024 }
  0x9a   : > { %3068 = dma.done.wait (%p3776_p1), [#allocation16], 256  }
  0x9b   : > { %3070 = vsyncadd (%p3776_p1), [#allocation16], 4294967040  ;;  %s3414_s19 = sand.u32 1, %s3085_s30   ;;  %p753_p0 = scmp.lt.s32.totalorder %s3097_s1, 1 }
  0x9c   : > { %s2294_s3 = sshll.u32 %s3414_s19, 3  ;;  %p755_p9 = scmp.lt.s32.totalorder %s3093_s21, 1 }
  0x9d   : > { %s754_s24 = scalar_select %p753_p0, %s3097_s1, 1 }
  0x9e   : > { %s756_s27 = scalar_select %p755_p9, %s3093_s21, 1 }
  0x9f   : > { %s2296_s23 = sshll.u32 %s754_s24, 1  ;;  %s2366_s0 = sshll.u32 %s754_s24, 4 }
  0xa0   : > { %s758_s2 = sadd.s32 %s2296_s23, %s756_s27  ;;  %s3777_s22 = sld [smem:[#allocation37_spill]] }
  0xa1   : > { %s2297_s25 = sshll.u32 %s758_s2, 3  ;;  %s3778_s18 = sld [smem:[#allocation36_spill]] }
  0xa2   : > { %s3431_s7 = scalar_lea.vmem [#allocation17], %s2294_s3  ;;  %s3433_s8 = scalar_lea.vmem [#allocation18], %s2294_s3 }
  0xa3   : > { %p2300_p11 = scmp.ne.s32.totalorder %s3093_s21, 0 }
  0xa4   : > { %s3123_s3 = smov (!%p2300_p11), 120   ;;  %s3124_s24 = smov (!%p2300_p11), 112  }
  0xa5   : > { %770 = sbr.rel (%p2300_p11) target bundleno = 822 (0x336), region = 128  ;;  %s3125_s27 = smov (!%p2300_p11), 104  }
  0xa6   : > { %s3424_s28 = scalar_lea.vmem %s3777_s22, %s2366_s0 }
  0xa7   : > { %s3429_s5 = scalar_lea.vmem %s3778_s18, %s2297_s25 }
  0xaa   : > { %v771_v0 = vld [vmem:[%s3424_s28] sm:$0xff]  ;;  %vm775_vm0 = vcmask 261120   ;;  %v772_v1 = vld [vmem:[%s3424_s28 + $0x8] sm:$0xff]  ;;  %v3121_v16 = vmov 0.0   ;;  %v2712_v18 = vld [vmem:[#allocation12] sm:$0xff]   ;;  %vm3122_vm1 = vmmov 0  }
  0xab   : > { %v776_v2 = vsel %vm775_vm0, %v771_v0, 0.0  ;;  %v779_v3 = vsel %vm775_vm0, %v772_v1, 0.0  ;;  %v2709_v14 = vld [vmem:[#allocation9 + $0x8] sm:$0xff]   ;;  %v2710_v15 = vld [vmem:[#allocation12 + $0x8] sm:$0xff]   ;;  %2416 = vmatprep.subr.bf16.mxu0 %v3121_v16  ;;  %2424 = vmatprep.subr.bf16.mxu1 %v3121_v16  ;;  %v2303_v36 = vld [vmem:[#allocation11] ss:$0 sm:$0xff] }
  0xac   : > { %777 = vadd.xlane.f32.xlu0 %v776_v2  ;;  %2417 = vmatpush3.bf16.msra.mxu0 %v2709_v14  ;;  %v2711_v17 = vld [vmem:[#allocation9] sm:$0xff]   ;;  %v2301_v27 = vld [vmem:[#allocation3] ss:$0 sm:$0xff]  ;;  %v2302_v31 = vld [vmem:[#allocation6] ss:$0 sm:$0xff]  ;;  %vm959_vm2 = vcmask 60416  }
  0xad   : > { %2425 = vmatpush3.bf16.msra.mxu1 %v2710_v15  ;;  %2418 = vmatprep.subr.bf16.mxu0 %v3121_v16  ;;  %v2307_v37 = vld [vmem:[#allocation14] ss:$0 sm:$0xff] }
  0xae   : > { %2426 = vmatprep.subr.bf16.mxu1 %v3121_v16  ;;  %2420 = vmatprep.mubr.msk.bf16.mxu0 %vm3122_vm1, %v3121_v16 }
  0xaf   : > { %2428 = vmatprep.mubr.msk.bf16.mxu1 %vm3122_vm1, %v3121_v16 }
  0xb0   : > { %780 = vadd.xlane.f32.xlu0 %v779_v3  ;;  %2419 = vmatpush3.bf16.msra.mxu0 %v2711_v17 }
  0xb1   : > { %2427 = vmatpush3.bf16.msra.mxu1 %v2712_v18 }
 0x135   : > { %v778_v4 = vpop.xlane.xlu0 %777 }
 0x136   : > { %v783_v5 = vmul.f32 0.03125, %v778_v4 }
 0x138   : > { %v785_v6 = vsub.f32 %v771_v0, %v783_v5 }
 0x139   : > { %v781_v7 = vpop.xlane.xlu0 %780 }
 0x13a   : > { %v784_v8 = vmul.f32 0.03125, %v781_v7  ;;  %v787_v9 = vmul.f32 %v785_v6, %v785_v6 }
 0x13c   : > { %v786_v10 = vsub.f32 %v772_v1, %v784_v8  ;;  %v789_v11 = vsel %vm775_vm0, %v787_v9, 0.0 }
 0x13d   : > { %790 = vadd.xlane.f32.xlu1 %v789_v11 }
 0x13e   : > { %v788_v12 = vmul.f32 %v786_v10, %v786_v10 }
 0x140   : > { %v792_v13 = vsel %vm775_vm0, %v788_v12, 0.0 }
 0x141   : > { %793 = vadd.xlane.f32.xlu1 %v792_v13 }
 0x1c6   : > { %v791_v19 = vpop.xlane.xlu1 %790 }
 0x1c7   : > { %v795_v20 = vmul.f32 0.03125, %v791_v19 }
 0x1c9   : > { %v797_v21 = vadd.f32 1e-06, %v795_v20 }
 0x1ca   : > { %v794_v22 = vpop.xlane.xlu1 %793 }
 0x1cb   : > { %2713 = vrsqrt.f32 %v797_v21  ;;  %v796_v23 = vmul.f32 0.03125, %v794_v22 }
 0x1cd   : > { %v798_v24 = vadd.f32 1e-06, %v796_v23 }
 0x1cf   : > { %2715 = vrsqrt.f32 %v798_v24 }
 0x1d8   : > { %v2714_v25 = vpop.eup %2713 }
 0x1d9   : > { %v801_v26 = vmul.f32 %v2714_v25, %v785_v6 }
 0x1db   : > { %v809_v30 = vmul.f32 %v2301_v27, %v801_v26 }
 0x1dc   : > { %v2716_v28 = vpop.eup %2715 }
 0x1dd   : > { %v802_v29 = vmul.f32 %v2716_v28, %v786_v10  ;;  %v817_v33 = vadd.f32 %v2302_v31, %v809_v30 }
 0x1df   : > { %v810_v32 = vmul.f32 %v2301_v27, %v802_v29 }
 0x1e1   : > { %v818_v34 = vadd.f32 %v2302_v31, %v810_v32 }
 0x1e3   : > { %v819_v35 = vpack.c.bf16 %v818_v34, %v817_v33 }
 0x1e5   : > { %2421 = vmatmul.mubr.msk.bf16.vlgmr.msra.gmra.mxu0 %vm775_vm0, %v819_v35  ;;  %2429 = vmatmul.mubr.msk.bf16.vlgmr.msra.gmra.mxu1 %vm775_vm0, %v819_v35 }
 0x2a5   : > { %v880_v38 = vpop.f32.mrf.mxu0  ;;  %v944_v39 = vpop.f32.mrf.mxu1 }
 0x2a6   : > { %v881_v40 = vadd.f32 %v2303_v36, %v880_v38  ;;  %v945_v41 = vadd.f32 %v2307_v37, %v944_v39 }
 0x2a7   : > { %v2422_v42 = vpop.f32.mrf.mxu0  ;;  %v2430_v43 = vpop.f32.mrf.mxu1 }
 0x2a8   : > { %v2367_v44 = vpack.c.bf16 %v881_v40, %v881_v40  ;;  %v2369_v45 = vpack.c.bf16 %v945_v41, %v945_v41 }
 0x2a9   : > { %v883_v46 = vpop.f32.mrf.mxu0  ;;  %v947_v47 = vpop.f32.mrf.mxu1 }
 0x2aa   : > { %960 = vst.msk [vmem:[#allocation2] sm:$0xf] %vm959_vm2, %v2367_v44  ;;  %971 = vst.msk [vmem:[#allocation2 + $0x20] sm:$0xf] %vm959_vm2, %v2369_v45  ;;  %v884_v48 = vadd.f32 %v2303_v36, %v883_v46  ;;  %v948_v49 = vadd.f32 %v2307_v37, %v947_v47  ;;  %982 = vrot.lane.b32.xlu1 %v2369_v45, %s3123_s3  ;;  %973 = vrot.lane.b32.xlu0 %v2367_v44, %s3123_s3 }
 0x2ab   : > { %v2423_v50 = vpop.f32.mrf.mxu0  ;;  %v2431_v51 = vpop.f32.mrf.mxu1 }
 0x2ac   : > { %v2368_v52 = vpack.c.bf16 %v884_v48, %v884_v48  ;;  %v2370_v53 = vpack.c.bf16 %v948_v49, %v948_v49 }
 0x2ae   : > { %961 = vst.msk [vmem:[#allocation2 + $0x4] sm:$0xf] %vm959_vm2, %v2368_v52  ;;  %972 = vst.msk [vmem:[#allocation2 + $0x24] sm:$0xf] %vm959_vm2, %v2370_v53  ;;  %991 = vrot.lane.b32.xlu0 %v2367_v44, %s3124_s24  ;;  %975 = vrot.lane.b32.xlu1 %v2368_v52, %s3123_s3 }
 0x2b2   : > { %1000 = vrot.lane.b32.xlu0 %v2369_v45, %s3124_s24  ;;  %984 = vrot.lane.b32.xlu1 %v2370_v53, %s3123_s3 }
 0x2b6   : > { %1009 = vrot.lane.b32.xlu0 %v2367_v44, %s3125_s27  ;;  %993 = vrot.lane.b32.xlu1 %v2368_v52, %s3124_s24 }
 0x2ba   : > { %1018 = vrot.lane.b32.xlu0 %v2369_v45, %s3125_s27  ;;  %1002 = vrot.lane.b32.xlu1 %v2370_v53, %s3124_s24 }
 0x2be   : > { %1011 = vrot.lane.b32.xlu1 %v2368_v52, %s3125_s27 }
 0x2c2   : > { %1020 = vrot.lane.b32.xlu1 %v2370_v53, %s3125_s27 }
 0x31c   : > { %v983_v54 = vpop.permute.xlu1 %982  ;;  %v974_v55 = vpop.permute.xlu0 %973 }
 0x31d   : > { %989 = vst.msk [vmem:[#allocation2 + $0x28] sm:$0xf] %vm959_vm2, %v983_v54  ;;  %980 = vst.msk [vmem:[#allocation2 + $0x8] sm:$0xf] %vm959_vm2, %v974_v55 }
 0x320   : > { %v992_v56 = vpop.permute.xlu0 %991  ;;  %v976_v57 = vpop.permute.xlu1 %975 }
 0x321   : > { %998 = vst.msk [vmem:[#allocation2 + $0x10] sm:$0xf] %vm959_vm2, %v992_v56  ;;  %981 = vst.msk [vmem:[#allocation2 + $0xc] sm:$0xf] %vm959_vm2, %v976_v57 }
 0x324   : > { %v1001_v58 = vpop.permute.xlu0 %1000  ;;  %v985_v59 = vpop.permute.xlu1 %984 }
 0x325   : > { %1007 = vst.msk [vmem:[#allocation2 + $0x30] sm:$0xf] %vm959_vm2, %v1001_v58  ;;  %990 = vst.msk [vmem:[#allocation2 + $0x2c] sm:$0xf] %vm959_vm2, %v985_v59 }
 0x328   : > { %v1010_v60 = vpop.permute.xlu0 %1009  ;;  %v994_v61 = vpop.permute.xlu1 %993 }
 0x329   : > { %1016 = vst.msk [vmem:[#allocation2 + $0x18] sm:$0xf] %vm959_vm2, %v1010_v60  ;;  %999 = vst.msk [vmem:[#allocation2 + $0x14] sm:$0xf] %vm959_vm2, %v994_v61 }
 0x32c   : > { %v1019_v62 = vpop.permute.xlu0 %1018  ;;  %v1003_v63 = vpop.permute.xlu1 %1002 }
 0x32d   : > { %1025 = vst.msk [vmem:[#allocation2 + $0x38] sm:$0xf] %vm959_vm2, %v1019_v62  ;;  %1008 = vst.msk [vmem:[#allocation2 + $0x34] sm:$0xf] %vm959_vm2, %v1003_v63 }
 0x330   : > { %v1012_v0 = vpop.permute.xlu1 %1011 }
 0x331   : > { %1017 = vst.msk [vmem:[#allocation2 + $0x1c] sm:$0xf] %vm959_vm2, %v1012_v0 }
 0x334   : > { %v1021_v1 = vpop.permute.xlu1 %1020 }
 0x335   : > { %1026 = vst.msk [vmem:[#allocation2 + $0x3c] sm:$0xf] %vm959_vm2, %v1021_v1 }
 0x336 PF: > { %s2315_s23 = sshll.u32 %s3093_s21, 3  ;;  %vm1032_vm3 = vcmask 261120   ;;  %v2717_v9 = vld [vmem:[%s3710_s4 + $0x8] sm:$0xff]   ;;  %v3126_v10 = vmov 0.0   ;;  %vm3127_vm4 = vmmov 0   ;;  %v2718_v11 = vld [vmem:[%s3710_s4] sm:$0xff]  }
 0x337   : > { %s1028_s0 = scalar_lea.vmem %s3424_s28, %s2315_s23  ;;  %2432 = vmatprep.subr.bf16.mxu1 %v3126_v10  ;;  %2436 = vmatprep.mubr.msk.bf16.mxu1 %vm3127_vm4, %v3126_v10  ;;  %v2316_v16 = vld [vmem:[#allocation3] ss:$0 sm:$0xff]  ;;  %v2317_v18 = vld [vmem:[#allocation6] ss:$0 sm:$0xff]  ;;  %vm1148_vm5 = vcmask 64512   ;;  %v2720_v24 = vld [vmem:[#allocation2 + $0x8] sm:$0xff]  }
 0x338   : > { %v3462_v2 = vld [vmem:[%s1028_s0] sm:$0xff]  ;;  %2433 = vmatpush3.bf16.msra.mxu1 %v2717_v9  ;;  %2458 = vmatprep.subr.bf16.mxu0 %v3126_v10  ;;  %v1325_v25 = vsel %vm1148_vm5, %v2720_v24, 0  ;;  %s3128_s28 = smov 120   ;;  %vm1195_vm6 = vcmask 130048   ;;  %s3129_s25 = smov 112   ;;  %vm1262_vm7 = vcmask 1043456  }
 0x339   : > { %v1033_v3 = vsel %vm1032_vm3, %v3462_v2, 0.0  ;;  %2434 = vmatprep.subr.bf16.mxu1 %v3126_v10  ;;  %2460 = vmatprep.mubr.msk.bf16.mxu0 %vm3127_vm4, %v3126_v10  ;;  %v2719_v20 = vld [vmem:[#allocation2] sm:$0xff]   ;;  %v2722_v63 = vld [vmem:[#allocation2 + $0x28] sm:$0xff]   ;;  %s3130_s24 = smov 104   ;;  %s2360_s3 = sshll.u32 %s3097_s1, 1 }
 0x33a   : > { %1034 = vadd.xlane.f32.xlu0 %v1033_v3  ;;  %v1153_v23 = vsel %vm1148_vm5, %v2719_v20, 0  ;;  %2459 = vmatpush3.bf16.xpose.msra.mxu0 %v1325_v25  ;;  %v2318_v26 = vld [vmem:[#allocation8] ss:$0 sm:$0xff]  ;;  %v1258_v51 = vld [vmem:[%s3716_s10] sm:$0xf]  ;;  %s2053_s23 = sshll.u32 %s3431_s7, 4  ;;  %s2054_s23 = int_to_ptr.vmem [resolvable:$true] %s2053_s23 }
 0x33b   : > { %2470 = vmatprep.subr.bf16.mxu0 %v3126_v10  ;;  %v2721_v39 = vld [vmem:[#allocation2 + $0x20] sm:$0xff]   ;;  %v1264_v52 = vsel %vm1262_vm7, %v1258_v51, 0  ;;  %s2033_s20 = scalar_lea.sflag [#allocation5], %s3414_s19  ;;  %s2967_s22 = scalar_lea.vmem %s2054_s23, 128 }
 0x33c   : > { %2435 = vmatpush3.bf16.msra.mxu1 %v2718_v11  ;;  %p2968_p13 = scmp.ne.s32.totalorder %s2054_s23, %s2967_s22  ;;  %p3780_p2 = scmp.ne.s32.totalorder %s3759_s29, 0 }
 0x33d   : > { %2440 = vmatprep.subr.bf16.mxu1 %v3126_v10 }
 0x33e   : > { %p2969_p4 = pnand %p2968_p13, %p3780_p2 }
 0x340   : > { %p2970_p8 = pneg %p2969_p4 }
 0x3c3   : > { %v1035_v4 = vpop.xlane.xlu0 %1034 }
 0x3c4   : > { %v1037_v5 = vmul.f32 0.03125, %v1035_v4  ;;  %v2723_v4 = vld [vmem:[#allocation2 + $0x10] sm:$0xff]  }
 0x3c6   : > { %v1038_v6 = vsub.f32 %v3462_v2, %v1037_v5 }
 0x3c8   : > { %v1039_v7 = vmul.f32 %v1038_v6, %v1038_v6 }
 0x3ca   : > { %v1040_v8 = vsel %vm1032_vm3, %v1039_v7, 0.0 }
 0x3cb   : > { %1041 = vadd.xlane.f32.xlu0 %v1040_v8  ;;  %v1429_v8 = vld [vmem:[%s3716_s10 + $0x4] sm:$0xf] }
 0x3cc   : > { %v1434_v9 = vsel %vm1262_vm7, %v1429_v8, 0 }
 0x454   : > { %v1042_v12 = vpop.xlane.xlu0 %1041 }
 0x455   : > { %v1043_v13 = vmul.f32 0.03125, %v1042_v12 }
 0x457   : > { %v1044_v14 = vadd.f32 1e-06, %v1043_v13 }
 0x459   : > { %2737 = vrsqrt.f32 %v1044_v14 }
 0x466   : > { %v2738_v15 = vpop.eup %2737 }
 0x467   : > { %v1046_v17 = vmul.f32 %v2738_v15, %v1038_v6  ;;  %v1494_v6 = vsel %vm1148_vm5, %v2723_v4, 0 }
 0x469   : > { %v1053_v19 = vmul.f32 %v2316_v16, %v1046_v17 }
 0x46b   : > { %v1060_v21 = vadd.f32 %v2317_v18, %v1053_v19 }
 0x46d   : > { %v1061_v22 = vpack.c.bf16 %v1060_v21, %v1060_v21 }
 0x46f   : > { %2437 = vmatmul.mubr.msk.bf16.vlgmr.msra.gmra.mxu1 %vm1032_vm3, %v1061_v22 }
 0x470   : > { %2441 = vmatpush3.bf16.xpose.msra.mxu1 %v1153_v23  ;;  %2442 = vmatprep.mubr.msk.bf16.mxu1 %vm3127_vm4, %v3126_v10 }
 0x471   : > { %2446 = vmatprep.subr.bf16.mxu1 %v3126_v10 }
 0x52f   : > { %v1122_v27 = vpop.f32.mrf.mxu1 }
 0x530   : > { %v1123_v28 = vadd.f32 %v2318_v26, %v1122_v27 }
 0x531   : > { %v2438_v29 = vpop.f32.mrf.mxu1 }
 0x532   : > { %v3489_v30 = vpack.c.bf16 %v1123_v28, %v1123_v28  ;;  %v2724_v28 = vld [vmem:[#allocation2 + $0x30] sm:$0xff]  }
 0x533   : > { %v1125_v31 = vpop.f32.mrf.mxu1 }
 0x534   : > { %1314 = vrot.lane.b32.xlu1 %v3489_v30, %s3128_s28  ;;  %2443 = vmatmul.mubr.msk.bf16.vlgmr.msra.gmra.mxu1 %vm1148_vm5, %v3489_v30  ;;  %s3131_s28 = smov [#allocation17]  }
 0x535   : > { %v2439_v32 = vpop.f32.mrf.mxu1  ;;  %2448 = vmatprep.mubr.msk.bf16.mxu1 %vm3127_vm4, %v3126_v10  ;;  %2447 = vmatpush3.bf16.msra.mxu1 %v2721_v39  ;;  %v2322_v39 = vld [vmem:[%s3717_s11] ss:$0 sm:$0xff]  ;;  %s2971_s1 = sshll.u32 %s3131_s28, 4  ;;  %s2972_s1 = int_to_ptr.vmem [resolvable:$false] %s2971_s1 }
 0x536   : > { %2452 = vmatprep.subr.bf16.mxu1 %v3126_v10  ;;  %p2974_p3 = scmp.lt.s32.totalorder %s2054_s23, %s2972_s1 }
 0x5a6   : > { %v1315_v33 = vpop.permute.xlu1 %1314 }
 0x5a7   : > { %2461 = vmatmul.mubr.msk.bf16.vlgmr.msra.gmra.mxu0 %vm1148_vm5, %v1315_v33  ;;  %v2725_v33 = vld [vmem:[#allocation2 + $0x18] sm:$0xff]  }
 0x5a8   : > { %2472 = vmatprep.mubr.msk.bf16.mxu0 %vm3127_vm4, %v3126_v10  ;;  %2471 = vmatpush3.bf16.msra.mxu0 %v1434_v9 }
 0x5a9   : > { %2482 = vmatprep.subr.bf16.mxu0 %v3126_v10 }
 0x5f4   : > { %v1189_v34 = vpop.f32.mrf.mxu1 }
 0x5f5   : > { %v1196_v35 = vsel %vm1195_vm6, %v1189_v34, -inf }
 0x5f6   : > { %1197 = vmax.xlane.f32.xlu1 %v1196_v35  ;;  %v2444_v36 = vpop.f32.mrf.mxu1 }
 0x5f8   : > { %v1192_v37 = vpop.f32.mrf.mxu1 }
 0x5f9   : > { %v1663_v37 = vsel %vm1148_vm5, %v2725_v33, 0 }
 0x5fa   : > { %v2445_v38 = vpop.f32.mrf.mxu1 }
 0x5fb   : > { %v1129_v38 = vld [vmem:[%s3429_s5] sm:$0xff]  ;;  %s3779_s5 = sld [smem:[#allocation45_spill]] }
 0x667   : > { %v1361_v40 = vpop.f32.mrf.mxu0 }
 0x668   : > { %v1367_v50 = vsel %vm1195_vm6, %v1361_v40, -inf }
 0x669   : > { %v2462_v41 = vpop.f32.mrf.mxu0 }
 0x66b   : > { %v1364_v42 = vpop.f32.mrf.mxu0 }
 0x66d   : > { %v2463_v43 = vpop.f32.mrf.mxu0 }
 0x67f   : > { %v1198_v44 = vpop.xlane.xlu1 %1197 }
 0x680   : > { %v1199_v45 = vsub.f32 %v1189_v34, %v1198_v44 }
 0x682   : > { %v1200_v46 = vmul.f32 1.442695, %v1199_v45 }
 0x684   : > { %2739 = vpow2.f32 %v1200_v46 }
 0x691   : > { %v2740_v47 = vpop.eup %2739 }
 0x692   : > { %v1202_v48 = vsel %vm1195_vm6, %v2740_v47, 0.0  ;;  %v1205_v49 = vpack.c.bf16 %v2740_v47, %v2740_v47  ;;  %v1598_v47 = vld [vmem:[%s3716_s10 + $0x8] sm:$0xf] }
 0x693   : > { %1203 = vadd.xlane.f32.xlu0 %v1202_v48  ;;  %v1603_v48 = vsel %vm1262_vm7, %v1598_v47, 0  ;;  %v2731_v47 = vld [vmem:[%s3722_s16 + $0x28] sm:$0xff]  }
 0x694   : > { %2449 = vmatmul.mubr.msk.bf16.vlgmr.msra.gmra.mxu1 %vm1195_vm6, %v1205_v49 }
 0x695   : > { %2454 = vmatprep.mubr.msk.bf16.mxu1 %vm3127_vm4, %v3126_v10  ;;  %2453 = vmatpush3.bf16.msra.mxu1 %v1264_v52 }
 0x696   : > { %2464 = vmatprep.subr.bf16.mxu1 %v3126_v10 }
 0x697   : > { %1368 = vmax.xlane.f32.xlu0 %v1367_v50 }
 0x6ad   : > { %1483 = vrot.lane.b32.xlu0 %v3489_v30, %s3129_s25 }
 0x71c   : > { %v1204_v53 = vpop.xlane.xlu0 %1203 }
 0x720   : > { %v1369_v54 = vpop.xlane.xlu0 %1368 }
 0x721   : > { %v1370_v55 = vsub.f32 %v1361_v40, %v1369_v54  ;;  %v1137_v40 = vadd.f32 %v2322_v39, %v1129_v38 }
 0x723   : > { %v1371_v56 = vmul.f32 1.442695, %v1370_v55 }
 0x724   : > { %v1484_v7 = vpop.permute.xlu0 %1483 }
 0x725   : > { %2741 = vpow2.f32 %v1371_v56 }
 0x726   : > { %2743 = vrcp.f32 %v1204_v53 }
 0x732   : > { %v2742_v57 = vpop.eup %2741 }
 0x733   : > { %v1373_v58 = vsel %vm1195_vm6, %v2742_v57, 0.0  ;;  %v2744_v59 = vpop.eup %2743  ;;  %v1376_v5 = vpack.c.bf16 %v2742_v57, %v2742_v57 }
 0x734   : > { %1374 = vadd.xlane.f32.xlu0 %v1373_v58 }
 0x754   : > { %v1249_v60 = vpop.f32.mrf.mxu1 }
 0x755   : > { %v1256_v61 = vmul.f32 %v2744_v59, %v1249_v60 }
 0x756   : > { %v2450_v62 = vpop.f32.mrf.mxu1 }
 0x757   : > { %v1257_v0 = vpack.c.bf16 %v1256_v61, %v1256_v61  ;;  %v2726_v62 = vld [vmem:[#allocation2 + $0x38] sm:$0xff]  }
 0x758   : > { %v1252_v1 = vpop.f32.mrf.mxu1 }
 0x759   : > { %2455 = vmatmul.mubr.msk.bf16.vlgmr.msra.gmra.mxu1 %vm1148_vm5, %v1257_v0 }
 0x75a   : > { %2465 = vmatpush3.bf16.msra.mxu1 %v2722_v63  ;;  %v2451_v3 = vpop.f32.mrf.mxu1  ;;  %2466 = vmatprep.mubr.msk.bf16.mxu1 %vm3127_vm4, %v3126_v10 }
 0x75b   : > { %2476 = vmatprep.subr.bf16.mxu1 %v3126_v10 }
 0x761   : > { %2467 = vmatmul.mubr.msk.bf16.vlgmr.msra.gmra.mxu1 %vm1195_vm6, %v1376_v5 }
 0x762   : > { %2477 = vmatpush3.bf16.xpose.msra.mxu1 %v1494_v6  ;;  %2478 = vmatprep.mubr.msk.bf16.mxu1 %vm3127_vm4, %v3126_v10  ;;  %v1767_v6 = vld [vmem:[%s3716_s10 + $0xc] sm:$0xf] }
 0x763   : > { %2488 = vmatprep.subr.bf16.mxu1 %v3126_v10 }
 0x769   : > { %2479 = vmatmul.mubr.msk.bf16.vlgmr.msra.gmra.mxu1 %vm1148_vm5, %v1484_v7  ;;  %v1772_v7 = vsel %vm1262_vm7, %v1767_v6, 0 }
 0x76a   : > { %2490 = vmatprep.mubr.msk.bf16.mxu1 %vm3127_vm4, %v3126_v10  ;;  %2489 = vmatpush3.bf16.msra.mxu1 %v1603_v48  ;;  %v2732_v48 = vld [vmem:[%s3722_s16 + $0x20] sm:$0xff]  }
 0x76b   : > { %2500 = vmatprep.subr.bf16.mxu1 %v3126_v10 }
 0x7bd   : > { %v1375_v11 = vpop.xlane.xlu0 %1374 }
 0x7be   : > { %2745 = vrcp.f32 %v1375_v11 }
 0x7cb   : > { %v2746_v16 = vpop.eup %2745 }
 0x819   : > { %v1300_v12 = vpop.f32.mrf.mxu1 }
 0x81a   : > { %v1306_v41 = vadd.f32 %v1300_v12, %v1137_v40 }
 0x81b   : > { %v2456_v13 = vpop.f32.mrf.mxu1 }
 0x81d   : > { %v1303_v14 = vpop.f32.mrf.mxu1 }
 0x81f   : > { %v2457_v15 = vpop.f32.mrf.mxu1 }
 0x821   : > { %v1420_v17 = vpop.f32.mrf.mxu1 }
 0x822   : > { %v1427_v18 = vmul.f32 %v2746_v16, %v1420_v17 }
 0x823   : > { %v2468_v19 = vpop.f32.mrf.mxu1 }
 0x824   : > { %v1428_v20 = vpack.c.bf16 %v1427_v18, %v1427_v18 }
 0x825   : > { %v1423_v21 = vpop.f32.mrf.mxu1 }
 0x826   : > { %2473 = vmatmul.mubr.msk.bf16.vlgmr.msra.gmra.mxu0 %vm1148_vm5, %v1428_v20 }
 0x827   : > { %v2469_v22 = vpop.f32.mrf.mxu1  ;;  %2484 = vmatprep.mubr.msk.bf16.mxu0 %vm3127_vm4, %v3126_v10  ;;  %2483 = vmatpush3.bf16.msra.mxu0 %v2724_v28 }
 0x828   : > { %2494 = vmatprep.subr.bf16.mxu0 %v3126_v10 }
 0x829   : > { %v1530_v23 = vpop.f32.mrf.mxu1 }
 0x82a   : > { %v1536_v24 = vsel %vm1195_vm6, %v1530_v23, -inf }
 0x82b   : > { %1537 = vmax.xlane.f32.xlu1 %v1536_v24  ;;  %v2480_v25 = vpop.f32.mrf.mxu1 }
 0x82d   : > { %v1533_v26 = vpop.f32.mrf.mxu1 }
 0x82f   : > { %v2481_v27 = vpop.f32.mrf.mxu1 }
 0x83c   : > { %1652 = vrot.lane.b32.xlu1 %v3489_v30, %s3130_s24  ;;  %s3619_s24 = sadd.s32 %s3093_s21, %s2360_s3  ;;  %s2973_s21 = scalar_lea.vmem %s2972_s1, 256 }
 0x83d   : > { %s2361_s27 = sshll.u32 %s3619_s24, 7  ;;  %p2975_p10 = scmp.lt.s32.totalorder %s2973_s21, %s2967_s22 }
 0x83e   : > { %s2051_s17 = scalar_lea.hbm %s3779_s5, %s2361_s27 }
 0x83f   : > { %p2976_p12 = por %p2975_p10, %p2974_p3 }
 0x841   : > { %p2977_p5 = pnand %p2976_p12, %p2970_p8 }
 0x8b4   : > { %v1538_v29 = vpop.xlane.xlu1 %1537 }
 0x8b5   : > { %v1539_v31 = vsub.f32 %v1530_v23, %v1538_v29 }
 0x8b7   : > { %v1540_v32 = vmul.f32 1.442695, %v1539_v31 }
 0x8b8   : > { %v1653_v30 = vpop.permute.xlu1 %1652 }
 0x8b9   : > { %2747 = vpow2.f32 %v1540_v32 }
 0x8c6   : > { %v2748_v34 = vpop.eup %2747 }
 0x8c7   : > { %v1542_v35 = vsel %vm1195_vm6, %v2748_v34, 0.0  ;;  %v1545_v36 = vpack.c.bf16 %v2748_v34, %v2748_v34  ;;  %v2727_v34 = vld [vmem:[#allocation15 + $0x8] sm:$0xff]  }
 0x8c8   : > { %1543 = vadd.xlane.f32.xlu1 %v1542_v35  ;;  %v2728_v35 = vld [vmem:[#allocation15] sm:$0xff]  }
 0x8c9   : > { %2485 = vmatmul.mubr.msk.bf16.vlgmr.msra.gmra.mxu0 %vm1195_vm6, %v1545_v36  ;;  %v2729_v36 = vld [vmem:[%s3722_s16 + $0x38] sm:$0xff]  }
 0x8ca   : > { %2495 = vmatpush3.bf16.xpose.msra.mxu0 %v1663_v37  ;;  %2496 = vmatprep.mubr.msk.bf16.mxu0 %vm3127_vm4, %v3126_v10  ;;  %v2730_v37 = vld [vmem:[%s3722_s16 + $0x30] sm:$0xff]  }
 0x8cb   : > { %2506 = vmatprep.subr.bf16.mxu0 %v3126_v10 }
 0x8d1   : > { %2497 = vmatmul.mubr.msk.bf16.vlgmr.msra.gmra.mxu0 %vm1148_vm5, %v1653_v30 }
 0x8d2   : > { %2508 = vmatprep.mubr.msk.bf16.mxu0 %vm3127_vm4, %v3126_v10  ;;  %2507 = vmatpush3.bf16.msra.mxu0 %v1772_v7 }
 0x8d3   : > { %2520 = vmatprep.subr.bf16.mxu0 %v3126_v10 }
 0x8e6   : > { %v1470_v42 = vpop.f32.mrf.mxu0 }
 0x8e7   : > { %v1476_v43 = vadd.f32 %v1470_v42, %v1306_v41  ;;  %v2343_v41 = vld [vmem:[%s3718_s12] ss:$0 sm:$0xff] }
 0x8e8   : > { %v2474_v44 = vpop.f32.mrf.mxu0 }
 0x8ea   : > { %v1473_v45 = vpop.f32.mrf.mxu0 }
 0x8ec   : > { %v2475_v46 = vpop.f32.mrf.mxu0 }
 0x951   : > { %v1544_v49 = vpop.xlane.xlu1 %1543 }
 0x952   : > { %2749 = vrcp.f32 %v1544_v49  ;;  %v2733_v49 = vld [vmem:[%s3722_s16 + $0x18] sm:$0xff]  }
 0x95f   : > { %v2750_v50 = vpop.eup %2749 }
 0x989   : > { %v1589_v51 = vpop.f32.mrf.mxu0 }
 0x98a   : > { %v1596_v52 = vmul.f32 %v2750_v50, %v1589_v51  ;;  %v2734_v50 = vld [vmem:[%s3722_s16 + $0x10] sm:$0xff]   ;;  %v2735_v51 = vld [vmem:[%s3722_s16 + $0x8] sm:$0xff]  }
 0x98b   : > { %v2486_v53 = vpop.f32.mrf.mxu0 }
 0x98c   : > { %v1597_v54 = vpack.c.bf16 %v1596_v52, %v1596_v52  ;;  %v2736_v52 = vld [vmem:[%s3722_s16] sm:$0xff]  }
 0x98d   : > { %v1592_v55 = vpop.f32.mrf.mxu0  ;;  %v2346_v53 = vld [vmem:[%s3721_s15] ss:$0 sm:$0xff] }
 0x98e   : > { %2491 = vmatmul.mubr.msk.bf16.vlgmr.msra.gmra.mxu1 %vm1148_vm5, %v1597_v54 }
 0x98f   : > { %v2487_v56 = vpop.f32.mrf.mxu0  ;;  %2502 = vmatprep.mubr.msk.bf16.mxu1 %vm3127_vm4, %v3126_v10  ;;  %2501 = vmatpush3.bf16.msra.mxu1 %v2726_v62 }
 0x990   : > { %2512 = vmatprep.subr.bf16.mxu1 %v3126_v10 }
 0x991   : > { %v1699_v57 = vpop.f32.mrf.mxu0 }
 0x992   : > { %v1705_v58 = vsel %vm1195_vm6, %v1699_v57, -inf }
 0x993   : > { %1706 = vmax.xlane.f32.xlu0 %v1705_v58  ;;  %v2498_v59 = vpop.f32.mrf.mxu0 }
 0x995   : > { %v1702_v60 = vpop.f32.mrf.mxu0 }
 0x997   : > { %v2499_v61 = vpop.f32.mrf.mxu0 }
 0xa1c   : > { %v1707_v63 = vpop.xlane.xlu0 %1706 }
 0xa1d   : > { %v1708_v0 = vsub.f32 %v1699_v57, %v1707_v63 }
 0xa1f   : > { %v1709_v1 = vmul.f32 1.442695, %v1708_v0 }
 0xa21   : > { %2751 = vpow2.f32 %v1709_v1 }
 0xa2e   : > { %v2752_v3 = vpop.eup %2751 }
 0xa2f   : > { %v1711_v4 = vsel %vm1195_vm6, %v2752_v3, 0.0  ;;  %v1714_v5 = vpack.c.bf16 %v2752_v3, %v2752_v3 }
 0xa30   : > { %1712 = vadd.xlane.f32.xlu0 %v1711_v4 }
 0xa31   : > { %2503 = vmatmul.mubr.msk.bf16.vlgmr.msra.gmra.mxu1 %vm1195_vm6, %v1714_v5 }
 0xa32   : > { %2516 = vmatprep.mubr.msk.bf16.mxu1 %vm3127_vm4, %v3126_v10  ;;  %2513 = vmatpush3.bf16.msra.mxu1 %v2727_v34 }
 0xa33   : > { %2514 = vmatprep.subr.bf16.mxu1 %v3126_v10 }
 0xa36   : > { %2515 = vmatpush3.bf16.msra.mxu1 %v2728_v35 }
 0xa4e   : > { %v1639_v8 = vpop.f32.mrf.mxu1 }
 0xa4f   : > { %v1645_v9 = vadd.f32 %v1639_v8, %v1476_v43  ;;  %v2344_v43 = vld [vmem:[%s3719_s13] ss:$0 sm:$0xff] }
 0xa50   : > { %v2492_v11 = vpop.f32.mrf.mxu1 }
 0xa52   : > { %v1642_v12 = vpop.f32.mrf.mxu1 }
 0xa54   : > { %v2493_v13 = vpop.f32.mrf.mxu1 }
 0xab9   : > { %v1713_v14 = vpop.xlane.xlu0 %1712 }
 0xaba   : > { %2753 = vrcp.f32 %v1713_v14 }
 0xac7   : > { %v2754_v15 = vpop.eup %2753 }
 0xaf1   : > { %v1758_v16 = vpop.f32.mrf.mxu1 }
 0xaf2   : > { %v1765_v17 = vmul.f32 %v2754_v15, %v1758_v16 }
 0xaf3   : > { %v2504_v18 = vpop.f32.mrf.mxu1 }
 0xaf4   : > { %v1766_v19 = vpack.c.bf16 %v1765_v17, %v1765_v17 }
 0xaf5   : > { %v1761_v20 = vpop.f32.mrf.mxu1 }
 0xaf6   : > { %2509 = vmatmul.mubr.msk.bf16.vlgmr.msra.gmra.mxu0 %vm1148_vm5, %v1766_v19 }
 0xaf7   : > { %v2505_v21 = vpop.f32.mrf.mxu1  ;;  %2536 = vmatprep.mubr.msk.bf16.mxu0 %vm3127_vm4, %v3126_v10  ;;  %2521 = vmatpush3.bf16.msra.mxu0 %v2729_v36 }
 0xaf8   : > { %2522 = vmatprep.subr.bf16.mxu0 %v3126_v10 }
 0xafb   : > { %2523 = vmatpush3.bf16.msra.mxu0 %v2730_v37 }
 0xafc   : > { %2524 = vmatprep.subr.bf16.mxu0 %v3126_v10 }
 0xaff   : > { %2525 = vmatpush3.bf16.msra.mxu0 %v2731_v47 }
 0xb00   : > { %2526 = vmatprep.subr.bf16.mxu0 %v3126_v10 }
 0xb03   : > { %2527 = vmatpush3.bf16.msra.mxu0 %v2732_v48 }
 0xb04   : > { %2528 = vmatprep.subr.bf16.mxu0 %v3126_v10 }
 0xb07   : > { %2529 = vmatpush3.bf16.msra.mxu0 %v2733_v49 }
 0xb08   : > { %2530 = vmatprep.subr.bf16.mxu0 %v3126_v10 }
 0xb0b   : > { %2531 = vmatpush3.bf16.msra.mxu0 %v2734_v50 }
 0xb0c   : > { %2532 = vmatprep.subr.bf16.mxu0 %v3126_v10 }
 0xb0f   : > { %2533 = vmatpush3.bf16.msra.mxu0 %v2735_v51 }
 0xb10   : > { %2534 = vmatprep.subr.bf16.mxu0 %v3126_v10 }
 0xb13   : > { %2535 = vmatpush3.bf16.msra.mxu0 %v2736_v52 }
 0xbb6   : > { %v1808_v22 = vpop.f32.mrf.mxu0 }
 0xbb7   : > { %v1814_v23 = vadd.f32 %v1808_v22, %v1645_v9 }
 0xbb8   : > { %v2510_v24 = vpop.f32.mrf.mxu0 }
 0xbb9   : > { %1815 = vst.msk [vmem:[%s3431_s7] sm:$0xff] %vm1032_vm3, %v1814_v23  ;;  %v1818_v25 = vsel %vm1032_vm3, %v1814_v23, 0.0 }
 0xbba   : > { %1819 = vadd.xlane.f32.xlu0 %v1818_v25  ;;  %v1811_v26 = vpop.f32.mrf.mxu0 }
 0xbbc   : > { %v2511_v27 = vpop.f32.mrf.mxu0 }
 0xc43   : > { %v1820_v28 = vpop.xlane.xlu0 %1819 }
 0xc44   : > { %v1821_v29 = vmul.f32 0.03125, %v1820_v28 }
 0xc46   : > { %v1822_v31 = vsub.f32 %v1814_v23, %v1821_v29 }
 0xc48   : > { %v1823_v32 = vmul.f32 %v1822_v31, %v1822_v31 }
 0xc4a   : > { %v1824_v33 = vsel %vm1032_vm3, %v1823_v32, 0.0 }
 0xc4b   : > { %1825 = vadd.xlane.f32.xlu0 %v1824_v33 }
 0xcd4   : > { %v1826_v30 = vpop.xlane.xlu0 %1825 }
 0xcd5   : > { %v1827_v38 = vmul.f32 0.03125, %v1826_v30 }
 0xcd7   : > { %v1828_v39 = vadd.f32 1e-05, %v1827_v38 }
 0xcd9   : > { %2755 = vrsqrt.f32 %v1828_v39 }
 0xce6   : > { %v2756_v40 = vpop.eup %2755 }
 0xce7   : > { %v1830_v42 = vmul.f32 %v2756_v40, %v1822_v31 }
 0xce9   : > { %v1837_v44 = vmul.f32 %v2343_v41, %v1830_v42 }
 0xceb   : > { %v1844_v45 = vadd.f32 %v2344_v43, %v1837_v44 }
 0xced   : > { %v1845_v46 = vpack.c.bf16 %v1844_v45, %v1844_v45 }
 0xcef   : > { %2517 = vmatmul.mubr.msk.bf16.vlgmr.msra.gmra.mxu1 %vm1032_vm3, %v1845_v46 }
 0xdaf   : > { %v1914_v54 = vpop.f32.mrf.mxu1 }
 0xdb0   : > { %v1915_v55 = vadd.f32 %v2346_v53, %v1914_v54 }
 0xdb1   : > { %v2518_v56 = vpop.f32.mrf.mxu1 }
 0xdb2   : > { %v1921_v57 = vmul.f32 0.70710677, %v1915_v55  ;;  %v1920_v60 = vmul.f32 0.5, %v1915_v55 }
 0xdb3   : > { %v1917_v58 = vpop.f32.mrf.mxu1 }
 0xdb4   : > { %2757 = verf.f32 %v1921_v57 }
 0xdb5   : > { %v2519_v10 = vpop.f32.mrf.mxu1 }
 0xdc1   : > { %v2758_v59 = vpop.eup %2757 }
 0xdc2   : > { %v1923_v61 = vadd.f32 1.0, %v2758_v59 }
 0xdc4   : > { %v1924_v62 = vmul.f32 %v1923_v61, %v1920_v60 }
 0xdc6   : > { %v1925_v63 = vpack.c.bf16 %v1924_v62, %v1924_v62 }
 0xdc8   : > { %2537 = vmatmul.mubr.bf16.vlgmr.msra.gmra.mxu0 %v1925_v63 }
 0xdc9   : > { %2980 = shalt.err (!%p2977_p5)
}
 0xdca   : > { %s2981_s7 = scalar_lea.hbm %s2051_s17, 128  ;;  %s2985_s26 = scalar_lea.hbm %s3779_s5, 512 }
 0xdcb   : > { %p2982_p6 = scmp.ne.s32.totalorder %s2051_s17, %s2981_s7  ;;  %p2986_p0 = scmp.lt.s32.totalorder %s2051_s17, %s3779_s5 }
 0xdcc   : > { %p2987_p9 = scmp.lt.s32.totalorder %s2985_s26, %s2981_s7 }
 0xdcd   : > { %p2983_p7 = pnand %p2982_p6, %p3780_p2 }
 0xdce   : > { %p2988_p11 = por %p2987_p9, %p2986_p0 }
 0xdcf   : > { %p2984_p1 = pneg %p2983_p7 }
 0xdd1   : > { %p2989_p13 = pnand %p2988_p11, %p2984_p1 }
 0xdd3   : > { %2992 = shalt.err (!%p2989_p13)
}
 0xdd4   : > { %2572 = dma.vmem_to_hbm [thread:$0]  (%p3780_p2), %s2054_s23, 128, %s2051_s17, %s2033_s20  }
 0xdd5   : > { %s3781_s22 = sld [smem:[#allocation44_spill]]  ;;  %s2068_s28 = sshll.u32 %s3433_s8, 4  ;;  %s3653_s28 = int_to_ptr.vmem [resolvable:$true] %s2068_s28 }
 0xdd6   : > { %s3782_s7 = sld [smem:[#allocation46_spill]]  ;;  %s2038_s23 = scalar_lea.sflag [#allocation19], %s3414_s19 }
 0xdd7   : > { %s2993_s17 = scalar_lea.vmem %s3653_s28, 128  ;;  %s3132_s24 = smov [#allocation18]  }
 0xdd8   : > { %p2994_p4 = scmp.ne.s32.totalorder %s3653_s28, %s2993_s17  ;;  %s2997_s20 = sshll.u32 %s3132_s24, 4  ;;  %s2998_s20 = int_to_ptr.vmem [resolvable:$false] %s2997_s20 }
 0xdd9   : > { %p3000_p10 = scmp.lt.s32.totalorder %s3653_s28, %s2998_s20 }
 0xdda   : > { %p2995_p8 = pnand %p2994_p4, %p3780_p2 }
 0xddb   : > { %v2345_v0 = vld [vmem:[%s3781_s22] ss:$0 sm:$0xff] }
 0xddc   : > { %v1853_v1 = vadd.f32 %v2345_v0, %v3462_v2  ;;  %s3651_s25 = scalar_lea.hbm %s3782_s7, %s2361_s27  ;;  %p2996_p3 = pneg %p2995_p8 }
 0xddd   : > { %s2999_s27 = scalar_lea.vmem %s2998_s20, 256 }
 0xdde   : > { %p3001_p12 = scmp.lt.s32.totalorder %s2999_s27, %s2993_s17 }
 0xde0   : > { %p3002_p5 = por %p3001_p12, %p3000_p10 }
 0xde2   : > { %p3003_p6 = pnand %p3002_p5, %p2996_p3 }
 0xe88   : > { %v2024_v3 = vpop.f32.mrf.mxu0 }
 0xe89   : > { %v2030_v4 = vadd.f32 %v2024_v3, %v1853_v1 }
 0xe8a   : > { %v2538_v5 = vpop.f32.mrf.mxu0 }
 0xe8b   : > { %2031 = vst.msk [vmem:[%s3433_s8] sm:$0xff] %vm1032_vm3, %v2030_v4 }
 0xe8c   : > { %v2027_v6 = vpop.f32.mrf.mxu0 }
 0xe8d   : > { %3006 = shalt.err (!%p3003_p6)
}
 0xe8e   : > { %s3007_s8 = scalar_lea.hbm %s3651_s25, 128  ;;  %s3011_s26 = scalar_lea.hbm %s3782_s7, 512 }
 0xe8f   : > { %p3008_p7 = scmp.ne.s32.totalorder %s3651_s25, %s3007_s8  ;;  %p3012_p9 = scmp.lt.s32.totalorder %s3651_s25, %s3782_s7 }
 0xe90   : > { %p3013_p11 = scmp.lt.s32.totalorder %s3011_s26, %s3007_s8 }
 0xe91   : > { %p3009_p1 = pnand %p3008_p7, %p3780_p2 }
 0xe92   : > { %p3014_p13 = por %p3013_p11, %p3012_p9 }
 0xe93   : > { %p3010_p0 = pneg %p3009_p1 }
 0xe95   : > { %p3015_p4 = pnand %p3014_p13, %p3010_p0 }
 0xe97   : > { %3018 = shalt.err (!%p3015_p4)
}
 0xe98   : > { %2573 = dma.vmem_to_hbm [thread:$0]  (%p3780_p2), %s3653_s28, 128, %s3651_s25, %s2038_s23   ;;  %v2539_v2 = vpop.f32.mrf.mxu0 }
 0xe99 PF: > { %s3783_s0 = sld [smem:[#allocation31_spill]] }
 0xe9a   : > { %s3784_s2 = sld [smem:[#allocation27_spill]] }
 0xe9b   : > { %s3785_s22 = sld [smem:[#allocation34_spill]] }
 0xe9f   : > { %p2624_p8 = scmp.ge.s32.totalorder %s3783_s0, 2 }
 0xea0   : > { %s2080_s1 = sand.u32 1, %s3784_s2  }
 0xea1   : > { %p3786_p3 = scmp.ne.s32.totalorder %s3785_s22, 0  ;;  %s2081_s21 = scalar_lea.sflag [#allocation5], %s2080_s1 }
 0xea3   : > { %p2602_p10 = pnand %p2624_p8, %p3786_p3 }
 0xea5   : > { %p2603_p12 = pneg %p2602_p10 }
 0xea7   : > { %3072 = dma.done.wait (%p2603_p12), %s2081_s21, 128  }
 0xea8   : > { %3074 = vsyncadd (%p2603_p12), %s2081_s21, 4294967168  ;;  %s2090_s17 = scalar_lea.sflag [#allocation19], %s2080_s1 }
 0xea9   : > { %3076 = dma.done.wait (%p2603_p12), %s2090_s17, 128  }
 0xeaa   : > { %3078 = vsyncadd (%p2603_p12), %s2090_s17, 4294967168  ;;  %s41_s23 = sadd.s32 1, %s3783_s0   ;;  %s3787_s29 = sld [smem:[#allocation28_spill]] }
 0xeab   : > { %p38_p5 = scmp.ge.s32.totalorder %s41_s23, 6   ;;  %s3788_s20 = sld [smem:[#allocation35_spill]] }
 0xeac   : > { %s3789_s21 = sld [smem:[#allocation29_spill]]  ;;  %s3793_s0 = smov %s3085_s30 }
 0xead   : > { %s3790_s1 = sld [smem:[#allocation30_spill]]  ;;  %40 = sbr.rel (!%p38_p5) target bundleno = 24 (0x18), region = 199 }
 0xeae   : > { %s3791_s22 = sld [smem:[#allocation32_spill]] }
 0xeaf   : > { %s3792_s2 = sld [smem:[#allocation33_spill]] }
 0xeb0   : > { %s3794_s30 = smov %s3787_s29 }
 0xeb2   :  { %2095 = vsyncpa [#allocation4], 1 }
 0xeb3   :  { %2097 = vsyncpa [#allocation4 + $0x1], 1 }
 0xeb4   :  { %2098 = vsyncpa [#allocation7], 1 }
 0xeb5   :  { %2099 = vsyncpa [#allocation10], 1 }
 0xeb6   :  { %2100 = vsyncpa [#allocation13], 1 }
 0xeb7   :  { %2101 = vsyncpa [#allocation16], 1 }
 0xeb8   :  { %2102 = vsyncpa [#allocation5], 1 }
 0xeb9   :  { %2104 = vsyncpa [#allocation5 + $0x1], 1 }
 0xeba   :  { %2105 = vsyncpa [#allocation19], 1 }
 0xebb   :  { %2107 = vsyncpa [#allocation19 + $0x1], 1 }

</bundles_post_ra>
